<compile_context>
chip_gen: v7x
topology: tpu7x:2x2x1
jax: 0.10.0
libtpu: 0.0.40
codegen_flags: <defaults>
</compile_context>

<pallas_src>
import math
from functools import partial

import numpy as np
import jax
import jax.numpy as jnp
from jax.experimental import pallas as pl
from jax.experimental.pallas import tpu as pltpu  # noqa: F401  (TPU backend)


def _softmax_last(s):
    m = jnp.max(s, axis=-1, keepdims=True)
    e = jnp.exp(s - m)
    # EUP reciprocal instead of a VALU divide (perf review item).
    return e * pl.reciprocal(jnp.sum(e, axis=-1, keepdims=True), approx=True)


# ---------------------------------------------------------------------------
# Primary kernel: fully batched, loop-free (except a trivial per-batch store
# of the 3x3 temporal attention blocks).
# ---------------------------------------------------------------------------
def _sfta_fused_kernel(xg_ref, xt_ref, wcf_ref, b_ref, m3_ref, rsel_ref,
                       cfold_ref, s_ref, gr_ref, fr_ref, te_ref, *, batch):
    """Fused forward pass (single invocation, everything VMEM-resident).

    xg_ref  : (4, 32, N)   xg[c, f, n] = x[b, t, f, c],  n = 3*b + t
    xt_ref  : (4, N, 32)   xt[c, n, f] = x[b, t, f, c]
    wcf_ref : (4, 32, 3L)  wcf[c, f, t*L + l] = W[t, f, c, l]   (head weight)
    b_ref   : (1, L)       head bias
    m3_ref  : (N, 3L)      m3[n, m] = 1 if m // L == n % 3      (t-block select)
    rsel_ref: (B, N)       rsel[b, n] = 1 if n // 3 == b        (row-group sum)
    cfold_ref:(3L, L)      cfold[t*L+l, l'] = 1 if l == l'      (L-block fold)
    s_ref   : (B, L)       softmax(z_flat @ W + b)
    gr_ref  : (4, 32, 32)  graph attention
    fr_ref  : (N, 32, 32)  frequency attention (wrapper reshapes to (B,3,32,32))
    te_ref  : (B, 3, 3)    temporal attention
    """
    n_ch, n_freq, n_tok = xg_ref.shape
    n_lab = b_ref.shape[-1]

    xg16 = xg_ref[...].astype(jnp.bfloat16)
    xt16 = xt_ref[...].astype(jnp.bfloat16)

    # ---- Graph attention: batched over the 4 channels (single MXU einsums).
    ga_scale = 1.0 / math.sqrt(float(n_tok))
    s_g = jnp.einsum('cfn,cgn->cfg', xg16, xg16,
                     preferred_element_type=jnp.float32) * ga_scale
    a_g = _softmax_last(s_g)                                   # (4, 32, 32) f32
    gr_ref[...] = a_g                                          # single store
    # y[c, n, f] = sum_g a_g[c, f, g] * x[c, g, n]
    yt = jnp.einsum('cng,cfg->cnf', xt16, a_g.astype(jnp.bfloat16),
                    preferred_element_type=jnp.float32)        # (4, N, 32)
    yt16 = yt.astype(jnp.bfloat16)

    # ---- Frequency attention: batched over all N = 3B tokens.
    fa_scale = 1.0 / math.sqrt(float(n_ch))
    s_f = jnp.einsum('cnf,cng->nfg', yt16, yt16,
                     preferred_element_type=jnp.float32) * fa_scale
    a_f = _softmax_last(s_f)                                   # (N, 32, 32)
    fr_ref[...] = a_f                                          # single store
    # z[n, c, f] = sum_g a_f[n, f, g] * y[c, n, g]
    z = jnp.einsum('cng,nfg->ncf', yt16, a_f.astype(jnp.bfloat16),
                   preferred_element_type=jnp.float32)         # (N, 4, 32)
    z16 = z.astype(jnp.bfloat16)

    # ---- Temporal attention: full token-token gram, per-batch 3x3 blocks.
    ta_scale = 1.0 / math.sqrt(float(n_ch * n_freq))           # 1/sqrt(128)
    t_cnm = jnp.einsum('ncf,mcf->cnm', z16, z16,
                       preferred_element_type=jnp.float32)     # (4, N, N)
    g_tok = jnp.sum(t_cnm, axis=0) * ta_scale                  # (N, N)
    for bi in range(batch):
        te_ref[bi] = _softmax_last(g_tok[3 * bi:3 * bi + 3,
                                         3 * bi:3 * bi + 3])

    # ---- Classifier head: one batched contraction + tiny selector matmuls.
    # p_tok[n, t*L + l] = sum_{c,f} z[n, c, f] * W[t, f, c, l]
    v_cnm = jnp.einsum('ncf,cfm->cnm', z16,
                       wcf_ref[...].astype(jnp.bfloat16),
                       preferred_element_type=jnp.float32)     # (4, N, 3L)
    p_tok = jnp.sum(v_cnm, axis=0)                             # (N, 3L)
    p_sel = p_tok * m3_ref[...]                                # keep t == n%3 block
    logits = jnp.dot(jnp.dot(rsel_ref[...], p_sel,
                             preferred_element_type=jnp.float32),
                     cfold_ref[...],
                     preferred_element_type=jnp.float32) + b_ref[...]
    s_ref[...] = _softmax_last(logits)


# ---------------------------------------------------------------------------
# Fallback kernel: per-token formulation (previously validated to lower and
# run cleanly), only used if the batched path fails to lower / verify.
# ---------------------------------------------------------------------------
def _sfta_looped_kernel(xg_ref, xt_ref, wcf_ref, b_ref,
                        s_ref, gr_ref, fr_ref, te_ref, *, batch):
    n_ch, n_freq, n_tok = xg_ref.shape
    n_lab = b_ref.shape[-1]

    xg = xg_ref[...].astype(jnp.float32)
    xt = xt_ref[...].astype(jnp.float32)

    ga_scale = 1.0 / math.sqrt(float(n_tok))
    s_g = jnp.einsum('cfn,cgn->cfg', xg, xg,
                     preferred_element_type=jnp.float32) * ga_scale
    a_g = _softmax_last(s_g)
    gr_ref[...] = a_g
    yt = jnp.einsum('cng,cfg->cnf', xt, a_g,
                    preferred_element_type=jnp.float32)        # (4, N, 32)

    fa_scale = 1.0 / math.sqrt(float(n_ch))
    z_t = []
    for n in range(n_tok):
        m = jnp.concatenate([yt[c][n:n + 1, :] for c in range(n_ch)], axis=0)
        s_f = jnp.dot(m.T, m, preferred_element_type=jnp.float32) * fa_scale
        a_f = _softmax_last(s_f)
        fr_ref[n] = a_f
        z_t.append(jnp.dot(m, a_f.T, preferred_element_type=jnp.float32))

    ta_scale = 1.0 / math.sqrt(float(n_ch * n_freq))
    logit_rows = []
    for bi in range(batch):
        zb = [jnp.concatenate([z_t[3 * bi + t][c:c + 1, :] for t in range(3)],
                              axis=0) for c in range(n_ch)]
        gram = jnp.dot(zb[0], zb[0].T, preferred_element_type=jnp.float32)
        for c in range(1, n_ch):
            gram = gram + jnp.dot(zb[c], zb[c].T,
                                  preferred_element_type=jnp.float32)
        te_ref[bi] = _softmax_last(gram * ta_scale)

        acc = b_ref[...]
        for c in range(n_ch):
            p = jnp.dot(zb[c], wcf_ref[c], preferred_element_type=jnp.float32)
            acc = acc + (p[0:1, 0:n_lab]
                         + p[1:2, n_lab:2 * n_lab]
                         + p[2:3, 2 * n_lab:3 * n_lab])
        logit_rows.append(acc)

    logits = jnp.concatenate(logit_rows, axis=0)
    s_ref[...] = _softmax_last(logits)


# ---------------------------------------------------------------------------
# Wrapper
# ---------------------------------------------------------------------------
def _vmem_spec(shape):
    zeros = (0,) * len(shape)
    return pl.BlockSpec(shape, lambda: zeros)


def _sfta_forward(x, w, b, *, fused=True):
    """x: (B, 3, 32, 4) f32, w: (384, L) f32 (in, out), b: (1, L) f32."""
    batch = x.shape[0]
    n_tok = 3 * batch
    n_lab = w.shape[1]

    # One-time KB-sized relayouts of the inputs/params only (cheap XLA ops);
    # all stage-to-stage intermediates stay inside the fused kernel's VMEM.
    xg = jnp.transpose(x, (3, 2, 0, 1)).reshape(4, 32, n_tok)   # (4, 32, N)
    xt = jnp.transpose(x, (3, 0, 1, 2)).reshape(4, n_tok, 32)   # (4, N, 32)
    w4 = w.reshape(3, 32, 4, n_lab)                             # W[t, f, c, l]
    wcf = jnp.transpose(w4, (2, 1, 0, 3)).reshape(4, 32, 3 * n_lab)

    out_shape = (
        jax.ShapeDtypeStruct((batch, n_lab), jnp.float32),
        jax.ShapeDtypeStruct((4, 32, 32), jnp.float32),
        jax.ShapeDtypeStruct((n_tok, 32, 32), jnp.float32),
        jax.ShapeDtypeStruct((batch, 3, 3), jnp.float32),
    )
    out_specs = (
        _vmem_spec((batch, n_lab)),
        _vmem_spec((4, 32, 32)),
        _vmem_spec((n_tok, 32, 32)),
        _vmem_spec((batch, 3, 3)),
    )

    if fused:
        # Tiny constant selector matrices for the loop-free head combine.
        m3 = jnp.asarray(np.arange(n_tok)[:, None] % 3
                         == np.arange(3 * n_lab)[None, :] // n_lab,
                         dtype=jnp.float32)                     # (N, 3L)
        rsel = jnp.asarray(np.arange(batch)[:, None]
                           == np.arange(n_tok)[None, :] // 3,
                           dtype=jnp.float32)                   # (B, N)
        cfold = jnp.asarray(np.arange(3 * n_lab)[:, None] % n_lab
                            == np.arange(n_lab)[None, :],
                            dtype=jnp.float32)                  # (3L, L)
        kernel = partial(_sfta_fused_kernel, batch=batch)
        inputs = (xg, xt, wcf, b, m3, rsel, cfold)
    else:
        kernel = partial(_sfta_looped_kernel, batch=batch)
        inputs = (xg, xt, wcf, b)

    in_specs = [_vmem_spec(tuple(a.shape)) for a in inputs]

    s, gr_att, fr_att, te_att = pl.pallas_call(
        kernel,
        out_shape=out_shape,
        in_specs=in_specs,
        out_specs=out_specs,
    )(*inputs)
    return s, gr_att, fr_att.reshape(batch, 3, 32, 32), te_att


def _reference_forward(x, w, b):
    """Pure-JAX reference of the same math (for correctness checking)."""
    batch = x.shape[0]
    xg = jnp.transpose(x, (3, 2, 0, 1)).reshape(4, 32, -1)
    n = xg.shape[-1]
    a_g = jax.nn.softmax(jnp.einsum('cfn,cgn->cfg', xg, xg) / math.sqrt(n), -1)
    y = jnp.einsum('cfg,cgn->cfn', a_g, xg)
    y = jnp.transpose(y.reshape(4, 32, batch, 3), (2, 3, 1, 0))       # (B,3,32,4)
    a_f = jax.nn.softmax(jnp.einsum('btfc,btgc->btfg', y, y) / 2.0, -1)
    z = jnp.einsum('btfg,btgc->btfc', a_f, y)                         # (B,3,32,4)
    zt = z.reshape(batch, 3, -1)
    a_t = jax.nn.softmax(
        jnp.einsum('btd,bud->btu', zt, zt) / math.sqrt(zt.shape[-1]), -1)
    logits = z.reshape(batch, -1) @ w + b
    return jax.nn.softmax(logits, axis=-1), a_g, a_f, a_t


if __name__ == "__main__":
    key = jax.random.PRNGKey(0)
    k_x, k_w, k_b = jax.random.split(key, 3)

    batch = 2
    hidden_dim = 4 * 3 * 32     # 384
    num_labels = 2

    x = jax.random.normal(k_x, (batch, 3, 32, 4), dtype=jnp.float32)
    # Linear params stored as (in, out): z_flat @ w + b == torch Linear(z_flat)
    w = jax.random.normal(k_w, (hidden_dim, num_labels), dtype=jnp.float32) * 0.05
    b = jax.random.normal(k_b, (1, num_labels), dtype=jnp.float32) * 0.05

    ref_outs = _reference_forward(x, w, b)

    def _run(fused):
        fwd = jax.jit(partial(_sfta_forward, fused=fused))
        outs = fwd(x, w, b)
        jax.block_until_ready(outs)
        names = ("s", "gr", "fr", "te")
        for name, got, ref in zip(names, outs, ref_outs):
            assert got.shape == ref.shape, (name, got.shape, ref.shape)
            err = float(jnp.max(jnp.abs(got - ref)))
            # All outputs are post-softmax probabilities (<= 1); 2e-2 absolute
            # tolerance absorbs bf16 MXU operands + approx reciprocal.
            assert err < 2e-2, (name, err)
        return outs

    try:
        outs = _run(fused=True)
    except Exception:
        # TODO(synk): the fully-batched path relies on dot_general dimension
        # numbers (non-leading batch dims) whose Mosaic lowering support can
        # vary across Pallas versions; fall back to the per-token formulation
        # (previously verified on-TPU) if lowering / verification fails.
        outs = _run(fused=False)

    s, gr_att, fr_att, te_att = outs
    assert s.shape == (batch, num_labels)
    assert gr_att.shape == (4, 32, 32)
    assert fr_att.shape == (batch, 3, 32, 32)
    assert te_att.shape == (batch, 3, 3)

    print("KERNEL_OK")
</pallas_src>

<mosaic_0001>
module attributes {stable_mosaic.version = 11 : i64} {
  func.func @_sfta_fused_kernel(%arg0: memref<4x32x6xf32, #tpu.memory_space<vmem>>, %arg1: memref<4x6x32xf32, #tpu.memory_space<vmem>>, %arg2: memref<4x32x6xf32, #tpu.memory_space<vmem>>, %arg3: memref<1x2xf32, #tpu.memory_space<vmem>>, %arg4: memref<6x6xf32, #tpu.memory_space<vmem>>, %arg5: memref<2x6xf32, #tpu.memory_space<vmem>>, %arg6: memref<6x2xf32, #tpu.memory_space<vmem>>, %arg7: memref<2x2xf32, #tpu.memory_space<vmem>>, %arg8: memref<4x32x32xf32, #tpu.memory_space<vmem>>, %arg9: memref<6x32x32xf32, #tpu.memory_space<vmem>>, %arg10: memref<2x3x3xf32, #tpu.memory_space<vmem>>) attributes {dimension_semantics = [], scalar_prefetch = 0 : i64, scratch_operands = 0 : i64, tpu.core_type = #tpu.core_type<tc>} {
    %c0 = arith.constant 0 : index
    %c0_0 = arith.constant 0 : index
    %c0_1 = arith.constant 0 : index
    %0 = vector.load %arg0[%c0, %c0_0, %c0_1] : memref<4x32x6xf32, #tpu.memory_space<vmem>>, vector<4x32x6xf32>
    %1 = arith.truncf %0 : vector<4x32x6xf32> to vector<4x32x6xbf16>
    %c0_2 = arith.constant 0 : index
    %c0_3 = arith.constant 0 : index
    %c0_4 = arith.constant 0 : index
    %2 = vector.load %arg1[%c0_2, %c0_3, %c0_4] : memref<4x6x32xf32, #tpu.memory_space<vmem>>, vector<4x6x32xf32>
    %3 = arith.truncf %2 : vector<4x6x32xf32> to vector<4x6x32xbf16>
    "tpu.trace_start"() <{level = 10 : i32, message = "cfn,cgn->cfg"}> : () -> ()
    %cst = arith.constant dense<0.000000e+00> : vector<4x32x32xf32>
    %4 = tpu.matmul %1, %1, %cst {dimension_numbers = #tpu.dot_dimension_numbers<[2], [2], [1], [1], [0, 0, 0, 1, 1, 1], [0], [0]>} : vector<4x32x6xbf16>, vector<4x32x6xbf16>, vector<4x32x32xf32> -> vector<4x32x32xf32>
    "tpu.trace_stop"() : () -> ()
    %cst_5 = arith.constant 0.408248305 : f32
    %5 = vector.broadcast %cst_5 : f32 to vector<4x32x32xf32>
    %6 = arith.mulf %4, %5 : vector<4x32x32xf32>
    %cst_6 = arith.constant dense<0xFF800000> : vector<4x32xf32>
    %7 = vector.multi_reduction <maximumf>, %6, %cst_6 [2] : vector<4x32x32xf32> to vector<4x32xf32>
    %8 = vector.shape_cast %7 : vector<4x32xf32> to vector<4x32x1xf32>
    %9 = vector.broadcast %8 : vector<4x32x1xf32> to vector<4x32x32xf32>
    %10 = arith.subf %6, %9 : vector<4x32x32xf32>
    %11 = math.exp %10 : vector<4x32x32xf32>
    %cst_7 = arith.constant dense<0.000000e+00> : vector<4x32xf32>
    %12 = vector.multi_reduction <add>, %11, %cst_7 [2] : vector<4x32x32xf32> to vector<4x32xf32>
    %13 = vector.shape_cast %12 : vector<4x32xf32> to vector<4x32x1xf32>
    %14 = tpu.reciprocal %13 {approx = true} : vector<4x32x1xf32> -> vector<4x32x1xf32>
    %15 = vector.broadcast %14 : vector<4x32x1xf32> to vector<4x32x32xf32>
    %16 = arith.mulf %11, %15 : vector<4x32x32xf32>
    %c0_8 = arith.constant 0 : index
    %c0_9 = arith.constant 0 : index
    %c0_10 = arith.constant 0 : index
    %17 = vector.load %arg8[%c0_8, %c0_9, %c0_10] : memref<4x32x32xf32, #tpu.memory_space<vmem>>, vector<4x32x32xf32>
    tpu.vector_store %arg8[%c0_8, %c0_9, %c0_10], %16 {strides = array<i32>} : memref<4x32x32xf32, #tpu.memory_space<vmem>>, vector<4x32x32xf32>,
    %18 = arith.truncf %16 : vector<4x32x32xf32> to vector<4x32x32xbf16>
    "tpu.trace_start"() <{level = 10 : i32, message = "cng,cfg->cnf"}> : () -> ()
    %cst_11 = arith.constant dense<0.000000e+00> : vector<4x6x32xf32>
    %19 = tpu.matmul %3, %18, %cst_11 {dimension_numbers = #tpu.dot_dimension_numbers<[2], [2], [1], [1], [0, 0, 0, 1, 1, 1], [0], [0]>} : vector<4x6x32xbf16>, vector<4x32x32xbf16>, vector<4x6x32xf32> -> vector<4x6x32xf32>
    "tpu.trace_stop"() : () -> ()
    %20 = arith.truncf %19 : vector<4x6x32xf32> to vector<4x6x32xbf16>
    "tpu.trace_start"() <{level = 10 : i32, message = "cnf,cng->nfg"}> : () -> ()
    %cst_12 = arith.constant dense<0.000000e+00> : vector<6x32x32xf32>
    %21 = tpu.matmul %20, %20, %cst_12 {dimension_numbers = #tpu.dot_dimension_numbers<[0], [0], [2], [2], [0, 1, 0, 2, 1, 2], [1], [1]>} : vector<4x6x32xbf16>, vector<4x6x32xbf16>, vector<6x32x32xf32> -> vector<6x32x32xf32>
    "tpu.trace_stop"() : () -> ()
    %cst_13 = arith.constant 5.000000e-01 : f32
    %22 = vector.broadcast %cst_13 : f32 to vector<6x32x32xf32>
    %23 = arith.mulf %21, %22 : vector<6x32x32xf32>
    %cst_14 = arith.constant dense<0xFF800000> : vector<6x32xf32>
    %24 = vector.multi_reduction <maximumf>, %23, %cst_14 [2] : vector<6x32x32xf32> to vector<6x32xf32>
    %25 = vector.shape_cast %24 : vector<6x32xf32> to vector<6x32x1xf32>
    %26 = vector.broadcast %25 : vector<6x32x1xf32> to vector<6x32x32xf32>
    %27 = arith.subf %23, %26 : vector<6x32x32xf32>
    %28 = math.exp %27 : vector<6x32x32xf32>
    %cst_15 = arith.constant dense<0.000000e+00> : vector<6x32xf32>
    %29 = vector.multi_reduction <add>, %28, %cst_15 [2] : vector<6x32x32xf32> to vector<6x32xf32>
    %30 = vector.shape_cast %29 : vector<6x32xf32> to vector<6x32x1xf32>
    %31 = tpu.reciprocal %30 {approx = true} : vector<6x32x1xf32> -> vector<6x32x1xf32>
    %32 = vector.broadcast %31 : vector<6x32x1xf32> to vector<6x32x32xf32>
    %33 = arith.mulf %28, %32 : vector<6x32x32xf32>
    %c0_16 = arith.constant 0 : index
    %c0_17 = arith.constant 0 : index
    %c0_18 = arith.constant 0 : index
    %34 = vector.load %arg9[%c0_16, %c0_17, %c0_18] : memref<6x32x32xf32, #tpu.memory_space<vmem>>, vector<6x32x32xf32>
    tpu.vector_store %arg9[%c0_16, %c0_17, %c0_18], %33 {strides = array<i32>} : memref<6x32x32xf32, #tpu.memory_space<vmem>>, vector<6x32x32xf32>,
    %35 = arith.truncf %33 : vector<6x32x32xf32> to vector<6x32x32xbf16>
    "tpu.trace_start"() <{level = 10 : i32, message = "cng,nfg->ncf"}> : () -> ()
    %cst_19 = arith.constant dense<0.000000e+00> : vector<6x4x32xf32>
    %36 = tpu.matmul %20, %35, %cst_19 {dimension_numbers = #tpu.dot_dimension_numbers<[2], [2], [0], [1], [0, 1, 0, 0, 1, 1], [1], [0]>} : vector<4x6x32xbf16>, vector<6x32x32xbf16>, vector<6x4x32xf32> -> vector<6x4x32xf32>
    "tpu.trace_stop"() : () -> ()
    %37 = arith.truncf %36 : vector<6x4x32xf32> to vector<6x4x32xbf16>
    "tpu.trace_start"() <{level = 10 : i32, message = "ncf,mcf->cnm"}> : () -> ()
    %cst_20 = arith.constant dense<0.000000e+00> : vector<4x6x6xf32>
    %38 = tpu.matmul %37, %37, %cst_20 {dimension_numbers = #tpu.dot_dimension_numbers<[2], [2], [0], [0], [0, 1, 0, 0, 1, 0], [1], [1]>} : vector<6x4x32xbf16>, vector<6x4x32xbf16>, vector<4x6x6xf32> -> vector<4x6x6xf32>
    "tpu.trace_stop"() : () -> ()
    %cst_21 = arith.constant dense<0.000000e+00> : vector<6x6xf32>
    %39 = vector.multi_reduction <add>, %38, %cst_21 [0] : vector<4x6x6xf32> to vector<6x6xf32>
    %cst_22 = arith.constant 0.0883883461 : f32
    %40 = vector.broadcast %cst_22 : f32 to vector<6x6xf32>
    %41 = arith.mulf %39, %40 : vector<6x6xf32>
    %42 = vector.extract_strided_slice %41 {offsets = [0, 0], sizes = [3, 3], strides = [1, 1]} : vector<6x6xf32> to vector<3x3xf32>
    %cst_23 = arith.constant dense<0xFF800000> : vector<3xf32>
    %43 = vector.multi_reduction <maximumf>, %42, %cst_23 [1] : vector<3x3xf32> to vector<3xf32>
    %44 = vector.shape_cast %43 : vector<3xf32> to vector<3x1xf32>
    %45 = vector.broadcast %44 : vector<3x1xf32> to vector<3x3xf32>
    %46 = arith.subf %42, %45 : vector<3x3xf32>
    %47 = math.exp %46 : vector<3x3xf32>
    %cst_24 = arith.constant dense<0.000000e+00> : vector<3xf32>
    %48 = vector.multi_reduction <add>, %47, %cst_24 [1] : vector<3x3xf32> to vector<3xf32>
    %49 = vector.shape_cast %48 : vector<3xf32> to vector<3x1xf32>
    %50 = tpu.reciprocal %49 {approx = true} : vector<3x1xf32> -> vector<3x1xf32>
    %51 = vector.broadcast %50 : vector<3x1xf32> to vector<3x3xf32>
    %52 = arith.mulf %47, %51 : vector<3x3xf32>
    %c0_25 = arith.constant 0 : index
    %c0_26 = arith.constant 0 : index
    %c0_27 = arith.constant 0 : index
    %53 = vector.load %arg10[%c0_25, %c0_26, %c0_27] : memref<2x3x3xf32, #tpu.memory_space<vmem>>, vector<1x3x3xf32>
    %54 = vector.shape_cast %53 : vector<1x3x3xf32> to vector<3x3xf32>
    %55 = vector.shape_cast %52 : vector<3x3xf32> to vector<1x3x3xf32>
    tpu.vector_store %arg10[%c0_25, %c0_26, %c0_27], %55 {strides = array<i32>} : memref<2x3x3xf32, #tpu.memory_space<vmem>>, vector<1x3x3xf32>,
    %56 = vector.extract_strided_slice %41 {offsets = [3, 3], sizes = [3, 3], strides = [1, 1]} : vector<6x6xf32> to vector<3x3xf32>
    %cst_28 = arith.constant dense<0xFF800000> : vector<3xf32>
    %57 = vector.multi_reduction <maximumf>, %56, %cst_28 [1] : vector<3x3xf32> to vector<3xf32>
    %58 = vector.shape_cast %57 : vector<3xf32> to vector<3x1xf32>
    %59 = vector.broadcast %58 : vector<3x1xf32> to vector<3x3xf32>
    %60 = arith.subf %56, %59 : vector<3x3xf32>
    %61 = math.exp %60 : vector<3x3xf32>
    %cst_29 = arith.constant dense<0.000000e+00> : vector<3xf32>
    %62 = vector.multi_reduction <add>, %61, %cst_29 [1] : vector<3x3xf32> to vector<3xf32>
    %63 = vector.shape_cast %62 : vector<3xf32> to vector<3x1xf32>
    %64 = tpu.reciprocal %63 {approx = true} : vector<3x1xf32> -> vector<3x1xf32>
    %65 = vector.broadcast %64 : vector<3x1xf32> to vector<3x3xf32>
    %66 = arith.mulf %61, %65 : vector<3x3xf32>
    %c1 = arith.constant 1 : index
    %c0_30 = arith.constant 0 : index
    %c0_31 = arith.constant 0 : index
    %67 = vector.load %arg10[%c1, %c0_30, %c0_31] : memref<2x3x3xf32, #tpu.memory_space<vmem>>, vector<1x3x3xf32>
    %68 = vector.shape_cast %67 : vector<1x3x3xf32> to vector<3x3xf32>
    %69 = vector.shape_cast %66 : vector<3x3xf32> to vector<1x3x3xf32>
    tpu.vector_store %arg10[%c1, %c0_30, %c0_31], %69 {strides = array<i32>} : memref<2x3x3xf32, #tpu.memory_space<vmem>>, vector<1x3x3xf32>,
    %c0_32 = arith.constant 0 : index
    %c0_33 = arith.constant 0 : index
    %c0_34 = arith.constant 0 : index
    %70 = vector.load %arg2[%c0_32, %c0_33, %c0_34] : memref<4x32x6xf32, #tpu.memory_space<vmem>>, vector<4x32x6xf32>
    %71 = arith.truncf %70 : vector<4x32x6xf32> to vector<4x32x6xbf16>
    "tpu.trace_start"() <{level = 10 : i32, message = "ncf,cfm->cnm"}> : () -> ()
    %cst_35 = arith.constant dense<0.000000e+00> : vector<4x6x6xf32>
    %72 = tpu.matmul %37, %71, %cst_35 {dimension_numbers = #tpu.dot_dimension_numbers<[2], [1], [0], [2], [0, 1, 0, 0, 1, 2], [1], [0]>} : vector<6x4x32xbf16>, vector<4x32x6xbf16>, vector<4x6x6xf32> -> vector<4x6x6xf32>
    "tpu.trace_stop"() : () -> ()
    %cst_36 = arith.constant dense<0.000000e+00> : vector<6x6xf32>
    %73 = vector.multi_reduction <add>, %72, %cst_36 [0] : vector<4x6x6xf32> to vector<6x6xf32>
    %c0_37 = arith.constant 0 : index
    %c0_38 = arith.constant 0 : index
    %74 = vector.load %arg4[%c0_37, %c0_38] : memref<6x6xf32, #tpu.memory_space<vmem>>, vector<6x6xf32>
    %75 = arith.mulf %73, %74 : vector<6x6xf32>
    %c0_39 = arith.constant 0 : index
    %c0_40 = arith.constant 0 : index
    %76 = vector.load %arg5[%c0_39, %c0_40] : memref<2x6xf32, #tpu.memory_space<vmem>>, vector<2x6xf32>
    %cst_41 = arith.constant dense<0.000000e+00> : vector<2x6xf32>
    %77 = tpu.matmul %76, %75, %cst_41 {dimension_numbers = #tpu.dot_dimension_numbers<[1], [0], [0], [1], [0, 0, 1, 1], [], []>} : vector<2x6xf32>, vector<6x6xf32>, vector<2x6xf32> -> vector<2x6xf32>
    %c0_42 = arith.constant 0 : index
    %c0_43 = arith.constant 0 : index
    %78 = vector.load %arg6[%c0_42, %c0_43] : memref<6x2xf32, #tpu.memory_space<vmem>>, vector<6x2xf32>
    %cst_44 = arith.constant dense<0.000000e+00> : vector<2x2xf32>
    %79 = tpu.matmul %77, %78, %cst_44 {dimension_numbers = #tpu.dot_dimension_numbers<[1], [0], [0], [1], [0, 0, 1, 1], [], []>} : vector<2x6xf32>, vector<6x2xf32>, vector<2x2xf32> -> vector<2x2xf32>
    %c0_45 = arith.constant 0 : index
    %c0_46 = arith.constant 0 : index
    %80 = vector.load %arg3[%c0_45, %c0_46] : memref<1x2xf32, #tpu.memory_space<vmem>>, vector<1x2xf32>
    %81 = vector.broadcast %80 : vector<1x2xf32> to vector<2x2xf32>
    %82 = arith.addf %79, %81 : vector<2x2xf32>
    %cst_47 = arith.constant dense<0xFF800000> : vector<2xf32>
    %83 = vector.multi_reduction <maximumf>, %82, %cst_47 [1] : vector<2x2xf32> to vector<2xf32>
    %84 = vector.shape_cast %83 : vector<2xf32> to vector<2x1xf32>
    %85 = vector.broadcast %84 : vector<2x1xf32> to vector<2x2xf32>
    %86 = arith.subf %82, %85 : vector<2x2xf32>
    %87 = math.exp %86 : vector<2x2xf32>
    %cst_48 = arith.constant dense<0.000000e+00> : vector<2xf32>
    %88 = vector.multi_reduction <add>, %87, %cst_48 [1] : vector<2x2xf32> to vector<2xf32>
    %89 = vector.shape_cast %88 : vector<2xf32> to vector<2x1xf32>
    %90 = tpu.reciprocal %89 {approx = true} : vector<2x1xf32> -> vector<2x1xf32>
    %91 = vector.broadcast %90 : vector<2x1xf32> to vector<2x2xf32>
    %92 = arith.mulf %87, %91 : vector<2x2xf32>
    %c0_49 = arith.constant 0 : index
    %c0_50 = arith.constant 0 : index
    %93 = vector.load %arg7[%c0_49, %c0_50] : memref<2x2xf32, #tpu.memory_space<vmem>>, vector<2x2xf32>
    tpu.vector_store %arg7[%c0_49, %c0_50], %92 {strides = array<i32>} : memref<2x2xf32, #tpu.memory_space<vmem>>, vector<2x2xf32>,
    return
  }
}

module attributes {stable_mosaic.version = 11 : i64} {
  func.func @_sfta_looped_kernel(%arg0: memref<4x32x6xf32, #tpu.memory_space<vmem>>, %arg1: memref<4x6x32xf32, #tpu.memory_space<vmem>>, %arg2: memref<4x32x6xf32, #tpu.memory_space<vmem>>, %arg3: memref<1x2xf32, #tpu.memory_space<vmem>>, %arg4: memref<2x2xf32, #tpu.memory_space<vmem>>, %arg5: memref<4x32x32xf32, #tpu.memory_space<vmem>>, %arg6: memref<6x32x32xf32, #tpu.memory_space<vmem>>, %arg7: memref<2x3x3xf32, #tpu.memory_space<vmem>>) attributes {dimension_semantics = [], scalar_prefetch = 0 : i64, scratch_operands = 0 : i64, tpu.core_type = #tpu.core_type<tc>} {
    %c0 = arith.constant 0 : index
    %c0_0 = arith.constant 0 : index
    %c0_1 = arith.constant 0 : index
    %0 = vector.load %arg0[%c0, %c0_0, %c0_1] : memref<4x32x6xf32, #tpu.memory_space<vmem>>, vector<4x32x6xf32>
    %c0_2 = arith.constant 0 : index
    %c0_3 = arith.constant 0 : index
    %c0_4 = arith.constant 0 : index
    %1 = vector.load %arg1[%c0_2, %c0_3, %c0_4] : memref<4x6x32xf32, #tpu.memory_space<vmem>>, vector<4x6x32xf32>
    "tpu.trace_start"() <{level = 10 : i32, message = "cfn,cgn->cfg"}> : () -> ()
    %cst = arith.constant dense<0.000000e+00> : vector<4x32x32xf32>
    %2 = tpu.matmul %0, %0, %cst {dimension_numbers = #tpu.dot_dimension_numbers<[2], [2], [1], [1], [0, 0, 0, 1, 1, 1], [0], [0]>} : vector<4x32x6xf32>, vector<4x32x6xf32>, vector<4x32x32xf32> -> vector<4x32x32xf32>
    "tpu.trace_stop"() : () -> ()
    %cst_5 = arith.constant 0.408248305 : f32
    %3 = vector.broadcast %cst_5 : f32 to vector<4x32x32xf32>
    %4 = arith.mulf %2, %3 : vector<4x32x32xf32>
    %cst_6 = arith.constant dense<0xFF800000> : vector<4x32xf32>
    %5 = vector.multi_reduction <maximumf>, %4, %cst_6 [2] : vector<4x32x32xf32> to vector<4x32xf32>
    %6 = vector.shape_cast %5 : vector<4x32xf32> to vector<4x32x1xf32>
    %7 = vector.broadcast %6 : vector<4x32x1xf32> to vector<4x32x32xf32>
    %8 = arith.subf %4, %7 : vector<4x32x32xf32>
    %9 = math.exp %8 : vector<4x32x32xf32>
    %cst_7 = arith.constant dense<0.000000e+00> : vector<4x32xf32>
    %10 = vector.multi_reduction <add>, %9, %cst_7 [2] : vector<4x32x32xf32> to vector<4x32xf32>
    %11 = vector.shape_cast %10 : vector<4x32xf32> to vector<4x32x1xf32>
    %12 = tpu.reciprocal %11 {approx = true} : vector<4x32x1xf32> -> vector<4x32x1xf32>
    %13 = vector.broadcast %12 : vector<4x32x1xf32> to vector<4x32x32xf32>
    %14 = arith.mulf %9, %13 : vector<4x32x32xf32>
    %c0_8 = arith.constant 0 : index
    %c0_9 = arith.constant 0 : index
    %c0_10 = arith.constant 0 : index
    %15 = vector.load %arg5[%c0_8, %c0_9, %c0_10] : memref<4x32x32xf32, #tpu.memory_space<vmem>>, vector<4x32x32xf32>
    tpu.vector_store %arg5[%c0_8, %c0_9, %c0_10], %14 {strides = array<i32>} : memref<4x32x32xf32, #tpu.memory_space<vmem>>, vector<4x32x32xf32>,
    "tpu.trace_start"() <{level = 10 : i32, message = "cng,cfg->cnf"}> : () -> ()
    %cst_11 = arith.constant dense<0.000000e+00> : vector<4x6x32xf32>
    %16 = tpu.matmul %1, %14, %cst_11 {dimension_numbers = #tpu.dot_dimension_numbers<[2], [2], [1], [1], [0, 0, 0, 1, 1, 1], [0], [0]>} : vector<4x6x32xf32>, vector<4x32x32xf32>, vector<4x6x32xf32> -> vector<4x6x32xf32>
    "tpu.trace_stop"() : () -> ()
    %17 = vector.extract_strided_slice %16 {offsets = [0, 0, 0], sizes = [1, 6, 32], strides = [1, 1, 1]} : vector<4x6x32xf32> to vector<1x6x32xf32>
    %18 = vector.shape_cast %17 : vector<1x6x32xf32> to vector<6x32xf32>
    %19 = vector.extract_strided_slice %18 {offsets = [0, 0], sizes = [1, 32], strides = [1, 1]} : vector<6x32xf32> to vector<1x32xf32>
    %20 = vector.extract_strided_slice %16 {offsets = [1, 0, 0], sizes = [1, 6, 32], strides = [1, 1, 1]} : vector<4x6x32xf32> to vector<1x6x32xf32>
    %21 = vector.shape_cast %20 : vector<1x6x32xf32> to vector<6x32xf32>
    %22 = vector.extract_strided_slice %21 {offsets = [0, 0], sizes = [1, 32], strides = [1, 1]} : vector<6x32xf32> to vector<1x32xf32>
    %23 = vector.extract_strided_slice %16 {offsets = [2, 0, 0], sizes = [1, 6, 32], strides = [1, 1, 1]} : vector<4x6x32xf32> to vector<1x6x32xf32>
    %24 = vector.shape_cast %23 : vector<1x6x32xf32> to vector<6x32xf32>
    %25 = vector.extract_strided_slice %24 {offsets = [0, 0], sizes = [1, 32], strides = [1, 1]} : vector<6x32xf32> to vector<1x32xf32>
    %26 = vector.extract_strided_slice %16 {offsets = [3, 0, 0], sizes = [1, 6, 32], strides = [1, 1, 1]} : vector<4x6x32xf32> to vector<1x6x32xf32>
    %27 = vector.shape_cast %26 : vector<1x6x32xf32> to vector<6x32xf32>
    %28 = vector.extract_strided_slice %27 {offsets = [0, 0], sizes = [1, 32], strides = [1, 1]} : vector<6x32xf32> to vector<1x32xf32>
    %29 = tpu.concatenate %19, %22, %25, %28 in 0 : vector<1x32xf32>, vector<1x32xf32>, vector<1x32xf32>, vector<1x32xf32> -> vector<4x32xf32>
    %30 = tpu.transpose %29, [1, 0] : vector<4x32xf32> -> vector<32x4xf32>
    %cst_12 = arith.constant dense<0.000000e+00> : vector<32x32xf32>
    %31 = tpu.matmul %30, %29, %cst_12 {dimension_numbers = #tpu.dot_dimension_numbers<[1], [0], [0], [1], [0, 0, 1, 1], [], []>} : vector<32x4xf32>, vector<4x32xf32>, vector<32x32xf32> -> vector<32x32xf32>
    %cst_13 = arith.constant 5.000000e-01 : f32
    %32 = vector.broadcast %cst_13 : f32 to vector<32x32xf32>
    %33 = arith.mulf %31, %32 : vector<32x32xf32>
    %cst_14 = arith.constant dense<0xFF800000> : vector<32xf32>
    %34 = vector.multi_reduction <maximumf>, %33, %cst_14 [1] : vector<32x32xf32> to vector<32xf32>
    %35 = vector.shape_cast %34 : vector<32xf32> to vector<32x1xf32>
    %36 = vector.broadcast %35 : vector<32x1xf32> to vector<32x32xf32>
    %37 = arith.subf %33, %36 : vector<32x32xf32>
    %38 = math.exp %37 : vector<32x32xf32>
    %cst_15 = arith.constant dense<0.000000e+00> : vector<32xf32>
    %39 = vector.multi_reduction <add>, %38, %cst_15 [1] : vector<32x32xf32> to vector<32xf32>
    %40 = vector.shape_cast %39 : vector<32xf32> to vector<32x1xf32>
    %41 = tpu.reciprocal %40 {approx = true} : vector<32x1xf32> -> vector<32x1xf32>
    %42 = vector.broadcast %41 : vector<32x1xf32> to vector<32x32xf32>
    %43 = arith.mulf %38, %42 : vector<32x32xf32>
    %c0_16 = arith.constant 0 : index
    %c0_17 = arith.constant 0 : index
    %c0_18 = arith.constant 0 : index
    %44 = vector.load %arg6[%c0_16, %c0_17, %c0_18] : memref<6x32x32xf32, #tpu.memory_space<vmem>>, vector<1x32x32xf32>
    %45 = vector.shape_cast %44 : vector<1x32x32xf32> to vector<32x32xf32>
    %46 = vector.shape_cast %43 : vector<32x32xf32> to vector<1x32x32xf32>
    tpu.vector_store %arg6[%c0_16, %c0_17, %c0_18], %46 {strides = array<i32>} : memref<6x32x32xf32, #tpu.memory_space<vmem>>, vector<1x32x32xf32>,
    %47 = tpu.transpose %43, [1, 0] : vector<32x32xf32> -> vector<32x32xf32>
    %cst_19 = arith.constant dense<0.000000e+00> : vector<4x32xf32>
    %48 = tpu.matmul %29, %47, %cst_19 {dimension_numbers = #tpu.dot_dimension_numbers<[1], [0], [0], [1], [0, 0, 1, 1], [], []>} : vector<4x32xf32>, vector<32x32xf32>, vector<4x32xf32> -> vector<4x32xf32>
    %49 = vector.extract_strided_slice %16 {offsets = [0, 0, 0], sizes = [1, 6, 32], strides = [1, 1, 1]} : vector<4x6x32xf32> to vector<1x6x32xf32>
    %50 = vector.shape_cast %49 : vector<1x6x32xf32> to vector<6x32xf32>
    %51 = vector.extract_strided_slice %50 {offsets = [1, 0], sizes = [1, 32], strides = [1, 1]} : vector<6x32xf32> to vector<1x32xf32>
    %52 = vector.extract_strided_slice %16 {offsets = [1, 0, 0], sizes = [1, 6, 32], strides = [1, 1, 1]} : vector<4x6x32xf32> to vector<1x6x32xf32>
    %53 = vector.shape_cast %52 : vector<1x6x32xf32> to vector<6x32xf32>
    %54 = vector.extract_strided_slice %53 {offsets = [1, 0], sizes = [1, 32], strides = [1, 1]} : vector<6x32xf32> to vector<1x32xf32>
    %55 = vector.extract_strided_slice %16 {offsets = [2, 0, 0], sizes = [1, 6, 32], strides = [1, 1, 1]} : vector<4x6x32xf32> to vector<1x6x32xf32>
    %56 = vector.shape_cast %55 : vector<1x6x32xf32> to vector<6x32xf32>
    %57 = vector.extract_strided_slice %56 {offsets = [1, 0], sizes = [1, 32], strides = [1, 1]} : vector<6x32xf32> to vector<1x32xf32>
    %58 = vector.extract_strided_slice %16 {offsets = [3, 0, 0], sizes = [1, 6, 32], strides = [1, 1, 1]} : vector<4x6x32xf32> to vector<1x6x32xf32>
    %59 = vector.shape_cast %58 : vector<1x6x32xf32> to vector<6x32xf32>
    %60 = vector.extract_strided_slice %59 {offsets = [1, 0], sizes = [1, 32], strides = [1, 1]} : vector<6x32xf32> to vector<1x32xf32>
    %61 = tpu.concatenate %51, %54, %57, %60 in 0 : vector<1x32xf32>, vector<1x32xf32>, vector<1x32xf32>, vector<1x32xf32> -> vector<4x32xf32>
    %62 = tpu.transpose %61, [1, 0] : vector<4x32xf32> -> vector<32x4xf32>
    %cst_20 = arith.constant dense<0.000000e+00> : vector<32x32xf32>
    %63 = tpu.matmul %62, %61, %cst_20 {dimension_numbers = #tpu.dot_dimension_numbers<[1], [0], [0], [1], [0, 0, 1, 1], [], []>} : vector<32x4xf32>, vector<4x32xf32>, vector<32x32xf32> -> vector<32x32xf32>
    %cst_21 = arith.constant 5.000000e-01 : f32
    %64 = vector.broadcast %cst_21 : f32 to vector<32x32xf32>
    %65 = arith.mulf %63, %64 : vector<32x32xf32>
    %cst_22 = arith.constant dense<0xFF800000> : vector<32xf32>
    %66 = vector.multi_reduction <maximumf>, %65, %cst_22 [1] : vector<32x32xf32> to vector<32xf32>
    %67 = vector.shape_cast %66 : vector<32xf32> to vector<32x1xf32>
    %68 = vector.broadcast %67 : vector<32x1xf32> to vector<32x32xf32>
    %69 = arith.subf %65, %68 : vector<32x32xf32>
    %70 = math.exp %69 : vector<32x32xf32>
    %cst_23 = arith.constant dense<0.000000e+00> : vector<32xf32>
    %71 = vector.multi_reduction <add>, %70, %cst_23 [1] : vector<32x32xf32> to vector<32xf32>
    %72 = vector.shape_cast %71 : vector<32xf32> to vector<32x1xf32>
    %73 = tpu.reciprocal %72 {approx = true} : vector<32x1xf32> -> vector<32x1xf32>
    %74 = vector.broadcast %73 : vector<32x1xf32> to vector<32x32xf32>
    %75 = arith.mulf %70, %74 : vector<32x32xf32>
    %c1 = arith.constant 1 : index
    %c0_24 = arith.constant 0 : index
    %c0_25 = arith.constant 0 : index
    %76 = vector.load %arg6[%c1, %c0_24, %c0_25] : memref<6x32x32xf32, #tpu.memory_space<vmem>>, vector<1x32x32xf32>
    %77 = vector.shape_cast %76 : vector<1x32x32xf32> to vector<32x32xf32>
    %78 = vector.shape_cast %75 : vector<32x32xf32> to vector<1x32x32xf32>
    tpu.vector_store %arg6[%c1, %c0_24, %c0_25], %78 {strides = array<i32>} : memref<6x32x32xf32, #tpu.memory_space<vmem>>, vector<1x32x32xf32>,
    %79 = tpu.transpose %75, [1, 0] : vector<32x32xf32> -> vector<32x32xf32>
    %cst_26 = arith.constant dense<0.000000e+00> : vector<4x32xf32>
    %80 = tpu.matmul %61, %79, %cst_26 {dimension_numbers = #tpu.dot_dimension_numbers<[1], [0], [0], [1], [0, 0, 1, 1], [], []>} : vector<4x32xf32>, vector<32x32xf32>, vector<4x32xf32> -> vector<4x32xf32>
    %81 = vector.extract_strided_slice %16 {offsets = [0, 0, 0], sizes = [1, 6, 32], strides = [1, 1, 1]} : vector<4x6x32xf32> to vector<1x6x32xf32>
    %82 = vector.shape_cast %81 : vector<1x6x32xf32> to vector<6x32xf32>
    %83 = vector.extract_strided_slice %82 {offsets = [2, 0], sizes = [1, 32], strides = [1, 1]} : vector<6x32xf32> to vector<1x32xf32>
    %84 = vector.extract_strided_slice %16 {offsets = [1, 0, 0], sizes = [1, 6, 32], strides = [1, 1, 1]} : vector<4x6x32xf32> to vector<1x6x32xf32>
    %85 = vector.shape_cast %84 : vector<1x6x32xf32> to vector<6x32xf32>
    %86 = vector.extract_strided_slice %85 {offsets = [2, 0], sizes = [1, 32], strides = [1, 1]} : vector<6x32xf32> to vector<1x32xf32>
    %87 = vector.extract_strided_slice %16 {offsets = [2, 0, 0], sizes = [1, 6, 32], strides = [1, 1, 1]} : vector<4x6x32xf32> to vector<1x6x32xf32>
    %88 = vector.shape_cast %87 : vector<1x6x32xf32> to vector<6x32xf32>
    %89 = vector.extract_strided_slice %88 {offsets = [2, 0], sizes = [1, 32], strides = [1, 1]} : vector<6x32xf32> to vector<1x32xf32>
    %90 = vector.extract_strided_slice %16 {offsets = [3, 0, 0], sizes = [1, 6, 32], strides = [1, 1, 1]} : vector<4x6x32xf32> to vector<1x6x32xf32>
    %91 = vector.shape_cast %90 : vector<1x6x32xf32> to vector<6x32xf32>
    %92 = vector.extract_strided_slice %91 {offsets = [2, 0], sizes = [1, 32], strides = [1, 1]} : vector<6x32xf32> to vector<1x32xf32>
    %93 = tpu.concatenate %83, %86, %89, %92 in 0 : vector<1x32xf32>, vector<1x32xf32>, vector<1x32xf32>, vector<1x32xf32> -> vector<4x32xf32>
    %94 = tpu.transpose %93, [1, 0] : vector<4x32xf32> -> vector<32x4xf32>
    %cst_27 = arith.constant dense<0.000000e+00> : vector<32x32xf32>
    %95 = tpu.matmul %94, %93, %cst_27 {dimension_numbers = #tpu.dot_dimension_numbers<[1], [0], [0], [1], [0, 0, 1, 1], [], []>} : vector<32x4xf32>, vector<4x32xf32>, vector<32x32xf32> -> vector<32x32xf32>
    %cst_28 = arith.constant 5.000000e-01 : f32
    %96 = vector.broadcast %cst_28 : f32 to vector<32x32xf32>
    %97 = arith.mulf %95, %96 : vector<32x32xf32>
    %cst_29 = arith.constant dense<0xFF800000> : vector<32xf32>
    %98 = vector.multi_reduction <maximumf>, %97, %cst_29 [1] : vector<32x32xf32> to vector<32xf32>
    %99 = vector.shape_cast %98 : vector<32xf32> to vector<32x1xf32>
    %100 = vector.broadcast %99 : vector<32x1xf32> to vector<32x32xf32>
    %101 = arith.subf %97, %100 : vector<32x32xf32>
    %102 = math.exp %101 : vector<32x32xf32>
    %cst_30 = arith.constant dense<0.000000e+00> : vector<32xf32>
    %103 = vector.multi_reduction <add>, %102, %cst_30 [1] : vector<32x32xf32> to vector<32xf32>
    %104 = vector.shape_cast %103 : vector<32xf32> to vector<32x1xf32>
    %105 = tpu.reciprocal %104 {approx = true} : vector<32x1xf32> -> vector<32x1xf32>
    %106 = vector.broadcast %105 : vector<32x1xf32> to vector<32x32xf32>
    %107 = arith.mulf %102, %106 : vector<32x32xf32>
    %c2 = arith.constant 2 : index
    %c0_31 = arith.constant 0 : index
    %c0_32 = arith.constant 0 : index
    %108 = vector.load %arg6[%c2, %c0_31, %c0_32] : memref<6x32x32xf32, #tpu.memory_space<vmem>>, vector<1x32x32xf32>
    %109 = vector.shape_cast %108 : vector<1x32x32xf32> to vector<32x32xf32>
    %110 = vector.shape_cast %107 : vector<32x32xf32> to vector<1x32x32xf32>
    tpu.vector_store %arg6[%c2, %c0_31, %c0_32], %110 {strides = array<i32>} : memref<6x32x32xf32, #tpu.memory_space<vmem>>, vector<1x32x32xf32>,
    %111 = tpu.transpose %107, [1, 0] : vector<32x32xf32> -> vector<32x32xf32>
    %cst_33 = arith.constant dense<0.000000e+00> : vector<4x32xf32>
    %112 = tpu.matmul %93, %111, %cst_33 {dimension_numbers = #tpu.dot_dimension_numbers<[1], [0], [0], [1], [0, 0, 1, 1], [], []>} : vector<4x32xf32>, vector<32x32xf32>, vector<4x32xf32> -> vector<4x32xf32>
    %113 = vector.extract_strided_slice %16 {offsets = [0, 0, 0], sizes = [1, 6, 32], strides = [1, 1, 1]} : vector<4x6x32xf32> to vector<1x6x32xf32>
    %114 = vector.shape_cast %113 : vector<1x6x32xf32> to vector<6x32xf32>
    %115 = vector.extract_strided_slice %114 {offsets = [3, 0], sizes = [1, 32], strides = [1, 1]} : vector<6x32xf32> to vector<1x32xf32>
    %116 = vector.extract_strided_slice %16 {offsets = [1, 0, 0], sizes = [1, 6, 32], strides = [1, 1, 1]} : vector<4x6x32xf32> to vector<1x6x32xf32>
    %117 = vector.shape_cast %116 : vector<1x6x32xf32> to vector<6x32xf32>
    %118 = vector.extract_strided_slice %117 {offsets = [3, 0], sizes = [1, 32], strides = [1, 1]} : vector<6x32xf32> to vector<1x32xf32>
    %119 = vector.extract_strided_slice %16 {offsets = [2, 0, 0], sizes = [1, 6, 32], strides = [1, 1, 1]} : vector<4x6x32xf32> to vector<1x6x32xf32>
    %120 = vector.shape_cast %119 : vector<1x6x32xf32> to vector<6x32xf32>
    %121 = vector.extract_strided_slice %120 {offsets = [3, 0], sizes = [1, 32], strides = [1, 1]} : vector<6x32xf32> to vector<1x32xf32>
    %122 = vector.extract_strided_slice %16 {offsets = [3, 0, 0], sizes = [1, 6, 32], strides = [1, 1, 1]} : vector<4x6x32xf32> to vector<1x6x32xf32>
    %123 = vector.shape_cast %122 : vector<1x6x32xf32> to vector<6x32xf32>
    %124 = vector.extract_strided_slice %123 {offsets = [3, 0], sizes = [1, 32], strides = [1, 1]} : vector<6x32xf32> to vector<1x32xf32>
    %125 = tpu.concatenate %115, %118, %121, %124 in 0 : vector<1x32xf32>, vector<1x32xf32>, vector<1x32xf32>, vector<1x32xf32> -> vector<4x32xf32>
    %126 = tpu.transpose %125, [1, 0] : vector<4x32xf32> -> vector<32x4xf32>
    %cst_34 = arith.constant dense<0.000000e+00> : vector<32x32xf32>
    %127 = tpu.matmul %126, %125, %cst_34 {dimension_numbers = #tpu.dot_dimension_numbers<[1], [0], [0], [1], [0, 0, 1, 1], [], []>} : vector<32x4xf32>, vector<4x32xf32>, vector<32x32xf32> -> vector<32x32xf32>
    %cst_35 = arith.constant 5.000000e-01 : f32
    %128 = vector.broadcast %cst_35 : f32 to vector<32x32xf32>
    %129 = arith.mulf %127, %128 : vector<32x32xf32>
    %cst_36 = arith.constant dense<0xFF800000> : vector<32xf32>
    %130 = vector.multi_reduction <maximumf>, %129, %cst_36 [1] : vector<32x32xf32> to vector<32xf32>
    %131 = vector.shape_cast %130 : vector<32xf32> to vector<32x1xf32>
    %132 = vector.broadcast %131 : vector<32x1xf32> to vector<32x32xf32>
    %133 = arith.subf %129, %132 : vector<32x32xf32>
    %134 = math.exp %133 : vector<32x32xf32>
    %cst_37 = arith.constant dense<0.000000e+00> : vector<32xf32>
    %135 = vector.multi_reduction <add>, %134, %cst_37 [1] : vector<32x32xf32> to vector<32xf32>
    %136 = vector.shape_cast %135 : vector<32xf32> to vector<32x1xf32>
    %137 = tpu.reciprocal %136 {approx = true} : vector<32x1xf32> -> vector<32x1xf32>
    %138 = vector.broadcast %137 : vector<32x1xf32> to vector<32x32xf32>
    %139 = arith.mulf %134, %138 : vector<32x32xf32>
    %c3 = arith.constant 3 : index
    %c0_38 = arith.constant 0 : index
    %c0_39 = arith.constant 0 : index
    %140 = vector.load %arg6[%c3, %c0_38, %c0_39] : memref<6x32x32xf32, #tpu.memory_space<vmem>>, vector<1x32x32xf32>
    %141 = vector.shape_cast %140 : vector<1x32x32xf32> to vector<32x32xf32>
    %142 = vector.shape_cast %139 : vector<32x32xf32> to vector<1x32x32xf32>
    tpu.vector_store %arg6[%c3, %c0_38, %c0_39], %142 {strides = array<i32>} : memref<6x32x32xf32, #tpu.memory_space<vmem>>, vector<1x32x32xf32>,
    %143 = tpu.transpose %139, [1, 0] : vector<32x32xf32> -> vector<32x32xf32>
    %cst_40 = arith.constant dense<0.000000e+00> : vector<4x32xf32>
    %144 = tpu.matmul %125, %143, %cst_40 {dimension_numbers = #tpu.dot_dimension_numbers<[1], [0], [0], [1], [0, 0, 1, 1], [], []>} : vector<4x32xf32>, vector<32x32xf32>, vector<4x32xf32> -> vector<4x32xf32>
    %145 = vector.extract_strided_slice %16 {offsets = [0, 0, 0], sizes = [1, 6, 32], strides = [1, 1, 1]} : vector<4x6x32xf32> to vector<1x6x32xf32>
    %146 = vector.shape_cast %145 : vector<1x6x32xf32> to vector<6x32xf32>
    %147 = vector.extract_strided_slice %146 {offsets = [4, 0], sizes = [1, 32], strides = [1, 1]} : vector<6x32xf32> to vector<1x32xf32>
    %148 = vector.extract_strided_slice %16 {offsets = [1, 0, 0], sizes = [1, 6, 32], strides = [1, 1, 1]} : vector<4x6x32xf32> to vector<1x6x32xf32>
    %149 = vector.shape_cast %148 : vector<1x6x32xf32> to vector<6x32xf32>
    %150 = vector.extract_strided_slice %149 {offsets = [4, 0], sizes = [1, 32], strides = [1, 1]} : vector<6x32xf32> to vector<1x32xf32>
    %151 = vector.extract_strided_slice %16 {offsets = [2, 0, 0], sizes = [1, 6, 32], strides = [1, 1, 1]} : vector<4x6x32xf32> to vector<1x6x32xf32>
    %152 = vector.shape_cast %151 : vector<1x6x32xf32> to vector<6x32xf32>
    %153 = vector.extract_strided_slice %152 {offsets = [4, 0], sizes = [1, 32], strides = [1, 1]} : vector<6x32xf32> to vector<1x32xf32>
    %154 = vector.extract_strided_slice %16 {offsets = [3, 0, 0], sizes = [1, 6, 32], strides = [1, 1, 1]} : vector<4x6x32xf32> to vector<1x6x32xf32>
    %155 = vector.shape_cast %154 : vector<1x6x32xf32> to vector<6x32xf32>
    %156 = vector.extract_strided_slice %155 {offsets = [4, 0], sizes = [1, 32], strides = [1, 1]} : vector<6x32xf32> to vector<1x32xf32>
    %157 = tpu.concatenate %147, %150, %153, %156 in 0 : vector<1x32xf32>, vector<1x32xf32>, vector<1x32xf32>, vector<1x32xf32> -> vector<4x32xf32>
    %158 = tpu.transpose %157, [1, 0] : vector<4x32xf32> -> vector<32x4xf32>
    %cst_41 = arith.constant dense<0.000000e+00> : vector<32x32xf32>
    %159 = tpu.matmul %158, %157, %cst_41 {dimension_numbers = #tpu.dot_dimension_numbers<[1], [0], [0], [1], [0, 0, 1, 1], [], []>} : vector<32x4xf32>, vector<4x32xf32>, vector<32x32xf32> -> vector<32x32xf32>
    %cst_42 = arith.constant 5.000000e-01 : f32
    %160 = vector.broadcast %cst_42 : f32 to vector<32x32xf32>
    %161 = arith.mulf %159, %160 : vector<32x32xf32>
    %cst_43 = arith.constant dense<0xFF800000> : vector<32xf32>
    %162 = vector.multi_reduction <maximumf>, %161, %cst_43 [1] : vector<32x32xf32> to vector<32xf32>
    %163 = vector.shape_cast %162 : vector<32xf32> to vector<32x1xf32>
    %164 = vector.broadcast %163 : vector<32x1xf32> to vector<32x32xf32>
    %165 = arith.subf %161, %164 : vector<32x32xf32>
    %166 = math.exp %165 : vector<32x32xf32>
    %cst_44 = arith.constant dense<0.000000e+00> : vector<32xf32>
    %167 = vector.multi_reduction <add>, %166, %cst_44 [1] : vector<32x32xf32> to vector<32xf32>
    %168 = vector.shape_cast %167 : vector<32xf32> to vector<32x1xf32>
    %169 = tpu.reciprocal %168 {approx = true} : vector<32x1xf32> -> vector<32x1xf32>
    %170 = vector.broadcast %169 : vector<32x1xf32> to vector<32x32xf32>
    %171 = arith.mulf %166, %170 : vector<32x32xf32>
    %c4 = arith.constant 4 : index
    %c0_45 = arith.constant 0 : index
    %c0_46 = arith.constant 0 : index
    %172 = vector.load %arg6[%c4, %c0_45, %c0_46] : memref<6x32x32xf32, #tpu.memory_space<vmem>>, vector<1x32x32xf32>
    %173 = vector.shape_cast %172 : vector<1x32x32xf32> to vector<32x32xf32>
    %174 = vector.shape_cast %171 : vector<32x32xf32> to vector<1x32x32xf32>
    tpu.vector_store %arg6[%c4, %c0_45, %c0_46], %174 {strides = array<i32>} : memref<6x32x32xf32, #tpu.memory_space<vmem>>, vector<1x32x32xf32>,
    %175 = tpu.transpose %171, [1, 0] : vector<32x32xf32> -> vector<32x32xf32>
    %cst_47 = arith.constant dense<0.000000e+00> : vector<4x32xf32>
    %176 = tpu.matmul %157, %175, %cst_47 {dimension_numbers = #tpu.dot_dimension_numbers<[1], [0], [0], [1], [0, 0, 1, 1], [], []>} : vector<4x32xf32>, vector<32x32xf32>, vector<4x32xf32> -> vector<4x32xf32>
    %177 = vector.extract_strided_slice %16 {offsets = [0, 0, 0], sizes = [1, 6, 32], strides = [1, 1, 1]} : vector<4x6x32xf32> to vector<1x6x32xf32>
    %178 = vector.shape_cast %177 : vector<1x6x32xf32> to vector<6x32xf32>
    %179 = vector.extract_strided_slice %178 {offsets = [5, 0], sizes = [1, 32], strides = [1, 1]} : vector<6x32xf32> to vector<1x32xf32>
    %180 = vector.extract_strided_slice %16 {offsets = [1, 0, 0], sizes = [1, 6, 32], strides = [1, 1, 1]} : vector<4x6x32xf32> to vector<1x6x32xf32>
    %181 = vector.shape_cast %180 : vector<1x6x32xf32> to vector<6x32xf32>
    %182 = vector.extract_strided_slice %181 {offsets = [5, 0], sizes = [1, 32], strides = [1, 1]} : vector<6x32xf32> to vector<1x32xf32>
    %183 = vector.extract_strided_slice %16 {offsets = [2, 0, 0], sizes = [1, 6, 32], strides = [1, 1, 1]} : vector<4x6x32xf32> to vector<1x6x32xf32>
    %184 = vector.shape_cast %183 : vector<1x6x32xf32> to vector<6x32xf32>
    %185 = vector.extract_strided_slice %184 {offsets = [5, 0], sizes = [1, 32], strides = [1, 1]} : vector<6x32xf32> to vector<1x32xf32>
    %186 = vector.extract_strided_slice %16 {offsets = [3, 0, 0], sizes = [1, 6, 32], strides = [1, 1, 1]} : vector<4x6x32xf32> to vector<1x6x32xf32>
    %187 = vector.shape_cast %186 : vector<1x6x32xf32> to vector<6x32xf32>
    %188 = vector.extract_strided_slice %187 {offsets = [5, 0], sizes = [1, 32], strides = [1, 1]} : vector<6x32xf32> to vector<1x32xf32>
    %189 = tpu.concatenate %179, %182, %185, %188 in 0 : vector<1x32xf32>, vector<1x32xf32>, vector<1x32xf32>, vector<1x32xf32> -> vector<4x32xf32>
    %190 = tpu.transpose %189, [1, 0] : vector<4x32xf32> -> vector<32x4xf32>
    %cst_48 = arith.constant dense<0.000000e+00> : vector<32x32xf32>
    %191 = tpu.matmul %190, %189, %cst_48 {dimension_numbers = #tpu.dot_dimension_numbers<[1], [0], [0], [1], [0, 0, 1, 1], [], []>} : vector<32x4xf32>, vector<4x32xf32>, vector<32x32xf32> -> vector<32x32xf32>
    %cst_49 = arith.constant 5.000000e-01 : f32
    %192 = vector.broadcast %cst_49 : f32 to vector<32x32xf32>
    %193 = arith.mulf %191, %192 : vector<32x32xf32>
    %cst_50 = arith.constant dense<0xFF800000> : vector<32xf32>
    %194 = vector.multi_reduction <maximumf>, %193, %cst_50 [1] : vector<32x32xf32> to vector<32xf32>
    %195 = vector.shape_cast %194 : vector<32xf32> to vector<32x1xf32>
    %196 = vector.broadcast %195 : vector<32x1xf32> to vector<32x32xf32>
    %197 = arith.subf %193, %196 : vector<32x32xf32>
    %198 = math.exp %197 : vector<32x32xf32>
    %cst_51 = arith.constant dense<0.000000e+00> : vector<32xf32>
    %199 = vector.multi_reduction <add>, %198, %cst_51 [1] : vector<32x32xf32> to vector<32xf32>
    %200 = vector.shape_cast %199 : vector<32xf32> to vector<32x1xf32>
    %201 = tpu.reciprocal %200 {approx = true} : vector<32x1xf32> -> vector<32x1xf32>
    %202 = vector.broadcast %201 : vector<32x1xf32> to vector<32x32xf32>
    %203 = arith.mulf %198, %202 : vector<32x32xf32>
    %c5 = arith.constant 5 : index
    %c0_52 = arith.constant 0 : index
    %c0_53 = arith.constant 0 : index
    %204 = vector.load %arg6[%c5, %c0_52, %c0_53] : memref<6x32x32xf32, #tpu.memory_space<vmem>>, vector<1x32x32xf32>
    %205 = vector.shape_cast %204 : vector<1x32x32xf32> to vector<32x32xf32>
    %206 = vector.shape_cast %203 : vector<32x32xf32> to vector<1x32x32xf32>
    tpu.vector_store %arg6[%c5, %c0_52, %c0_53], %206 {strides = array<i32>} : memref<6x32x32xf32, #tpu.memory_space<vmem>>, vector<1x32x32xf32>,
    %207 = tpu.transpose %203, [1, 0] : vector<32x32xf32> -> vector<32x32xf32>
    %cst_54 = arith.constant dense<0.000000e+00> : vector<4x32xf32>
    %208 = tpu.matmul %189, %207, %cst_54 {dimension_numbers = #tpu.dot_dimension_numbers<[1], [0], [0], [1], [0, 0, 1, 1], [], []>} : vector<4x32xf32>, vector<32x32xf32>, vector<4x32xf32> -> vector<4x32xf32>
    %209 = vector.extract_strided_slice %48 {offsets = [0, 0], sizes = [1, 32], strides = [1, 1]} : vector<4x32xf32> to vector<1x32xf32>
    %210 = vector.extract_strided_slice %80 {offsets = [0, 0], sizes = [1, 32], strides = [1, 1]} : vector<4x32xf32> to vector<1x32xf32>
    %211 = vector.extract_strided_slice %112 {offsets = [0, 0], sizes = [1, 32], strides = [1, 1]} : vector<4x32xf32> to vector<1x32xf32>
    %212 = tpu.concatenate %209, %210, %211 in 0 : vector<1x32xf32>, vector<1x32xf32>, vector<1x32xf32> -> vector<3x32xf32>
    %213 = vector.extract_strided_slice %48 {offsets = [1, 0], sizes = [1, 32], strides = [1, 1]} : vector<4x32xf32> to vector<1x32xf32>
    %214 = vector.extract_strided_slice %80 {offsets = [1, 0], sizes = [1, 32], strides = [1, 1]} : vector<4x32xf32> to vector<1x32xf32>
    %215 = vector.extract_strided_slice %112 {offsets = [1, 0], sizes = [1, 32], strides = [1, 1]} : vector<4x32xf32> to vector<1x32xf32>
    %216 = tpu.concatenate %213, %214, %215 in 0 : vector<1x32xf32>, vector<1x32xf32>, vector<1x32xf32> -> vector<3x32xf32>
    %217 = vector.extract_strided_slice %48 {offsets = [2, 0], sizes = [1, 32], strides = [1, 1]} : vector<4x32xf32> to vector<1x32xf32>
    %218 = vector.extract_strided_slice %80 {offsets = [2, 0], sizes = [1, 32], strides = [1, 1]} : vector<4x32xf32> to vector<1x32xf32>
    %219 = vector.extract_strided_slice %112 {offsets = [2, 0], sizes = [1, 32], strides = [1, 1]} : vector<4x32xf32> to vector<1x32xf32>
    %220 = tpu.concatenate %217, %218, %219 in 0 : vector<1x32xf32>, vector<1x32xf32>, vector<1x32xf32> -> vector<3x32xf32>
    %221 = vector.extract_strided_slice %48 {offsets = [3, 0], sizes = [1, 32], strides = [1, 1]} : vector<4x32xf32> to vector<1x32xf32>
    %222 = vector.extract_strided_slice %80 {offsets = [3, 0], sizes = [1, 32], strides = [1, 1]} : vector<4x32xf32> to vector<1x32xf32>
    %223 = vector.extract_strided_slice %112 {offsets = [3, 0], sizes = [1, 32], strides = [1, 1]} : vector<4x32xf32> to vector<1x32xf32>
    %224 = tpu.concatenate %221, %222, %223 in 0 : vector<1x32xf32>, vector<1x32xf32>, vector<1x32xf32> -> vector<3x32xf32>
    %225 = tpu.transpose %212, [1, 0] : vector<3x32xf32> -> vector<32x3xf32>
    %cst_55 = arith.constant dense<0.000000e+00> : vector<3x3xf32>
    %226 = tpu.matmul %212, %225, %cst_55 {dimension_numbers = #tpu.dot_dimension_numbers<[1], [0], [0], [1], [0, 0, 1, 1], [], []>} : vector<3x32xf32>, vector<32x3xf32>, vector<3x3xf32> -> vector<3x3xf32>
    %227 = tpu.transpose %216, [1, 0] : vector<3x32xf32> -> vector<32x3xf32>
    %cst_56 = arith.constant dense<0.000000e+00> : vector<3x3xf32>
    %228 = tpu.matmul %216, %227, %cst_56 {dimension_numbers = #tpu.dot_dimension_numbers<[1], [0], [0], [1], [0, 0, 1, 1], [], []>} : vector<3x32xf32>, vector<32x3xf32>, vector<3x3xf32> -> vector<3x3xf32>
    %229 = arith.addf %226, %228 : vector<3x3xf32>
    %230 = tpu.transpose %220, [1, 0] : vector<3x32xf32> -> vector<32x3xf32>
    %cst_57 = arith.constant dense<0.000000e+00> : vector<3x3xf32>
    %231 = tpu.matmul %220, %230, %cst_57 {dimension_numbers = #tpu.dot_dimension_numbers<[1], [0], [0], [1], [0, 0, 1, 1], [], []>} : vector<3x32xf32>, vector<32x3xf32>, vector<3x3xf32> -> vector<3x3xf32>
    %232 = arith.addf %229, %231 : vector<3x3xf32>
    %233 = tpu.transpose %224, [1, 0] : vector<3x32xf32> -> vector<32x3xf32>
    %cst_58 = arith.constant dense<0.000000e+00> : vector<3x3xf32>
    %234 = tpu.matmul %224, %233, %cst_58 {dimension_numbers = #tpu.dot_dimension_numbers<[1], [0], [0], [1], [0, 0, 1, 1], [], []>} : vector<3x32xf32>, vector<32x3xf32>, vector<3x3xf32> -> vector<3x3xf32>
    %235 = arith.addf %232, %234 : vector<3x3xf32>
    %cst_59 = arith.constant 0.0883883461 : f32
    %236 = vector.broadcast %cst_59 : f32 to vector<3x3xf32>
    %237 = arith.mulf %235, %236 : vector<3x3xf32>
    %cst_60 = arith.constant dense<0xFF800000> : vector<3xf32>
    %238 = vector.multi_reduction <maximumf>, %237, %cst_60 [1] : vector<3x3xf32> to vector<3xf32>
    %239 = vector.shape_cast %238 : vector<3xf32> to vector<3x1xf32>
    %240 = vector.broadcast %239 : vector<3x1xf32> to vector<3x3xf32>
    %241 = arith.subf %237, %240 : vector<3x3xf32>
    %242 = math.exp %241 : vector<3x3xf32>
    %cst_61 = arith.constant dense<0.000000e+00> : vector<3xf32>
    %243 = vector.multi_reduction <add>, %242, %cst_61 [1] : vector<3x3xf32> to vector<3xf32>
    %244 = vector.shape_cast %243 : vector<3xf32> to vector<3x1xf32>
    %245 = tpu.reciprocal %244 {approx = true} : vector<3x1xf32> -> vector<3x1xf32>
    %246 = vector.broadcast %245 : vector<3x1xf32> to vector<3x3xf32>
    %247 = arith.mulf %242, %246 : vector<3x3xf32>
    %c0_62 = arith.constant 0 : index
    %c0_63 = arith.constant 0 : index
    %c0_64 = arith.constant 0 : index
    %248 = vector.load %arg7[%c0_62, %c0_63, %c0_64] : memref<2x3x3xf32, #tpu.memory_space<vmem>>, vector<1x3x3xf32>
    %249 = vector.shape_cast %248 : vector<1x3x3xf32> to vector<3x3xf32>
    %250 = vector.shape_cast %247 : vector<3x3xf32> to vector<1x3x3xf32>
    tpu.vector_store %arg7[%c0_62, %c0_63, %c0_64], %250 {strides = array<i32>} : memref<2x3x3xf32, #tpu.memory_space<vmem>>, vector<1x3x3xf32>,
    %c0_65 = arith.constant 0 : index
    %c0_66 = arith.constant 0 : index
    %251 = vector.load %arg3[%c0_65, %c0_66] : memref<1x2xf32, #tpu.memory_space<vmem>>, vector<1x2xf32>
    %c0_67 = arith.constant 0 : index
    %c0_68 = arith.constant 0 : index
    %c0_69 = arith.constant 0 : index
    %252 = vector.load %arg2[%c0_67, %c0_68, %c0_69] : memref<4x32x6xf32, #tpu.memory_space<vmem>>, vector<1x32x6xf32>
    %253 = vector.shape_cast %252 : vector<1x32x6xf32> to vector<32x6xf32>
    %cst_70 = arith.constant dense<0.000000e+00> : vector<3x6xf32>
    %254 = tpu.matmul %212, %253, %cst_70 {dimension_numbers = #tpu.dot_dimension_numbers<[1], [0], [0], [1], [0, 0, 1, 1], [], []>} : vector<3x32xf32>, vector<32x6xf32>, vector<3x6xf32> -> vector<3x6xf32>
    %255 = vector.extract_strided_slice %254 {offsets = [0, 0], sizes = [1, 2], strides = [1, 1]} : vector<3x6xf32> to vector<1x2xf32>
    %256 = vector.extract_strided_slice %254 {offsets = [1, 2], sizes = [1, 2], strides = [1, 1]} : vector<3x6xf32> to vector<1x2xf32>
    %257 = arith.addf %255, %256 : vector<1x2xf32>
    %258 = vector.extract_strided_slice %254 {offsets = [2, 4], sizes = [1, 2], strides = [1, 1]} : vector<3x6xf32> to vector<1x2xf32>
    %259 = arith.addf %257, %258 : vector<1x2xf32>
    %260 = arith.addf %251, %259 : vector<1x2xf32>
    %c1_71 = arith.constant 1 : index
    %c0_72 = arith.constant 0 : index
    %c0_73 = arith.constant 0 : index
    %261 = vector.load %arg2[%c1_71, %c0_72, %c0_73] : memref<4x32x6xf32, #tpu.memory_space<vmem>>, vector<1x32x6xf32>
    %262 = vector.shape_cast %261 : vector<1x32x6xf32> to vector<32x6xf32>
    %cst_74 = arith.constant dense<0.000000e+00> : vector<3x6xf32>
    %263 = tpu.matmul %216, %262, %cst_74 {dimension_numbers = #tpu.dot_dimension_numbers<[1], [0], [0], [1], [0, 0, 1, 1], [], []>} : vector<3x32xf32>, vector<32x6xf32>, vector<3x6xf32> -> vector<3x6xf32>
    %264 = vector.extract_strided_slice %263 {offsets = [0, 0], sizes = [1, 2], strides = [1, 1]} : vector<3x6xf32> to vector<1x2xf32>
    %265 = vector.extract_strided_slice %263 {offsets = [1, 2], sizes = [1, 2], strides = [1, 1]} : vector<3x6xf32> to vector<1x2xf32>
    %266 = arith.addf %264, %265 : vector<1x2xf32>
    %267 = vector.extract_strided_slice %263 {offsets = [2, 4], sizes = [1, 2], strides = [1, 1]} : vector<3x6xf32> to vector<1x2xf32>
    %268 = arith.addf %266, %267 : vector<1x2xf32>
    %269 = arith.addf %260, %268 : vector<1x2xf32>
    %c2_75 = arith.constant 2 : index
    %c0_76 = arith.constant 0 : index
    %c0_77 = arith.constant 0 : index
    %270 = vector.load %arg2[%c2_75, %c0_76, %c0_77] : memref<4x32x6xf32, #tpu.memory_space<vmem>>, vector<1x32x6xf32>
    %271 = vector.shape_cast %270 : vector<1x32x6xf32> to vector<32x6xf32>
    %cst_78 = arith.constant dense<0.000000e+00> : vector<3x6xf32>
    %272 = tpu.matmul %220, %271, %cst_78 {dimension_numbers = #tpu.dot_dimension_numbers<[1], [0], [0], [1], [0, 0, 1, 1], [], []>} : vector<3x32xf32>, vector<32x6xf32>, vector<3x6xf32> -> vector<3x6xf32>
    %273 = vector.extract_strided_slice %272 {offsets = [0, 0], sizes = [1, 2], strides = [1, 1]} : vector<3x6xf32> to vector<1x2xf32>
    %274 = vector.extract_strided_slice %272 {offsets = [1, 2], sizes = [1, 2], strides = [1, 1]} : vector<3x6xf32> to vector<1x2xf32>
    %275 = arith.addf %273, %274 : vector<1x2xf32>
    %276 = vector.extract_strided_slice %272 {offsets = [2, 4], sizes = [1, 2], strides = [1, 1]} : vector<3x6xf32> to vector<1x2xf32>
    %277 = arith.addf %275, %276 : vector<1x2xf32>
    %278 = arith.addf %269, %277 : vector<1x2xf32>
    %c3_79 = arith.constant 3 : index
    %c0_80 = arith.constant 0 : index
    %c0_81 = arith.constant 0 : index
    %279 = vector.load %arg2[%c3_79, %c0_80, %c0_81] : memref<4x32x6xf32, #tpu.memory_space<vmem>>, vector<1x32x6xf32>
    %280 = vector.shape_cast %279 : vector<1x32x6xf32> to vector<32x6xf32>
    %cst_82 = arith.constant dense<0.000000e+00> : vector<3x6xf32>
    %281 = tpu.matmul %224, %280, %cst_82 {dimension_numbers = #tpu.dot_dimension_numbers<[1], [0], [0], [1], [0, 0, 1, 1], [], []>} : vector<3x32xf32>, vector<32x6xf32>, vector<3x6xf32> -> vector<3x6xf32>
    %282 = vector.extract_strided_slice %281 {offsets = [0, 0], sizes = [1, 2], strides = [1, 1]} : vector<3x6xf32> to vector<1x2xf32>
    %283 = vector.extract_strided_slice %281 {offsets = [1, 2], sizes = [1, 2], strides = [1, 1]} : vector<3x6xf32> to vector<1x2xf32>
    %284 = arith.addf %282, %283 : vector<1x2xf32>
    %285 = vector.extract_strided_slice %281 {offsets = [2, 4], sizes = [1, 2], strides = [1, 1]} : vector<3x6xf32> to vector<1x2xf32>
    %286 = arith.addf %284, %285 : vector<1x2xf32>
    %287 = arith.addf %278, %286 : vector<1x2xf32>
    %288 = vector.extract_strided_slice %144 {offsets = [0, 0], sizes = [1, 32], strides = [1, 1]} : vector<4x32xf32> to vector<1x32xf32>
    %289 = vector.extract_strided_slice %176 {offsets = [0, 0], sizes = [1, 32], strides = [1, 1]} : vector<4x32xf32> to vector<1x32xf32>
    %290 = vector.extract_strided_slice %208 {offsets = [0, 0], sizes = [1, 32], strides = [1, 1]} : vector<4x32xf32> to vector<1x32xf32>
    %291 = tpu.concatenate %288, %289, %290 in 0 : vector<1x32xf32>, vector<1x32xf32>, vector<1x32xf32> -> vector<3x32xf32>
    %292 = vector.extract_strided_slice %144 {offsets = [1, 0], sizes = [1, 32], strides = [1, 1]} : vector<4x32xf32> to vector<1x32xf32>
    %293 = vector.extract_strided_slice %176 {offsets = [1, 0], sizes = [1, 32], strides = [1, 1]} : vector<4x32xf32> to vector<1x32xf32>
    %294 = vector.extract_strided_slice %208 {offsets = [1, 0], sizes = [1, 32], strides = [1, 1]} : vector<4x32xf32> to vector<1x32xf32>
    %295 = tpu.concatenate %292, %293, %294 in 0 : vector<1x32xf32>, vector<1x32xf32>, vector<1x32xf32> -> vector<3x32xf32>
    %296 = vector.extract_strided_slice %144 {offsets = [2, 0], sizes = [1, 32], strides = [1, 1]} : vector<4x32xf32> to vector<1x32xf32>
    %297 = vector.extract_strided_slice %176 {offsets = [2, 0], sizes = [1, 32], strides = [1, 1]} : vector<4x32xf32> to vector<1x32xf32>
    %298 = vector.extract_strided_slice %208 {offsets = [2, 0], sizes = [1, 32], strides = [1, 1]} : vector<4x32xf32> to vector<1x32xf32>
    %299 = tpu.concatenate %296, %297, %298 in 0 : vector<1x32xf32>, vector<1x32xf32>, vector<1x32xf32> -> vector<3x32xf32>
    %300 = vector.extract_strided_slice %144 {offsets = [3, 0], sizes = [1, 32], strides = [1, 1]} : vector<4x32xf32> to vector<1x32xf32>
    %301 = vector.extract_strided_slice %176 {offsets = [3, 0], sizes = [1, 32], strides = [1, 1]} : vector<4x32xf32> to vector<1x32xf32>
    %302 = vector.extract_strided_slice %208 {offsets = [3, 0], sizes = [1, 32], strides = [1, 1]} : vector<4x32xf32> to vector<1x32xf32>
    %303 = tpu.concatenate %300, %301, %302 in 0 : vector<1x32xf32>, vector<1x32xf32>, vector<1x32xf32> -> vector<3x32xf32>
    %304 = tpu.transpose %291, [1, 0] : vector<3x32xf32> -> vector<32x3xf32>
    %cst_83 = arith.constant dense<0.000000e+00> : vector<3x3xf32>
    %305 = tpu.matmul %291, %304, %cst_83 {dimension_numbers = #tpu.dot_dimension_numbers<[1], [0], [0], [1], [0, 0, 1, 1], [], []>} : vector<3x32xf32>, vector<32x3xf32>, vector<3x3xf32> -> vector<3x3xf32>
    %306 = tpu.transpose %295, [1, 0] : vector<3x32xf32> -> vector<32x3xf32>
    %cst_84 = arith.constant dense<0.000000e+00> : vector<3x3xf32>
    %307 = tpu.matmul %295, %306, %cst_84 {dimension_numbers = #tpu.dot_dimension_numbers<[1], [0], [0], [1], [0, 0, 1, 1], [], []>} : vector<3x32xf32>, vector<32x3xf32>, vector<3x3xf32> -> vector<3x3xf32>
    %308 = arith.addf %305, %307 : vector<3x3xf32>
    %309 = tpu.transpose %299, [1, 0] : vector<3x32xf32> -> vector<32x3xf32>
    %cst_85 = arith.constant dense<0.000000e+00> : vector<3x3xf32>
    %310 = tpu.matmul %299, %309, %cst_85 {dimension_numbers = #tpu.dot_dimension_numbers<[1], [0], [0], [1], [0, 0, 1, 1], [], []>} : vector<3x32xf32>, vector<32x3xf32>, vector<3x3xf32> -> vector<3x3xf32>
    %311 = arith.addf %308, %310 : vector<3x3xf32>
    %312 = tpu.transpose %303, [1, 0] : vector<3x32xf32> -> vector<32x3xf32>
    %cst_86 = arith.constant dense<0.000000e+00> : vector<3x3xf32>
    %313 = tpu.matmul %303, %312, %cst_86 {dimension_numbers = #tpu.dot_dimension_numbers<[1], [0], [0], [1], [0, 0, 1, 1], [], []>} : vector<3x32xf32>, vector<32x3xf32>, vector<3x3xf32> -> vector<3x3xf32>
    %314 = arith.addf %311, %313 : vector<3x3xf32>
    %cst_87 = arith.constant 0.0883883461 : f32
    %315 = vector.broadcast %cst_87 : f32 to vector<3x3xf32>
    %316 = arith.mulf %314, %315 : vector<3x3xf32>
    %cst_88 = arith.constant dense<0xFF800000> : vector<3xf32>
    %317 = vector.multi_reduction <maximumf>, %316, %cst_88 [1] : vector<3x3xf32> to vector<3xf32>
    %318 = vector.shape_cast %317 : vector<3xf32> to vector<3x1xf32>
    %319 = vector.broadcast %318 : vector<3x1xf32> to vector<3x3xf32>
    %320 = arith.subf %316, %319 : vector<3x3xf32>
    %321 = math.exp %320 : vector<3x3xf32>
    %cst_89 = arith.constant dense<0.000000e+00> : vector<3xf32>
    %322 = vector.multi_reduction <add>, %321, %cst_89 [1] : vector<3x3xf32> to vector<3xf32>
    %323 = vector.shape_cast %322 : vector<3xf32> to vector<3x1xf32>
    %324 = tpu.reciprocal %323 {approx = true} : vector<3x1xf32> -> vector<3x1xf32>
    %325 = vector.broadcast %324 : vector<3x1xf32> to vector<3x3xf32>
    %326 = arith.mulf %321, %325 : vector<3x3xf32>
    %c1_90 = arith.constant 1 : index
    %c0_91 = arith.constant 0 : index
    %c0_92 = arith.constant 0 : index
    %327 = vector.load %arg7[%c1_90, %c0_91, %c0_92] : memref<2x3x3xf32, #tpu.memory_space<vmem>>, vector<1x3x3xf32>
    %328 = vector.shape_cast %327 : vector<1x3x3xf32> to vector<3x3xf32>
    %329 = vector.shape_cast %326 : vector<3x3xf32> to vector<1x3x3xf32>
    tpu.vector_store %arg7[%c1_90, %c0_91, %c0_92], %329 {strides = array<i32>} : memref<2x3x3xf32, #tpu.memory_space<vmem>>, vector<1x3x3xf32>,
    %c0_93 = arith.constant 0 : index
    %c0_94 = arith.constant 0 : index
    %330 = vector.load %arg3[%c0_93, %c0_94] : memref<1x2xf32, #tpu.memory_space<vmem>>, vector<1x2xf32>
    %c0_95 = arith.constant 0 : index
    %c0_96 = arith.constant 0 : index
    %c0_97 = arith.constant 0 : index
    %331 = vector.load %arg2[%c0_95, %c0_96, %c0_97] : memref<4x32x6xf32, #tpu.memory_space<vmem>>, vector<1x32x6xf32>
    %332 = vector.shape_cast %331 : vector<1x32x6xf32> to vector<32x6xf32>
    %cst_98 = arith.constant dense<0.000000e+00> : vector<3x6xf32>
    %333 = tpu.matmul %291, %332, %cst_98 {dimension_numbers = #tpu.dot_dimension_numbers<[1], [0], [0], [1], [0, 0, 1, 1], [], []>} : vector<3x32xf32>, vector<32x6xf32>, vector<3x6xf32> -> vector<3x6xf32>
    %334 = vector.extract_strided_slice %333 {offsets = [0, 0], sizes = [1, 2], strides = [1, 1]} : vector<3x6xf32> to vector<1x2xf32>
    %335 = vector.extract_strided_slice %333 {offsets = [1, 2], sizes = [1, 2], strides = [1, 1]} : vector<3x6xf32> to vector<1x2xf32>
    %336 = arith.addf %334, %335 : vector<1x2xf32>
    %337 = vector.extract_strided_slice %333 {offsets = [2, 4], sizes = [1, 2], strides = [1, 1]} : vector<3x6xf32> to vector<1x2xf32>
    %338 = arith.addf %336, %337 : vector<1x2xf32>
    %339 = arith.addf %330, %338 : vector<1x2xf32>
    %c1_99 = arith.constant 1 : index
    %c0_100 = arith.constant 0 : index
    %c0_101 = arith.constant 0 : index
    %340 = vector.load %arg2[%c1_99, %c0_100, %c0_101] : memref<4x32x6xf32, #tpu.memory_space<vmem>>, vector<1x32x6xf32>
    %341 = vector.shape_cast %340 : vector<1x32x6xf32> to vector<32x6xf32>
    %cst_102 = arith.constant dense<0.000000e+00> : vector<3x6xf32>
    %342 = tpu.matmul %295, %341, %cst_102 {dimension_numbers = #tpu.dot_dimension_numbers<[1], [0], [0], [1], [0, 0, 1, 1], [], []>} : vector<3x32xf32>, vector<32x6xf32>, vector<3x6xf32> -> vector<3x6xf32>
    %343 = vector.extract_strided_slice %342 {offsets = [0, 0], sizes = [1, 2], strides = [1, 1]} : vector<3x6xf32> to vector<1x2xf32>
    %344 = vector.extract_strided_slice %342 {offsets = [1, 2], sizes = [1, 2], strides = [1, 1]} : vector<3x6xf32> to vector<1x2xf32>
    %345 = arith.addf %343, %344 : vector<1x2xf32>
    %346 = vector.extract_strided_slice %342 {offsets = [2, 4], sizes = [1, 2], strides = [1, 1]} : vector<3x6xf32> to vector<1x2xf32>
    %347 = arith.addf %345, %346 : vector<1x2xf32>
    %348 = arith.addf %339, %347 : vector<1x2xf32>
    %c2_103 = arith.constant 2 : index
    %c0_104 = arith.constant 0 : index
    %c0_105 = arith.constant 0 : index
    %349 = vector.load %arg2[%c2_103, %c0_104, %c0_105] : memref<4x32x6xf32, #tpu.memory_space<vmem>>, vector<1x32x6xf32>
    %350 = vector.shape_cast %349 : vector<1x32x6xf32> to vector<32x6xf32>
    %cst_106 = arith.constant dense<0.000000e+00> : vector<3x6xf32>
    %351 = tpu.matmul %299, %350, %cst_106 {dimension_numbers = #tpu.dot_dimension_numbers<[1], [0], [0], [1], [0, 0, 1, 1], [], []>} : vector<3x32xf32>, vector<32x6xf32>, vector<3x6xf32> -> vector<3x6xf32>
    %352 = vector.extract_strided_slice %351 {offsets = [0, 0], sizes = [1, 2], strides = [1, 1]} : vector<3x6xf32> to vector<1x2xf32>
    %353 = vector.extract_strided_slice %351 {offsets = [1, 2], sizes = [1, 2], strides = [1, 1]} : vector<3x6xf32> to vector<1x2xf32>
    %354 = arith.addf %352, %353 : vector<1x2xf32>
    %355 = vector.extract_strided_slice %351 {offsets = [2, 4], sizes = [1, 2], strides = [1, 1]} : vector<3x6xf32> to vector<1x2xf32>
    %356 = arith.addf %354, %355 : vector<1x2xf32>
    %357 = arith.addf %348, %356 : vector<1x2xf32>
    %c3_107 = arith.constant 3 : index
    %c0_108 = arith.constant 0 : index
    %c0_109 = arith.constant 0 : index
    %358 = vector.load %arg2[%c3_107, %c0_108, %c0_109] : memref<4x32x6xf32, #tpu.memory_space<vmem>>, vector<1x32x6xf32>
    %359 = vector.shape_cast %358 : vector<1x32x6xf32> to vector<32x6xf32>
    %cst_110 = arith.constant dense<0.000000e+00> : vector<3x6xf32>
    %360 = tpu.matmul %303, %359, %cst_110 {dimension_numbers = #tpu.dot_dimension_numbers<[1], [0], [0], [1], [0, 0, 1, 1], [], []>} : vector<3x32xf32>, vector<32x6xf32>, vector<3x6xf32> -> vector<3x6xf32>
    %361 = vector.extract_strided_slice %360 {offsets = [0, 0], sizes = [1, 2], strides = [1, 1]} : vector<3x6xf32> to vector<1x2xf32>
    %362 = vector.extract_strided_slice %360 {offsets = [1, 2], sizes = [1, 2], strides = [1, 1]} : vector<3x6xf32> to vector<1x2xf32>
    %363 = arith.addf %361, %362 : vector<1x2xf32>
    %364 = vector.extract_strided_slice %360 {offsets = [2, 4], sizes = [1, 2], strides = [1, 1]} : vector<3x6xf32> to vector<1x2xf32>
    %365 = arith.addf %363, %364 : vector<1x2xf32>
    %366 = arith.addf %357, %365 : vector<1x2xf32>
    %367 = tpu.concatenate %287, %366 in 0 : vector<1x2xf32>, vector<1x2xf32> -> vector<2x2xf32>
    %cst_111 = arith.constant dense<0xFF800000> : vector<2xf32>
    %368 = vector.multi_reduction <maximumf>, %367, %cst_111 [1] : vector<2x2xf32> to vector<2xf32>
    %369 = vector.shape_cast %368 : vector<2xf32> to vector<2x1xf32>
    %370 = vector.broadcast %369 : vector<2x1xf32> to vector<2x2xf32>
    %371 = arith.subf %367, %370 : vector<2x2xf32>
    %372 = math.exp %371 : vector<2x2xf32>
    %cst_112 = arith.constant dense<0.000000e+00> : vector<2xf32>
    %373 = vector.multi_reduction <add>, %372, %cst_112 [1] : vector<2x2xf32> to vector<2xf32>
    %374 = vector.shape_cast %373 : vector<2xf32> to vector<2x1xf32>
    %375 = tpu.reciprocal %374 {approx = true} : vector<2x1xf32> -> vector<2x1xf32>
    %376 = vector.broadcast %375 : vector<2x1xf32> to vector<2x2xf32>
    %377 = arith.mulf %372, %376 : vector<2x2xf32>
    %c0_113 = arith.constant 0 : index
    %c0_114 = arith.constant 0 : index
    %378 = vector.load %arg4[%c0_113, %c0_114] : memref<2x2xf32, #tpu.memory_space<vmem>>, vector<2x2xf32>
    tpu.vector_store %arg4[%c0_113, %c0_114], %377 {strides = array<i32>} : memref<2x2xf32, #tpu.memory_space<vmem>>, vector<2x2xf32>,
    return
  }
}

</mosaic_0001>

<bundles_post_ra>
// kernel: _sfta_forward.1
= control target key start
LH: loop header
LB: loop body
LE: loop exit
PB: predicated region body
PF: predicated region fallthrough
CT: control target
= control target key end

     0   :  { %16 = vsyncpa [#allocation3], 0  ;;  %vm65_vm0 = vcmask 48128   ;;  %s6546_s0 = inlined_call_operand.vmem [shape: f32[4,32,6], index: 0, kind: input, shape index: {}]   ;;  %s6547_s1 = inlined_call_operand.vmem [shape: f32[4,6,32], index: 1, kind: input, shape index: {}]   ;;  %s6548_s2 = inlined_call_operand.vmem [shape: f32[4,32,6], index: 2, kind: input, shape index: {}]   ;;  %s6549_s3 = inlined_call_operand.vmem [shape: f32[1,2], index: 3, kind: input, shape index: {}]   ;;  %s6550_s4 = inlined_call_operand.vmem [shape: f32[6,6], index: 4, kind: input, shape index: {}]   ;;  %s6551_s5 = inlined_call_operand.vmem [shape: f32[2,6], index: 5, kind: input, shape index: {}]   ;;  %s6552_s6 = inlined_call_operand.vmem [shape: f32[6,2], index: 6, kind: input, shape index: {}]   ;;  %s6553_s7 = inlined_call_operand.hbm [shape: f32[2,2], index: 7, kind: output, shape index: {0}]   ;;  %s6554_s8 = inlined_call_operand.hbm [shape: f32[4,32,32], index: 8, kind: output, shape index: {1}]   ;;  %s6555_s9 = inlined_call_operand.hbm [shape: f32[6,32,32], index: 9, kind: output, shape index: {2}]   ;;  %s6556_s10 = inlined_call_operand.vmem [shape: f32[2,3,3], index: 10, kind: output, shape index: {3}]  }
   0x1   :  { %v33_v0 = vld [vmem:[%s6546_s0] sm:$0xff]  ;;  %v34_v1 = vld [vmem:[%s6546_s0 + $0x8] sm:$0xff]  ;;  %v35_v5 = vld [vmem:[%s6546_s0 + $0x10] sm:$0xff] }
   0x2   :  { %v37_v2 = vld [vmem:[%s6546_s0 + $0x20] sm:$0xff]  ;;  %v49_v3 = vpack.c.bf16 %v34_v1, %v33_v0  ;;  %v38_v4 = vld [vmem:[%s6546_s0 + $0x28] sm:$0xff]  ;;  %v36_v6 = vld [vmem:[%s6546_s0 + $0x18] sm:$0xff] }
   0x3   :  { %v51_v7 = vpack.c.bf16 %v38_v4, %v37_v2  ;;  %v50_v8 = vpack.c.bf16 %v36_v6, %v35_v5  ;;  %v39_v9 = vld [vmem:[%s6546_s0 + $0x30] sm:$0xff]  ;;  %v40_v10 = vld [vmem:[%s6546_s0 + $0x38] sm:$0xff] }
   0x4   :  { %5129 = vmatprep.subr.msk.bf16.mxu0 %vm65_vm0, %v49_v3  ;;  %v67_v11 = vsel %vm65_vm0, %v49_v3, 0  ;;  %v52_v12 = vpack.c.bf16 %v40_v10, %v39_v9  ;;  %4911 = vmatprep.mubr.msk.bf16.mxu0 %vm65_vm0, %v49_v3 }
   0x5   :  { %5131 = vmatprep.subr.msk.bf16.mxu1 %vm65_vm0, %v51_v7  ;;  %4908 = vmatpush3.bf16.xpose.msra.mxu0 %v67_v11  ;;  %v122_v13 = vsel %vm65_vm0, %v51_v7, 0 }
   0x6   :  { %4916 = vmatpush3.bf16.xpose.msra.mxu1 %v122_v13  ;;  %5130 = vmatprep.subr.msk.bf16.mxu0 %vm65_vm0, %v50_v8 }
   0x7   :  { %17 = vsyncpa [#allocation5], 0  ;;  %5132 = vmatprep.subr.msk.bf16.mxu1 %vm65_vm0, %v52_v12  ;;  %4919 = vmatprep.mubr.msk.bf16.mxu1 %vm65_vm0, %v51_v7  ;;  %v41_v14 = vld [vmem:[%s6546_s0 + $0x40] sm:$0xff]  ;;  %v42_v15 = vld [vmem:[%s6546_s0 + $0x48] sm:$0xff]  ;;  %v70_v18 = vsel %vm65_vm0, %v50_v8, 0  ;;  %v125_v20 = vsel %vm65_vm0, %v52_v12, 0 }
   0x8   :  { %v45_v16 = vld [vmem:[%s6546_s0 + $0x60] sm:$0xff]  ;;  %v46_v17 = vld [vmem:[%s6546_s0 + $0x68] sm:$0xff]  ;;  %v53_v19 = vpack.c.bf16 %v42_v15, %v41_v14  ;;  %v43_v22 = vld [vmem:[%s6546_s0 + $0x50] sm:$0xff]  ;;  %vm302_vm1 = vcmask 261120   ;;  %vm5397_vm2 = vmmov 0   ;;  %vm1972_vm3 = vcmask 1041408  }
   0x9   :  { %v55_v21 = vpack.c.bf16 %v46_v17, %v45_v16  ;;  %v44_v23 = vld [vmem:[%s6546_s0 + $0x58] sm:$0xff]  ;;  %v47_v24 = vld [vmem:[%s6546_s0 + $0x70] sm:$0xff]  ;;  %vm1965_vm4 = vcmask 31744   ;;  %vm4307_vm5 = vcmask 46080   ;;  %vm4329_vm6 = vcmask 46107   ;;  %s5402_s27 = smov [#allocation4]  }
   0xa   :  { %v48_v25 = vld [vmem:[%s6546_s0 + $0x78] sm:$0xff]  ;;  %v177_v26 = vsel %vm65_vm0, %v53_v19, 0  ;;  %v54_v27 = vpack.c.bf16 %v44_v23, %v43_v22  ;;  %vm4316_vm7 = vcmask 18432   ;;  %vm4549_vm8 = vcmask 1045504   ;;  %s4735_s28 = sshll.u32 %s5402_s27, 4  ;;  %s4736_s28 = int_to_ptr.vmem [resolvable:$true] %s4735_s28 }
   0xb   :  { %v232_v28 = vsel %vm65_vm0, %v55_v21, 0  ;;  %v56_v29 = vpack.c.bf16 %v48_v25, %v47_v24  ;;  %vm4340_vm9 = vcmask 21507   ;;  %vm4707_vm10 = vcmask 9216   ;;  %p5331_p1 = scmp.lt.s32.totalorder %s4736_s28, %s4736_s28 }
   0xc   :  { %v180_v30 = vsel %vm65_vm0, %v54_v27, 0 }
   0xd   :  { %4910 = vmatpush3.bf16.xpose.msra.mxu0 %v70_v18  ;;  %v235_v31 = vsel %vm65_vm0, %v56_v29, 0 }
   0xe   :  { %4918 = vmatpush3.bf16.xpose.msra.mxu1 %v125_v20  ;;  %5133 = vmatprep.subr.msk.bf16.mxu0 %vm65_vm0, %v53_v19 }
   0xf   :  { %5135 = vmatprep.subr.msk.bf16.mxu1 %vm65_vm0, %v55_v21 }
  0x14   :  { %4912 = vmatmul.mubr.msk.bf16.vlgmr.msra.gmra.mrb[0].mxu0 %vm65_vm0, %v50_v8 }
  0x15   :  { %4920 = vmatmul.mubr.msk.bf16.vlgmr.msra.gmra.mrb[0].mxu1 %vm65_vm0, %v52_v12  ;;  %4924 = vmatpush3.bf16.xpose.msra.mxu0 %v177_v26 }
  0x16   :  { %4932 = vmatpush3.bf16.xpose.msra.mxu1 %v232_v28  ;;  %5134 = vmatprep.subr.msk.bf16.mxu0 %vm65_vm0, %v54_v27 }
  0x17   :  { %5136 = vmatprep.subr.msk.bf16.mxu1 %vm65_vm0, %v56_v29  ;;  %4927 = vmatprep.mubr.msk.bf16.mxu0 %vm65_vm0, %v53_v19 }
  0x18   :  { %4935 = vmatprep.mubr.msk.bf16.mxu1 %vm65_vm0, %v55_v21 }
  0x1d   :  { %4926 = vmatpush3.bf16.xpose.msra.mxu0 %v180_v30 }
  0x1e   :  { %4934 = vmatpush3.bf16.xpose.msra.mxu1 %v235_v31 }
  0x24   :  { %4928 = vmatmul.mubr.msk.bf16.vlgmr.msra.gmra.mrb[4].mxu0 %vm65_vm0, %v54_v27 }
  0x25   :  { %4936 = vmatmul.mubr.msk.bf16.vlgmr.msra.gmra.mrb[4].mxu1 %vm65_vm0, %v56_v29 }
  0xe7   :  { %v4913_v32 = vpop.f32.mrb[0].mxu0 }
  0xe8   :  { %v4921_v33 = vpop.f32.mrb[0].mxu1  ;;  %v106_v34 = vpop.f32.mrb[1].mxu0  ;;  %v5548_v47 = vmul.f32 0.4082483, %v4913_v32 }
  0xe9   :  { %v5534_v35 = vmul.f32 0.4082483, %v106_v34  ;;  %v161_v36 = vpop.f32.mrb[1].mxu1  ;;  %v4914_v37 = vpop.f32.mrb[2].mxu0  ;;  %v5554_v50 = vmul.f32 0.4082483, %v4921_v33 }
  0xea   :  { %v5536_v38 = vmul.f32 0.4082483, %v161_v36  ;;  %v109_v39 = vpop.f32.mrb[3].mxu0  ;;  %v4922_v40 = vpop.f32.mrb[2].mxu1  ;;  %v5552_v49 = vmul.f32 0.4082483, %v4914_v37 }
  0xeb   :  { %v5538_v41 = vmul.f32 0.4082483, %v109_v39  ;;  %v164_v42 = vpop.f32.mrb[3].mxu1  ;;  %v303_v43 = vsel %vm302_vm1, %v5534_v35, -inf  ;;  %v309_v51 = vsel %vm302_vm1, %v5548_v47, -inf  ;;  %v321_v55 = vsel %vm302_vm1, %v5554_v50, -inf }
  0xec   :  { %v5542_v44 = vmul.f32 0.4082483, %v164_v42  ;;  %v315_v45 = vsel %vm302_vm1, %v5536_v38, -inf  ;;  %304 = vmax.xlane.f32.xlu0 %v303_v43  ;;  %v5558_v52 = vmul.f32 0.4082483, %v4922_v40  ;;  %v312_v53 = vsel %vm302_vm1, %v5552_v49, -inf }
  0xed   :  { %316 = vmax.xlane.f32.xlu1 %v315_v45  ;;  %v306_v48 = vsel %vm302_vm1, %v5538_v41, -inf }
  0xee   :  { %v318_v46 = vsel %vm302_vm1, %v5542_v44, -inf  ;;  %v324_v56 = vsel %vm302_vm1, %v5558_v52, -inf }
  0xf0   :  { %307 = vmax.xlane.f32.xlu0 %v306_v48 }
  0xf1   :  { %319 = vmax.xlane.f32.xlu1 %v318_v46 }
  0xf4   :  { %310 = vmax.xlane.f32.xlu0 %v309_v51 }
  0xf5   :  { %313 = vmax.xlane.f32.xlu1 %v312_v53 }
  0xf7   :  { %v4929_v54 = vpop.f32.mrb[4].mxu0 }
  0xf8   :  { %322 = vmax.xlane.f32.xlu0 %v321_v55  ;;  %v216_v57 = vpop.f32.mrb[5].mxu0  ;;  %v4937_v58 = vpop.f32.mrb[4].mxu1  ;;  %v5580_v7 = vmul.f32 0.4082483, %v4929_v54 }
  0xf9   :  { %325 = vmax.xlane.f32.xlu1 %v324_v56  ;;  %v5566_v59 = vmul.f32 0.4082483, %v216_v57  ;;  %v4930_v60 = vpop.f32.mrb[6].mxu0  ;;  %v271_v61 = vpop.f32.mrb[5].mxu1  ;;  %v5586_v10 = vmul.f32 0.4082483, %v4937_v58 }
  0xfa   :  { %v219_v62 = vpop.f32.mrb[7].mxu0  ;;  %v5568_v63 = vmul.f32 0.4082483, %v271_v61  ;;  %v4938_v0 = vpop.f32.mrb[6].mxu1  ;;  %v5584_v9 = vmul.f32 0.4082483, %v4930_v60 }
  0xfb   :  { %v5570_v1 = vmul.f32 0.4082483, %v219_v62  ;;  %v327_v2 = vsel %vm302_vm1, %v5566_v59, -inf  ;;  %v274_v3 = vpop.f32.mrb[7].mxu1  ;;  %v333_v11 = vsel %vm302_vm1, %v5580_v7, -inf  ;;  %v345_v14 = vsel %vm302_vm1, %v5586_v10, -inf }
  0xfc   :  { %328 = vmax.xlane.f32.xlu0 %v327_v2  ;;  %v5574_v4 = vmul.f32 0.4082483, %v274_v3  ;;  %v339_v6 = vsel %vm302_vm1, %v5568_v63, -inf  ;;  %v5590_v12 = vmul.f32 0.4082483, %v4938_v0  ;;  %v336_v13 = vsel %vm302_vm1, %v5584_v9, -inf }
  0xfd   :  { %v330_v5 = vsel %vm302_vm1, %v5570_v1, -inf }
  0xfe   :  { %331 = vmax.xlane.f32.xlu1 %v330_v5  ;;  %v342_v8 = vsel %vm302_vm1, %v5574_v4, -inf  ;;  %v348_v15 = vsel %vm302_vm1, %v5590_v12, -inf }
 0x100   :  { %340 = vmax.xlane.f32.xlu0 %v339_v6 }
 0x102   :  { %343 = vmax.xlane.f32.xlu1 %v342_v8 }
 0x104   :  { %334 = vmax.xlane.f32.xlu0 %v333_v11 }
 0x106   :  { %337 = vmax.xlane.f32.xlu1 %v336_v13 }
 0x108   :  { %346 = vmax.xlane.f32.xlu0 %v345_v14 }
 0x10a   :  { %349 = vmax.xlane.f32.xlu1 %v348_v15 }
 0x179   :  { %v305_v16 = vpop.xlane.xlu0 %304 }
 0x17a   :  { %v317_v17 = vpop.xlane.xlu1 %316  ;;  %v351_v18 = vsub.f32 %v5534_v35, %v305_v16 }
 0x17b   :  { %v355_v19 = vsub.f32 %v5536_v38, %v317_v17 }
 0x17c   :  { %v367_v20 = vmul.f32 1.442695, %v351_v18 }
 0x17d   :  { %v375_v21 = vmul.f32 1.442695, %v355_v19  ;;  %v308_v22 = vpop.xlane.xlu0 %307 }
 0x17e   :  { %5154 = vpow2.f32 %v367_v20  ;;  %v320_v23 = vpop.xlane.xlu1 %319  ;;  %v352_v24 = vsub.f32 %v5538_v41, %v308_v22 }
 0x17f   :  { %v356_v25 = vsub.f32 %v5542_v44, %v320_v23  ;;  %5156 = vpow2.f32 %v375_v21 }
 0x180   :  { %v369_v26 = vmul.f32 1.442695, %v352_v24 }
 0x181   :  { %v377_v27 = vmul.f32 1.442695, %v356_v25  ;;  %v311_v28 = vpop.xlane.xlu0 %310 }
 0x182   :  { %5158 = vpow2.f32 %v369_v26  ;;  %v314_v29 = vpop.xlane.xlu1 %313  ;;  %v353_v30 = vsub.f32 %v5548_v47, %v311_v28 }
 0x183   :  { %v354_v31 = vsub.f32 %v5552_v49, %v314_v29  ;;  %5160 = vpow2.f32 %v377_v27 }
 0x184   :  { %v371_v32 = vmul.f32 1.442695, %v353_v30 }
 0x185   :  { %v373_v33 = vmul.f32 1.442695, %v354_v31  ;;  %v323_v34 = vpop.xlane.xlu0 %322 }
 0x186   :  { %5162 = vpow2.f32 %v371_v32  ;;  %v326_v35 = vpop.xlane.xlu1 %325  ;;  %v357_v36 = vsub.f32 %v5554_v50, %v323_v34  ;;  %v5396_v32 = vmov 0.0  }
 0x187   :  { %v358_v37 = vsub.f32 %v5558_v52, %v326_v35  ;;  %5164 = vpow2.f32 %v373_v33  ;;  %4939 = vmatprep.subr.bf16.mxu0 %v5396_v32  ;;  %4947 = vmatprep.subr.bf16.mxu1 %v5396_v32 }
 0x188   :  { %v5606_v38 = vpop.eup %5154  ;;  %v379_v39 = vmul.f32 1.442695, %v357_v36  ;;  %4943 = vmatprep.mubr.msk.bf16.mxu0 %vm5397_vm2, %v5396_v32  ;;  %4951 = vmatprep.mubr.msk.bf16.mxu1 %vm5397_vm2, %v5396_v32 }
 0x189   :  { %v381_v40 = vmul.f32 1.442695, %v358_v37  ;;  %v329_v41 = vpop.xlane.xlu0 %328  ;;  %v399_v42 = vsel %vm302_vm1, %v5606_v38, 0.0  ;;  %v5610_v43 = vpop.eup %5156 }
 0x18a   :  { %5166 = vpow2.f32 %v379_v39  ;;  %v359_v44 = vsub.f32 %v5566_v59, %v329_v41  ;;  %400 = vadd.xlane.f32.xlu0 %v399_v42  ;;  %v411_v50 = vsel %vm302_vm1, %v5610_v43, 0.0 }
 0x18b   :  { %v332_v45 = vpop.xlane.xlu1 %331  ;;  %5168 = vpow2.f32 %v381_v40 }
 0x18c   :  { %v5613_v46 = vpop.eup %5158  ;;  %v383_v47 = vmul.f32 1.442695, %v359_v44  ;;  %v360_v48 = vsub.f32 %v5570_v1, %v332_v45 }
 0x18d   :  { %v341_v49 = vpop.xlane.xlu0 %340  ;;  %v402_v51 = vsel %vm302_vm1, %v5613_v46, 0.0  ;;  %v5620_v52 = vpop.eup %5160 }
 0x18e   :  { %5170 = vpow2.f32 %v383_v47  ;;  %v385_v53 = vmul.f32 1.442695, %v360_v48  ;;  %v363_v54 = vsub.f32 %v5568_v63, %v341_v49  ;;  %412 = vadd.xlane.f32.xlu0 %v411_v50  ;;  %403 = vadd.xlane.f32.xlu1 %v402_v51  ;;  %v414_v61 = vsel %vm302_vm1, %v5620_v52, 0.0 }
 0x18f   :  { %v344_v55 = vpop.xlane.xlu1 %343 }
 0x190   :  { %v5623_v56 = vpop.eup %5162  ;;  %5172 = vpow2.f32 %v385_v53  ;;  %v391_v57 = vmul.f32 1.442695, %v363_v54  ;;  %v364_v58 = vsub.f32 %v5574_v4, %v344_v55 }
 0x191   :  { %v335_v59 = vpop.xlane.xlu0 %334  ;;  %v405_v60 = vsel %vm302_vm1, %v5623_v56, 0.0  ;;  %v5630_v62 = vpop.eup %5164 }
 0x192   :  { %5174 = vpow2.f32 %v391_v57  ;;  %v393_v63 = vmul.f32 1.442695, %v364_v58  ;;  %v361_v0 = vsub.f32 %v5580_v7, %v335_v59  ;;  %406 = vadd.xlane.f32.xlu0 %v405_v60  ;;  %415 = vadd.xlane.f32.xlu1 %v414_v61  ;;  %v408_v8 = vsel %vm302_vm1, %v5630_v62, 0.0 }
 0x193   :  { %v338_v1 = vpop.xlane.xlu1 %337 }
 0x194   :  { %v5633_v2 = vpop.eup %5166  ;;  %5176 = vpow2.f32 %v393_v63  ;;  %v387_v3 = vmul.f32 1.442695, %v361_v0  ;;  %v362_v4 = vsub.f32 %v5584_v9, %v338_v1 }
 0x195   :  { %v347_v5 = vpop.xlane.xlu0 %346  ;;  %v417_v6 = vsel %vm302_vm1, %v5633_v2, 0.0  ;;  %v5640_v11 = vpop.eup %5168 }
 0x196   :  { %5178 = vpow2.f32 %v387_v3  ;;  %v389_v7 = vmul.f32 1.442695, %v362_v4  ;;  %v365_v13 = vsub.f32 %v5586_v10, %v347_v5  ;;  %418 = vadd.xlane.f32.xlu0 %v417_v6  ;;  %409 = vadd.xlane.f32.xlu1 %v408_v8  ;;  %v420_v18 = vsel %vm302_vm1, %v5640_v11, 0.0 }
 0x197   :  { %v350_v14 = vpop.xlane.xlu1 %349 }
 0x198   :  { %v5643_v15 = vpop.eup %5170  ;;  %5180 = vpow2.f32 %v389_v7  ;;  %v395_v9 = vmul.f32 1.442695, %v365_v13  ;;  %v366_v16 = vsub.f32 %v5590_v12, %v350_v14  ;;  %v57_v7 = vld [vmem:[%s6547_s1] sm:$0x3f] }
 0x199   :  { %v423_v17 = vsel %vm302_vm1, %v5643_v15, 0.0 }
 0x19a   :  { %v5650_v19 = vpop.eup %5172  ;;  %5182 = vpow2.f32 %v395_v9  ;;  %v397_v20 = vmul.f32 1.442695, %v366_v16  ;;  %424 = vadd.xlane.f32.xlu0 %v423_v17  ;;  %421 = vadd.xlane.f32.xlu1 %v420_v18  ;;  %v61_v17 = vpack.c.bf16 %v57_v7, %v57_v7 }
 0x19b   :  { %v426_v12 = vsel %vm302_vm1, %v5650_v19, 0.0 }
 0x19c   :  { %v5652_v10 = vpop.eup %5174  ;;  %5184 = vpow2.f32 %v397_v20  ;;  %v58_v20 = vld [vmem:[%s6547_s1 + $0x8] sm:$0x3f] }
 0x19d   :  { %v435_v21 = vsel %vm302_vm1, %v5652_v10, 0.0 }
 0x19e   :  { %v5658_v22 = vpop.eup %5176  ;;  %436 = vadd.xlane.f32.xlu0 %v435_v21  ;;  %427 = vadd.xlane.f32.xlu1 %v426_v12 }
 0x19f   :  { %v438_v25 = vsel %vm302_vm1, %v5658_v22, 0.0 }
 0x1a0   :  { %v5660_v23 = vpop.eup %5178 }
 0x1a1   :  { %v429_v24 = vsel %vm302_vm1, %v5660_v23, 0.0 }
 0x1a2   :  { %v5666_v26 = vpop.eup %5180  ;;  %430 = vadd.xlane.f32.xlu0 %v429_v24  ;;  %439 = vadd.xlane.f32.xlu1 %v438_v25  ;;  %v62_v25 = vpack.c.bf16 %v58_v20, %v58_v20 }
 0x1a3   :  { %v432_v29 = vsel %vm302_vm1, %v5666_v26, 0.0 }
 0x1a4   :  { %v5668_v27 = vpop.eup %5182 }
 0x1a5   :  { %v441_v28 = vsel %vm302_vm1, %v5668_v27, 0.0 }
 0x1a6   :  { %v5674_v30 = vpop.eup %5184  ;;  %442 = vadd.xlane.f32.xlu0 %v441_v28  ;;  %433 = vadd.xlane.f32.xlu1 %v432_v29 }
 0x1a7   :  { %v444_v31 = vsel %vm302_vm1, %v5674_v30, 0.0 }
 0x1aa   :  { %445 = vadd.xlane.f32.xlu1 %v444_v31 }
 0x217   :  { %v401_v33 = vpop.xlane.xlu0 %400 }
 0x218   :  { %5186 = vrcp.f32 %v401_v33 }
 0x21b   :  { %v413_v34 = vpop.xlane.xlu0 %412  ;;  %v404_v35 = vpop.xlane.xlu1 %403 }
 0x21c   :  { %5188 = vrcp.f32 %v413_v34 }
 0x21d   :  { %5190 = vrcp.f32 %v404_v35 }
 0x21f   :  { %v407_v36 = vpop.xlane.xlu0 %406  ;;  %v416_v37 = vpop.xlane.xlu1 %415 }
 0x220   :  { %5192 = vrcp.f32 %v407_v36 }
 0x221   :  { %5194 = vrcp.f32 %v416_v37 }
 0x222   :  { %v5187_v39 = vpop.eup %5186 }
 0x223   :  { %v419_v40 = vpop.xlane.xlu0 %418  ;;  %v410_v41 = vpop.xlane.xlu1 %409  ;;  %v463_v42 = vmul.f32 %v5187_v39, %v5606_v38  ;;  %v59_v39 = vld [vmem:[%s6547_s1 + $0x10] sm:$0x3f] }
 0x224   :  { %5196 = vrcp.f32 %v419_v40 }
 0x225   :  { %5198 = vrcp.f32 %v410_v41  ;;  %479 = vst.msk [vmem:[#allocation4] sm:$0xff] %vm302_vm1, %v463_v42  ;;  %v63_v41 = vpack.c.bf16 %v59_v39, %v59_v39 }
 0x226   :  { %v5189_v44 = vpop.eup %5188 }
 0x227   :  { %v5191_v45 = vpop.eup %5190  ;;  %v425_v47 = vpop.xlane.xlu0 %424  ;;  %v467_v49 = vmul.f32 %v5189_v44, %v5610_v43 }
 0x228   :  { %v422_v48 = vpop.xlane.xlu1 %421  ;;  %5200 = vrcp.f32 %v425_v47  ;;  %v464_v50 = vmul.f32 %v5191_v45, %v5613_v46 }
 0x229   :  { %5202 = vrcp.f32 %v422_v48  ;;  %483 = vst.msk [vmem:[#allocation4 + $0x20] sm:$0xff] %vm302_vm1, %v467_v49 }
 0x22a   :  { %v5193_v51 = vpop.eup %5192  ;;  %480 = vst.msk [vmem:[#allocation4 + $0x8] sm:$0xff] %vm302_vm1, %v464_v50  ;;  %v495_v38 = vpack.c.bf16 %v464_v50, %v463_v42  ;;  %v60_v42 = vld [vmem:[%s6547_s1 + $0x18] sm:$0x3f] }
 0x22b   :  { %v5195_v53 = vpop.eup %5194  ;;  %v437_v54 = vpop.xlane.xlu0 %436  ;;  %v465_v57 = vmul.f32 %v5193_v51, %v5623_v56 }
 0x22c   :  { %v428_v55 = vpop.xlane.xlu1 %427  ;;  %5204 = vrcp.f32 %v437_v54  ;;  %v507_v58 = vsel %vm302_vm1, %v495_v38, 0  ;;  %v468_v43 = vmul.f32 %v5195_v53, %v5620_v52  ;;  %v5398_v54 = vmov 1983009808  }
 0x22d   :  { %5206 = vrcp.f32 %v428_v55  ;;  %4940 = vmatpush3.bf16.xpose.msra.mxu0 %v507_v58  ;;  %481 = vst.msk [vmem:[#allocation4 + $0x10] sm:$0xff] %vm302_vm1, %v465_v57  ;;  %v807_v55 = vunpack.c.l.s4 %v5398_v54 }
 0x22e   :  { %v5197_v46 = vpop.eup %5196  ;;  %484 = vst.msk [vmem:[#allocation4 + $0x28] sm:$0xff] %vm302_vm1, %v468_v43  ;;  %v497_v59 = vpack.c.bf16 %v468_v43, %v467_v49  ;;  %4941 = vmatprep.subr.bf16.mxu0 %v5396_v32 }
 0x22f   :  { %v5199_v60 = vpop.eup %5198  ;;  %v431_v61 = vpop.xlane.xlu0 %430  ;;  %v469_v56 = vmul.f32 %v5197_v46, %v5633_v2  ;;  %v808_v43 = vunpack.c.0.s8 %v807_v55 }
 0x230   :  { %v440_v63 = vpop.xlane.xlu1 %439  ;;  %5208 = vrcp.f32 %v431_v61  ;;  %v556_v0 = vsel %vm302_vm1, %v497_v59, 0  ;;  %v466_v52 = vmul.f32 %v5199_v60, %v5630_v62  ;;  %v5399_v59 = vmov 1934713408  }
 0x231   :  { %5210 = vrcp.f32 %v440_v63  ;;  %4948 = vmatpush3.bf16.xpose.msra.mxu1 %v556_v0  ;;  %485 = vst.msk [vmem:[#allocation4 + $0x30] sm:$0xff] %vm302_vm1, %v469_v56  ;;  %v838_v60 = vunpack.c.l.s4 %v5399_v59 }
 0x232   :  { %v5201_v1 = vpop.eup %5200  ;;  %482 = vst.msk [vmem:[#allocation4 + $0x18] sm:$0xff] %vm302_vm1, %v466_v52  ;;  %v496_v3 = vpack.c.bf16 %v466_v52, %v465_v57  ;;  %4949 = vmatprep.subr.bf16.mxu1 %v5396_v32  ;;  %v809_v57 = vlaneseq }
 0x233   :  { %v5203_v4 = vpop.eup %5202  ;;  %v443_v5 = vpop.xlane.xlu0 %442  ;;  %v471_v2 = vmul.f32 %v5201_v1, %v5643_v15  ;;  %v839_v63 = vunpack.c.0.s8 %v838_v60 }
 0x234   :  { %v434_v6 = vpop.xlane.xlu1 %433  ;;  %5212 = vrcp.f32 %v443_v5  ;;  %v510_v8 = vsel %vm302_vm1, %v496_v3, 0  ;;  %v470_v62 = vmul.f32 %v5203_v4, %v5640_v11  ;;  %v810_v46 = vshrl.u32 %v809_v57, 7 }
 0x235   :  { %5214 = vrcp.f32 %v434_v6  ;;  %4942 = vmatpush3.bf16.xpose.msra.mxu0 %v510_v8  ;;  %487 = vst.msk [vmem:[#allocation4 + $0x40] sm:$0xff] %vm302_vm1, %v471_v2 }
 0x236   :  { %v5205_v13 = vpop.eup %5204  ;;  %486 = vst.msk [vmem:[#allocation4 + $0x38] sm:$0xff] %vm302_vm1, %v470_v62  ;;  %v498_v14 = vpack.c.bf16 %v470_v62, %v469_v56  ;;  %4955 = vmatprep.subr.bf16.mxu0 %v5396_v32  ;;  %v5750_v61 = vsub.s32 %v808_v43, %v810_v46  ;;  %v5753_v4 = vsub.s32 %v839_v63, %v810_v46 }
 0x237   :  { %v5207_v15 = vpop.eup %5206  ;;  %v475_v16 = vmul.f32 %v5205_v13, %v5652_v10 }
 0x238   :  { %v446_v9 = vpop.xlane.xlu1 %445  ;;  %v559_v11 = vsel %vm302_vm1, %v498_v14, 0  ;;  %v472_v18 = vmul.f32 %v5207_v15, %v5650_v19 }
 0x239   :  { %5216 = vrcp.f32 %v446_v9  ;;  %4950 = vmatpush3.bf16.xpose.msra.mxu1 %v559_v11  ;;  %491 = vst.msk [vmem:[#allocation4 + $0x60] sm:$0xff] %vm302_vm1, %v475_v16 }
 0x23a   :  { %v5209_v21 = vpop.eup %5208  ;;  %488 = vst.msk [vmem:[#allocation4 + $0x48] sm:$0xff] %vm302_vm1, %v472_v18  ;;  %v499_v12 = vpack.c.bf16 %v472_v18, %v471_v2  ;;  %4963 = vmatprep.subr.bf16.mxu1 %v5396_v32 }
 0x23b   :  { %v5211_v10 = vpop.eup %5210  ;;  %v473_v24 = vmul.f32 %v5209_v21, %v5660_v23  ;;  %v5400_v21 = vmov 0  }
 0x23c   :  { %4944 = vmatmul.mubr.msk.bf16.vlgmr.msra.gmra.mrb[8].mxu0 %vm302_vm1, %v61_v17  ;;  %v605_v19 = vsel %vm302_vm1, %v499_v12, 0  ;;  %v476_v28 = vmul.f32 %v5211_v10, %v5658_v22 }
 0x23d   :  { %4956 = vmatpush3.bf16.xpose.msra.mxu0 %v605_v19  ;;  %489 = vst.msk [vmem:[#allocation4 + $0x50] sm:$0xff] %vm302_vm1, %v473_v24  ;;  %4959 = vmatprep.mubr.msk.bf16.mxu0 %vm5397_vm2, %v5396_v32 }
 0x23e   :  { %v5213_v29 = vpop.eup %5212  ;;  %492 = vst.msk [vmem:[#allocation4 + $0x68] sm:$0xff] %vm302_vm1, %v476_v28  ;;  %v501_v31 = vpack.c.bf16 %v476_v28, %v475_v16  ;;  %4957 = vmatprep.subr.bf16.mxu0 %v5396_v32 }
 0x23f   :  { %v5215_v23 = vpop.eup %5214  ;;  %v477_v33 = vmul.f32 %v5213_v29, %v5668_v27 }
 0x240   :  { %4952 = vmatmul.mubr.msk.bf16.vlgmr.msra.gmra.mrb[8].mxu1 %vm302_vm1, %v62_v25  ;;  %v654_v34 = vsel %vm302_vm1, %v501_v31, 0  ;;  %v474_v22 = vmul.f32 %v5215_v23, %v5666_v26 }
 0x241   :  { %4964 = vmatpush3.bf16.xpose.msra.mxu1 %v654_v34  ;;  %493 = vst.msk [vmem:[#allocation4 + $0x70] sm:$0xff] %vm302_vm1, %v477_v33  ;;  %4967 = vmatprep.mubr.msk.bf16.mxu1 %vm5397_vm2, %v5396_v32 }
 0x242   :  { %490 = vst.msk [vmem:[#allocation4 + $0x58] sm:$0xff] %vm302_vm1, %v474_v22  ;;  %v500_v36 = vpack.c.bf16 %v474_v22, %v473_v24  ;;  %4965 = vmatprep.subr.bf16.mxu1 %v5396_v32 }
 0x243   :  { %v5217_v35 = vpop.eup %5216 }
 0x244   :  { %v478_v27 = vmul.f32 %v5217_v35, %v5674_v30  ;;  %v608_v37 = vsel %vm302_vm1, %v500_v36, 0  ;;  %v64_v30 = vpack.c.bf16 %v60_v42, %v60_v42 }
 0x245   :  { %4958 = vmatpush3.bf16.xpose.msra.mxu0 %v608_v37 }
 0x246   :  { %494 = vst.msk [vmem:[#allocation4 + $0x78] sm:$0xff] %vm302_vm1, %v478_v27  ;;  %v502_v26 = vpack.c.bf16 %v478_v27, %v477_v33 }
 0x248   :  { %v657_v40 = vsel %vm302_vm1, %v502_v26, 0 }
 0x249   :  { %4966 = vmatpush3.bf16.xpose.msra.mxu1 %v657_v40 }
 0x24c   :  { %4960 = vmatmul.mubr.msk.bf16.vlgmr.msra.gmra.mrb[12].mxu0 %vm302_vm1, %v63_v41 }
 0x250   :  { %4968 = vmatmul.mubr.msk.bf16.vlgmr.msra.gmra.mrb[12].mxu1 %vm302_vm1, %v64_v30 }
 0x30f   :  { %v546_v44 = vpop.f32.mrb[8].mxu0 }
 0x310   :  { %v699_v45 = vpack.c.bf16 %v546_v44, %v546_v44  ;;  %v4945_v47 = vpop.f32.mrb[9].mxu0 }
 0x311   :  { %v549_v48 = vpop.f32.mrb[10].mxu0 }
 0x312   :  { %v4946_v49 = vpop.f32.mrb[11].mxu0  ;;  %703 = vxpose.xlu0.c.b16.start.end [1/1] (short) (narrow) %v699_v45, 32  ;;  %v1891_v3 = vrot.slane %v699_v45, %v5750_v61 }
 0x313   :  { %v595_v50 = vpop.f32.mrb[8].mxu1 }
 0x314   :  { %v700_v51 = vpack.c.bf16 %v595_v50, %v595_v50  ;;  %v4953_v38 = vpop.f32.mrb[9].mxu1 }
 0x315   :  { %v598_v53 = vpop.f32.mrb[10].mxu1 }
 0x316   :  { %v4954_v58 = vpop.f32.mrb[11].mxu1  ;;  %719 = vxpose.xlu1.c.b16.start.end [1/1] (short) (narrow) %v700_v51, 32  ;;  %v1922_v15 = vrot.slane %v700_v51, %v5750_v61 }
 0x31f   :  { %v644_v56 = vpop.f32.mrb[12].mxu0 }
 0x320   :  { %v701_v0 = vpack.c.bf16 %v644_v56, %v644_v56  ;;  %v4961_v52 = vpop.f32.mrb[13].mxu0  ;;  %v5799_v56 = vpack.i.b16 %v5400_v21, %v5400_v21 }
 0x321   :  { %v647_v1 = vpop.f32.mrb[14].mxu0 }
 0x322   :  { %v1898_v5 = vrot.slane %v701_v0, %v5750_v61  ;;  %v4962_v6 = vpop.f32.mrb[15].mxu0  ;;  %735 = vxpose.xlu0.c.b16.start.end [1/1] (short) (narrow) %v701_v0, 32 }
 0x323   :  { %v693_v2 = vpop.f32.mrb[12].mxu1 }
 0x324   :  { %v1899_v8 = vcombine.low %v1891_v3, %v1898_v5  ;;  %v1900_v62 = vcombine.high %v1891_v3, %v1898_v5  ;;  %v702_v7 = vpack.c.bf16 %v693_v2, %v693_v2  ;;  %v4969_v13 = vpop.f32.mrb[13].mxu1 }
 0x325   :  { %v696_v14 = vpop.f32.mrb[14].mxu1 }
 0x326   :  { %v1907_v9 = vrot.slane %v1899_v8, %v5753_v4  ;;  %v1929_v16 = vrot.slane %v702_v7, %v5750_v61  ;;  %751 = vxpose.xlu1.c.b16.start.end [1/1] (short) (narrow) %v702_v7, 32  ;;  %v4970_v11 = vpop.f32.mrb[15].mxu1  ;;  %v1915_v20 = vrot.slane %v1900_v62, %v5753_v4 }
 0x328   :  { %v1930_v17 = vcombine.low %v1922_v15, %v1929_v16  ;;  %v1931_v18 = vcombine.high %v1922_v15, %v1929_v16  ;;  %v1908_v12 = vcombine.high %v1907_v9, %v5400_v21  ;;  %v1950_v19 = vshrl.u32 %v1907_v9, 16 }
 0x329   :  { %v1962_v23 = vshrl.u32 %v1915_v20, 16 }
 0x32a   :  { %v1938_v10 = vrot.slane %v1930_v17, %v5753_v4  ;;  %v1946_v24 = vrot.slane %v1931_v18, %v5753_v4  ;;  %v1956_v33 = vshrl.u32 %v1908_v12, 16 }
 0x32c   :  { %v1963_v25 = vshrl.u32 %v1946_v24, 16  ;;  %v5763_v28 = vpack.i.b16 %v1938_v10, %v1907_v9  ;;  %v1951_v29 = vshrl.u32 %v1938_v10, 16  ;;  %v1939_v31 = vcombine.high %v1938_v10, %v5400_v21 }
 0x32d   :  { %v5766_v34 = vpack.i.b16 %v1946_v24, %v1915_v20 }
 0x32e   :  { %5137 = vmatprep.subr.msk.bf16.mxu0 %vm1972_vm3, %v5763_v28  ;;  %v1974_v22 = vsel %vm1972_vm3, %v5763_v28, 0  ;;  %v5772_v35 = vpack.i.b16 %v1951_v29, %v1950_v19  ;;  %v5774_v36 = vpack.i.b16 %v1939_v31, %v1908_v12  ;;  %v1957_v27 = vshrl.u32 %v1939_v31, 16 }
 0x32f   :  { %4972 = vmatpush3.bf16.msra.mxu0 %v1974_v22  ;;  %v5776_v37 = vpack.i.b16 %v1963_v25, %v1962_v23 }
 0x330   :  { %5138 = vmatprep.subr.msk.bf16.mxu1 %vm1972_vm3, %v5772_v35  ;;  %5139 = vmatprep.subr.msk.bf16.mxu0 %vm1972_vm3, %v5774_v36  ;;  %v2032_v26 = vsel %vm1972_vm3, %v5772_v35, 0  ;;  %v5784_v39 = vpack.i.b16 %v1957_v27, %v1956_v33 }
 0x331   :  { %4978 = vmatpush3.bf16.msra.mxu1 %v2032_v26 }
 0x332   :  { %5140 = vmatprep.subr.msk.bf16.mxu1 %vm1972_vm3, %v5784_v39 }
 0x378   :  { %v711_v40 = vpop.trf.xlu0 }
 0x379   :  { %v771_v45 = vshrl.u32 %v711_v40, 16 }
 0x37c   :  { %v727_v41 = vpop.trf.xlu1  ;;  %v5788_v42 = vpop.trf.xlu0 }
 0x37d   :  { %v772_v47 = vshrl.u32 %v727_v41, 16  ;;  %v769_v48 = vpack.i.b16 %v727_v41, %v711_v40  ;;  %v793_v23 = vshrl.u32 %v5788_v42, 16 }
 0x37f   :  { %v773_v51 = vpack.i.b16 %v772_v47, %v771_v45  ;;  %v812_v55 = vrot.slane %v769_v48, %v5750_v61  ;;  %v805_v5 = vcombine.high %v769_v48, %v5799_v56 }
 0x380   :  { %v5790_v30 = vpop.trf.xlu1 }
 0x381   :  { %v878_v43 = vrot.slane %v773_v51, %v5750_v61  ;;  %v871_v7 = vcombine.high %v773_v51, %v5799_v56  ;;  %v819_v14 = vrot.slane %v805_v5, %v5750_v61  ;;  %v794_v33 = vshrl.u32 %v5790_v30, 16 }
 0x382   :  { %v791_v26 = vpack.i.b16 %v5790_v30, %v5788_v42 }
 0x383   :  { %v885_v11 = vrot.slane %v871_v7, %v5750_v61 }
 0x388   :  { %v743_v44 = vpop.trf.xlu0 }
 0x389   :  { %v779_v49 = vshrl.u32 %v743_v44, 16 }
 0x38c   :  { %v759_v50 = vpop.trf.xlu1  ;;  %v744_v20 = vpop.trf.xlu0 }
 0x38d   :  { %v777_v38 = vpack.i.b16 %v759_v50, %v743_v44  ;;  %v780_v53 = vshrl.u32 %v759_v50, 16  ;;  %v801_v19 = vshrl.u32 %v744_v20, 16  ;;  %v795_v44 = vpack.i.b16 %v794_v33, %v793_v23 }
 0x38f   :  { %v781_v54 = vpack.i.b16 %v780_v53, %v779_v49  ;;  %v827_v57 = vrot.slane %v777_v38, %v5750_v61  ;;  %v820_v1 = vcombine.high %v777_v38, %v5799_v56  ;;  %v944_v49 = vrot.slane %v791_v26, %v5750_v61 }
 0x390   :  { %v760_v12 = vpop.trf.xlu1  ;;  %v1010_v51 = vrot.slane %v795_v44, %v5750_v61 }
 0x391   :  { %v835_v58 = vcombine.low %v812_v55, %v827_v57  ;;  %v893_v46 = vrot.slane %v781_v54, %v5750_v61  ;;  %v836_v63 = vcombine.high %v812_v55, %v827_v57  ;;  %v886_v2 = vcombine.high %v781_v54, %v5799_v56 }
 0x392   :  { %v834_v62 = vrot.slane %v820_v1, %v5750_v61  ;;  %v802_v25 = vshrl.u32 %v760_v12, 16  ;;  %v799_v22 = vpack.i.b16 %v760_v12, %v744_v20  ;;  %v1003_v1 = vcombine.high %v795_v44, %v5799_v56 }
 0x393   :  { %v843_v59 = vrot.slane %v835_v58, %v5753_v4  ;;  %v901_v60 = vcombine.low %v878_v43, %v893_v46  ;;  %v902_v52 = vcombine.high %v878_v43, %v893_v46  ;;  %v850_v3 = vrot.slane %v836_v63, %v5753_v4 }
 0x394   :  { %v900_v15 = vrot.slane %v886_v2, %v5750_v61  ;;  %v851_v16 = vcombine.low %v819_v14, %v834_v62  ;;  %v852_v24 = vcombine.high %v819_v14, %v834_v62  ;;  %v803_v40 = vpack.i.b16 %v802_v25, %v801_v19 }
 0x395   :  { %1069 = vxpose.xlu0.c.b16.start.end [1/1] (short) (narrow) %v843_v59, 16  ;;  %v909_v0 = vrot.slane %v901_v60, %v5753_v4  ;;  %v916_v6 = vrot.slane %v902_v52, %v5753_v4  ;;  %v867_v8 = vcombine.high %v843_v59, %v5400_v21  ;;  %v868_v9 = vcombine.high %v850_v3, %v5400_v21 }
 0x396   :  { %v917_v18 = vcombine.low %v885_v11, %v900_v15  ;;  %v859_v10 = vrot.slane %v851_v16, %v5753_v4  ;;  %v918_v31 = vcombine.high %v885_v11, %v900_v15  ;;  %v866_v27 = vrot.slane %v852_v24, %v5753_v4 }
 0x397   :  { %1085 = vxpose.xlu1.c.b16.start.end [1/1] (short) (narrow) %v909_v0, 16  ;;  %v933_v13 = vcombine.high %v909_v0, %v5400_v21  ;;  %v934_v17 = vcombine.high %v916_v6, %v5400_v21  ;;  %v959_v47 = vrot.slane %v799_v22, %v5750_v61  ;;  %v1025_v50 = vrot.slane %v803_v40, %v5750_v61 }
 0x398   :  { %v925_v29 = vrot.slane %v917_v18, %v5753_v4  ;;  %v932_v41 = vrot.slane %v918_v31, %v5753_v4  ;;  %v869_v45 = vcombine.high %v859_v10, %v5400_v21  ;;  %v870_v42 = vcombine.high %v866_v27, %v5400_v21 }
 0x399   :  { %1133 = vxpose.xlu0.c.b16.start.end [1/1] (short) (narrow) %v850_v3, 16  ;;  %v967_v30 = vcombine.low %v944_v49, %v959_v47  ;;  %v1033_v53 = vcombine.low %v1010_v51, %v1025_v50  ;;  %v968_v55 = vcombine.high %v944_v49, %v959_v47  ;;  %v1034_v58 = vcombine.high %v1010_v51, %v1025_v50 }
 0x39a   :  { %v935_v48 = vcombine.high %v925_v29, %v5400_v21  ;;  %v936_v38 = vcombine.high %v932_v41, %v5400_v21  ;;  %v952_v43 = vcombine.high %v799_v22, %v5799_v56  ;;  %v937_v59 = vcombine.high %v791_v26, %v5799_v56 }
 0x39b   :  { %1149 = vxpose.xlu1.c.b16.start.end [1/1] (short) (narrow) %v916_v6, 16  ;;  %v975_v54 = vrot.slane %v967_v30, %v5753_v4  ;;  %v1041_v57 = vrot.slane %v1033_v53, %v5753_v4  ;;  %v982_v46 = vrot.slane %v968_v55, %v5753_v4  ;;  %v1048_v60 = vrot.slane %v1034_v58, %v5753_v4 }
 0x39c   :  { %v1018_v63 = vcombine.high %v803_v40, %v5799_v56  ;;  %v966_v52 = vrot.slane %v952_v43, %v5750_v61  ;;  %v951_v5 = vrot.slane %v937_v59, %v5750_v61  ;;  %v1017_v62 = vrot.slane %v1003_v1, %v5750_v61 }
 0x39d   :  { %1101 = vxpose.xlu0.c.b16.start.end [1/1] (short) (narrow) %v867_v8, 16  ;;  %v999_v0 = vcombine.high %v975_v54, %v5400_v21  ;;  %v1065_v3 = vcombine.high %v1041_v57, %v5400_v21  ;;  %v1000_v2 = vcombine.high %v982_v46, %v5400_v21  ;;  %v1066_v7 = vcombine.high %v1048_v60, %v5400_v21 }
 0x39e   :  { %v1032_v6 = vrot.slane %v1018_v63, %v5750_v61  ;;  %v983_v8 = vcombine.low %v951_v5, %v966_v52  ;;  %v984_v15 = vcombine.high %v951_v5, %v966_v52 }
 0x39f   :  { %1117 = vxpose.xlu1.c.b16.start.end [1/1] (short) (narrow) %v933_v13, 16 }
 0x3a0   :  { %v1049_v13 = vcombine.low %v1017_v62, %v1032_v6  ;;  %v991_v14 = vrot.slane %v983_v8, %v5753_v4  ;;  %v1050_v16 = vcombine.high %v1017_v62, %v1032_v6  ;;  %v998_v11 = vrot.slane %v984_v15, %v5753_v4 }
 0x3a1   :  { %1165 = vxpose.xlu0.c.b16.start.end [1/1] (short) (narrow) %v868_v9, 16 }
 0x3a2   :  { %v1057_v9 = vrot.slane %v1049_v13, %v5753_v4  ;;  %v1001_v18 = vcombine.high %v991_v14, %v5400_v21  ;;  %v1002_v12 = vcombine.high %v998_v11, %v5400_v21 }
 0x3a3   :  { %1181 = vxpose.xlu1.c.b16.start.end [1/1] (short) (narrow) %v934_v17, 16  ;;  %v1064_v17 = vrot.slane %v1050_v16, %v5753_v4 }
 0x3a4   :  { %v1067_v20 = vcombine.high %v1057_v9, %v5400_v21 }
 0x3a5   :  { %1197 = vxpose.xlu0.c.b16.start.end [1/1] (short) (narrow) %v859_v10, 16  ;;  %v1068_v10 = vcombine.high %v1064_v17, %v5400_v21 }
 0x3a7   :  { %1213 = vxpose.xlu1.c.b16.start.end [1/1] (short) (narrow) %v925_v29, 16 }
 0x3a9   :  { %1261 = vxpose.xlu0.c.b16.start.end [1/1] (short) (narrow) %v866_v27, 16 }
 0x3ab   :  { %1277 = vxpose.xlu1.c.b16.start.end [1/1] (short) (narrow) %v932_v41, 16 }
 0x3ad   :  { %1229 = vxpose.xlu0.c.b16.start.end [1/1] (short) (narrow) %v869_v45, 16 }
 0x3af   :  { %1245 = vxpose.xlu1.c.b16.start.end [1/1] (short) (narrow) %v935_v48, 16 }
 0x3b1   :  { %1293 = vxpose.xlu0.c.b16.start.end [1/1] (short) (narrow) %v870_v42, 16 }
 0x3b3   :  { %1309 = vxpose.xlu1.c.b16.start.end [1/1] (short) (narrow) %v936_v38, 16 }
 0x3b5   :  { %1325 = vxpose.xlu0.c.b16.start.end [1/1] (short) (narrow) %v975_v54, 16 }
 0x3b7   :  { %1341 = vxpose.xlu1.c.b16.start.end [1/1] (short) (narrow) %v1041_v57, 16 }
 0x3b9   :  { %1389 = vxpose.xlu0.c.b16.start.end [1/1] (short) (narrow) %v982_v46, 16 }
 0x3bb   :  { %1405 = vxpose.xlu1.c.b16.start.end [1/1] (short) (narrow) %v1048_v60, 16 }
 0x3bd   :  { %1357 = vxpose.xlu0.c.b16.start.end [1/1] (short) (narrow) %v999_v0, 16 }
 0x3bf   :  { %1373 = vxpose.xlu1.c.b16.start.end [1/1] (short) (narrow) %v1065_v3, 16 }
 0x3c1   :  { %1421 = vxpose.xlu0.c.b16.start.end [1/1] (short) (narrow) %v1000_v2, 16 }
 0x3c3   :  { %1437 = vxpose.xlu1.c.b16.start.end [1/1] (short) (narrow) %v1066_v7, 16 }
 0x3c5   :  { %1453 = vxpose.xlu0.c.b16.start.end [1/1] (short) (narrow) %v991_v14, 16 }
 0x3c7   :  { %1469 = vxpose.xlu1.c.b16.start.end [1/1] (short) (narrow) %v1057_v9, 16 }
 0x3c9   :  { %1517 = vxpose.xlu0.c.b16.start.end [1/1] (short) (narrow) %v998_v11, 16 }
 0x3cb   :  { %1533 = vxpose.xlu1.c.b16.start.end [1/1] (short) (narrow) %v1064_v17, 16 }
 0x3cd   :  { %1485 = vxpose.xlu0.c.b16.start.end [1/1] (short) (narrow) %v1001_v18, 16 }
 0x3cf   :  { %1501 = vxpose.xlu1.c.b16.start.end [1/1] (short) (narrow) %v1067_v20, 16 }
 0x3d1   :  { %1549 = vxpose.xlu0.c.b16.start.end [1/1] (short) (narrow) %v1002_v12, 16 }
 0x3d3   :  { %1565 = vxpose.xlu1.c.b16.start.end [1/1] (short) (narrow) %v1068_v10, 16 }
 0x3fb   :  { %v1077_v24 = vpop.trf.xlu0 }
 0x3fd   :  { %v1093_v19 = vpop.trf.xlu1 }
 0x3ff   :  { %v1141_v25 = vpop.trf.xlu0 }
 0x400   :  { %v1581_v47 = vcombine.low %v1077_v24, %v1141_v25 }
 0x401   :  { %v1157_v29 = vpop.trf.xlu1 }
 0x402   :  { %v1648_v49 = vcombine.low %v1093_v19, %v1157_v29  ;;  %v5860_v38 = vrot.slane %v1581_v47, %v5750_v61 }
 0x403   :  { %v1109_v31 = vpop.trf.xlu0 }
 0x404   :  { %v5866_v57 = vrot.slane %v1648_v49, %v5750_v61 }
 0x405   :  { %v1125_v23 = vpop.trf.xlu1 }
 0x407   :  { %v1173_v33 = vpop.trf.xlu0 }
 0x408   :  { %v1589_v44 = vcombine.low %v1109_v31, %v1173_v33 }
 0x409   :  { %v1189_v22 = vpop.trf.xlu1 }
 0x40a   :  { %v1656_v48 = vcombine.low %v1125_v23, %v1189_v22  ;;  %v5857_v42 = vrot.slane %v1589_v44, %v5750_v61 }
 0x40b   :  { %v1205_v27 = vpop.trf.xlu0 }
 0x40c   :  { %v5863_v53 = vrot.slane %v1656_v48, %v5750_v61  ;;  %v1613_v43 = vcombine.low %v5860_v38, %v5857_v42 }
 0x40d   :  { %v1221_v26 = vpop.trf.xlu1 }
 0x40e   :  { %v1680_v0 = vcombine.low %v5866_v57, %v5863_v53  ;;  %v1621_v6 = vrot.slane %v1613_v43, %v5753_v4 }
 0x40f   :  { %v1269_v40 = vpop.trf.xlu0 }
 0x410   :  { %v1597_v30 = vcombine.low %v1205_v27, %v1269_v40  ;;  %v1688_v7 = vrot.slane %v1680_v0, %v5753_v4 }
 0x411   :  { %v1285_v41 = vpop.trf.xlu1 }
 0x412   :  { %v1664_v54 = vcombine.low %v1221_v26, %v1285_v41  ;;  %v5871_v46 = vrot.slane %v1597_v30, %v5750_v61 }
 0x413   :  { %v1237_v45 = vpop.trf.xlu0 }
 0x414   :  { %v5879_v52 = vrot.slane %v1664_v54, %v5750_v61 }
 0x415   :  { %v1253_v50 = vpop.trf.xlu1 }
 0x417   :  { %v1301_v51 = vpop.trf.xlu0 }
 0x418   :  { %v1605_v55 = vcombine.low %v1237_v45, %v1301_v51 }
 0x419   :  { %v1317_v58 = vpop.trf.xlu1 }
 0x41a   :  { %v5874_v59 = vrot.slane %v1605_v55, %v5750_v61  ;;  %v1672_v60 = vcombine.low %v1253_v50, %v1317_v58 }
 0x41b   :  { %v1333_v63 = vpop.trf.xlu0 }
 0x41c   :  { %v1629_v1 = vcombine.low %v5871_v46, %v5874_v59  ;;  %v5884_v3 = vrot.slane %v1672_v60, %v5750_v61 }
 0x41d   :  { %v1349_v5 = vpop.trf.xlu1 }
 0x41e   :  { %v1637_v2 = vrot.slane %v1629_v1, %v5753_v4  ;;  %v1696_v8 = vcombine.low %v5879_v52, %v5884_v3 }
 0x41f   :  { %v1397_v62 = vpop.trf.xlu0 }
 0x420   :  { %v1704_v13 = vrot.slane %v1696_v8, %v5753_v4  ;;  %v1645_v14 = vcombine.low %v1621_v6, %v1637_v2  ;;  %v1715_v22 = vcombine.low %v1333_v63, %v1397_v62 }
 0x421   :  { %v1413_v15 = vpop.trf.xlu1 }
 0x422   :  { %v1712_v9 = vcombine.low %v1688_v7, %v1704_v13  ;;  %v1852_v17 = vshrl.u32 %v1645_v14, 16  ;;  %v1782_v26 = vcombine.low %v1349_v5, %v1413_v15  ;;  %v5898_v47 = vrot.slane %v1715_v22, %v5750_v61 }
 0x423   :  { %v1365_v16 = vpop.trf.xlu0  ;;  %v1713_v15 = vcombine.high %v1688_v7, %v1704_v13  ;;  %v2148_v22 = vsel %vm1972_vm3, %v5784_v39, 0 }
 0x424   :  { %v1851_v11 = vpack.i.b16 %v1712_v9, %v1645_v14  ;;  %v1853_v18 = vshrl.u32 %v1712_v9, 16  ;;  %v1789_v30 = vrot.slane %v1782_v26, %v5750_v61  ;;  %v1697_v14 = vcombine.high %v5879_v52, %v5884_v3 }
 0x425   :  { %v1381_v20 = vpop.trf.xlu1  ;;  %v1859_v52 = vshrl.u32 %v1713_v15, 16 }
 0x426   :  { %4973 = vmatprep.mubr.msk.bf16.mxu0 %vm1965_vm4, %v1851_v11  ;;  %v1854_v12 = vpack.i.b16 %v1853_v18, %v1852_v17  ;;  %v1681_v17 = vcombine.high %v5866_v57, %v5863_v53  ;;  %v1630_v18 = vcombine.high %v5871_v46, %v5874_v59  ;;  %v2090_v46 = vsel %vm1972_vm3, %v5774_v36, 0 }
 0x427   :  { %v1429_v10 = vpop.trf.xlu0 }
 0x428   :  { %4979 = vmatprep.mubr.msk.bf16.mxu1 %vm1965_vm4, %v1854_v12  ;;  %v1723_v23 = vcombine.low %v1365_v16, %v1429_v10  ;;  %v1614_v10 = vcombine.high %v5860_v38, %v5857_v42 }
 0x429   :  { %v1445_v24 = vpop.trf.xlu1 }
 0x42a   :  { %v1790_v27 = vcombine.low %v1381_v20, %v1445_v24  ;;  %v5895_v41 = vrot.slane %v1723_v23, %v5750_v61  ;;  %v1646_v20 = vcombine.high %v1621_v6, %v1637_v2  ;;  %v1711_v24 = vrot.slane %v1697_v14, %v5753_v4 }
 0x42b   :  { %v1461_v19 = vpop.trf.xlu0  ;;  %v1628_v38 = vrot.slane %v1614_v10, %v5753_v4 }
 0x42c   :  { %v1797_v48 = vrot.slane %v1790_v27, %v5750_v61  ;;  %v1747_v54 = vcombine.low %v5898_v47, %v5895_v41  ;;  %v1858_v53 = vshrl.u32 %v1646_v20, 16  ;;  %v1748_v26 = vcombine.high %v5898_v47, %v5895_v41 }
 0x42d   :  { %v1477_v25 = vpop.trf.xlu1  ;;  %v2206_v41 = vsel %vm1972_vm3, %v5766_v34, 0 }
 0x42e   :  { %v1814_v60 = vcombine.low %v1789_v30, %v1797_v48  ;;  %v1755_v5 = vrot.slane %v1747_v54, %v5753_v4  ;;  %v1860_v59 = vpack.i.b16 %v1859_v52, %v1858_v53  ;;  %v1815_v2 = vcombine.high %v1789_v30, %v1797_v48 }
 0x42f   :  { %v1525_v29 = vpop.trf.xlu0 }
 0x430   :  { %v1731_v44 = vcombine.low %v1461_v19, %v1525_v29  ;;  %v1822_v9 = vrot.slane %v1814_v60, %v5753_v4  ;;  %v1695_v19 = vrot.slane %v1681_v17, %v5753_v4  ;;  %v1857_v29 = vpack.i.b16 %v1713_v15, %v1646_v20 }
 0x431   :  { %v1541_v31 = vpop.trf.xlu1  ;;  %v1829_v48 = vrot.slane %v1815_v2, %v5753_v4 }
 0x432   :  { %v1798_v49 = vcombine.low %v1477_v25, %v1541_v31  ;;  %v1738_v55 = vrot.slane %v1731_v44, %v5750_v61  ;;  %v1644_v25 = vrot.slane %v1630_v18, %v5753_v4  ;;  %v1714_v6 = vcombine.low %v1695_v19, %v1711_v24 }
 0x433   :  { %v1493_v33 = vpop.trf.xlu0 }
 0x434   :  { %v1805_v63 = vrot.slane %v1798_v49, %v5750_v61  ;;  %v1647_v27 = vcombine.low %v1628_v38, %v1644_v25 }
 0x435   :  { %v1509_v40 = vpop.trf.xlu1 }
 0x436   :  { %v1864_v54 = vshrl.u32 %v1647_v27, 16 }
 0x437   :  { %v1557_v45 = vpop.trf.xlu0 }
 0x438   :  { %v1739_v50 = vcombine.low %v1493_v33, %v1557_v45  ;;  %v1865_v45 = vshrl.u32 %v1714_v6, 16 }
 0x439   :  { %v1573_v51 = vpop.trf.xlu1 }
 0x43a   :  { %v1746_v58 = vrot.slane %v1739_v50, %v5750_v61  ;;  %v1806_v43 = vcombine.low %v1509_v40, %v1573_v51  ;;  %v1863_v51 = vpack.i.b16 %v1714_v6, %v1647_v27 }
 0x43c   :  { %v1763_v0 = vcombine.low %v1738_v55, %v1746_v58  ;;  %v1813_v1 = vrot.slane %v1806_v43, %v5750_v61  ;;  %v1764_v23 = vcombine.high %v1738_v55, %v1746_v58  ;;  %v1762_v55 = vrot.slane %v1748_v26, %v5753_v4 }
 0x43d   :  { %v1866_v43 = vpack.i.b16 %v1865_v45, %v1864_v54 }
 0x43e   :  { %v1771_v8 = vrot.slane %v1763_v0, %v5753_v4  ;;  %v1830_v62 = vcombine.low %v1805_v63, %v1813_v1  ;;  %v1831_v57 = vcombine.high %v1805_v63, %v1813_v1  ;;  %v1778_v49 = vrot.slane %v1764_v23, %v5753_v4 }
 0x43f   :  { %v2264_v63 = vsel %vm1972_vm3, %v5776_v37, 0 }
 0x440   :  { %v1779_v16 = vcombine.low %v1755_v5, %v1771_v8  ;;  %v1838_v11 = vrot.slane %v1830_v62, %v5753_v4  ;;  %v1780_v33 = vcombine.high %v1755_v5, %v1771_v8  ;;  %v1845_v40 = vrot.slane %v1831_v57, %v5753_v4 }
 0x441   :  { %v1781_v60 = vcombine.low %v1762_v55, %v1778_v49 }
 0x442   :  { %v1846_v12 = vcombine.low %v1822_v9, %v1838_v11  ;;  %v1870_v3 = vshrl.u32 %v1779_v16, 16  ;;  %v1847_v31 = vcombine.high %v1822_v9, %v1838_v11  ;;  %v1876_v50 = vshrl.u32 %v1780_v33, 16 }
 0x443   :  { %v1848_v58 = vcombine.low %v1829_v48, %v1845_v40  ;;  %v1882_v1 = vshrl.u32 %v1781_v60, 16 }
 0x444   :  { %v1869_v7 = vpack.i.b16 %v1846_v12, %v1779_v16  ;;  %v1871_v13 = vshrl.u32 %v1846_v12, 16  ;;  %v1877_v44 = vshrl.u32 %v1847_v31, 16  ;;  %v1875_v30 = vpack.i.b16 %v1847_v31, %v1780_v33 }
 0x445   :  { %v1883_v0 = vshrl.u32 %v1848_v58, 16  ;;  %v1881_v5 = vpack.i.b16 %v1848_v58, %v1781_v60 }
 0x446   :  { %4974 = vmatmul.mubr.msk.bf16.vlgmr.msra.gmra.mrb[16].mxu0 %vm1965_vm4, %v1869_v7  ;;  %v1872_v42 = vpack.i.b16 %v1871_v13, %v1870_v3  ;;  %v1878_v47 = vpack.i.b16 %v1877_v44, %v1876_v50 }
 0x447   :  { %4984 = vmatpush3.bf16.msra.mxu0 %v2090_v46  ;;  %4985 = vmatprep.mubr.msk.bf16.mxu0 %vm1965_vm4, %v1857_v29  ;;  %v1884_v8 = vpack.i.b16 %v1883_v0, %v1882_v1 }
 0x448   :  { %5141 = vmatprep.subr.msk.bf16.mxu0 %vm1972_vm3, %v5766_v34  ;;  %4980 = vmatmul.mubr.msk.bf16.vlgmr.msra.gmra.mrb[16].mxu1 %vm1965_vm4, %v1872_v42 }
 0x449   :  { %4990 = vmatpush3.bf16.msra.mxu1 %v2148_v22  ;;  %4991 = vmatprep.mubr.msk.bf16.mxu1 %vm1965_vm4, %v1860_v59 }
 0x44a   :  { %5142 = vmatprep.subr.msk.bf16.mxu1 %vm1972_vm3, %v5776_v37 }
 0x44e   :  { %4986 = vmatmul.mubr.msk.bf16.vlgmr.msra.gmra.mrb[20].mxu0 %vm1965_vm4, %v1875_v30 }
 0x44f   :  { %4996 = vmatpush3.bf16.msra.mxu0 %v2206_v41  ;;  %4997 = vmatprep.mubr.msk.bf16.mxu0 %vm1965_vm4, %v1863_v51 }
 0x450   :  { %4992 = vmatmul.mubr.msk.bf16.vlgmr.msra.gmra.mrb[20].mxu1 %vm1965_vm4, %v1878_v47  ;;  %5007 = vmatprep.subr.bf16.mxu0 %v5396_v32 }
 0x451   :  { %5002 = vmatpush3.bf16.msra.mxu1 %v2264_v63  ;;  %5003 = vmatprep.mubr.msk.bf16.mxu1 %vm1965_vm4, %v1866_v43 }
 0x452   :  { %5015 = vmatprep.subr.bf16.mxu1 %v5396_v32 }
 0x456   :  { %4998 = vmatmul.mubr.msk.bf16.vlgmr.msra.gmra.mrb[24].mxu0 %vm1965_vm4, %v1881_v5 }
 0x457   :  { %5011 = vmatprep.mubr.msk.bf16.mxu0 %vm5397_vm2, %v5396_v32 }
 0x458   :  { %5004 = vmatmul.mubr.msk.bf16.vlgmr.msra.gmra.mrb[24].mxu1 %vm1965_vm4, %v1884_v8 }
 0x459   :  { %5019 = vmatprep.mubr.msk.bf16.mxu1 %vm5397_vm2, %v5396_v32 }
 0x519   :  { %v4975_v62 = vpop.f32.mrb[16].mxu0 }
 0x51a   :  { %v2010_v14 = vpop.f32.mrb[17].mxu0  ;;  %v5970_v7 = vmul.f32 0.5, %v4975_v62 }
 0x51b   :  { %v5958_v15 = vmul.f32 0.5, %v2010_v14  ;;  %v4976_v9 = vpop.f32.mrb[18].mxu0  ;;  %v4981_v16 = vpop.f32.mrb[16].mxu1 }
 0x51c   :  { %v2013_v11 = vpop.f32.mrb[19].mxu0  ;;  %v2068_v17 = vpop.f32.mrb[17].mxu1  ;;  %v5974_v29 = vmul.f32 0.5, %v4976_v9  ;;  %v5978_v38 = vmul.f32 0.5, %v4981_v16  ;;  %v2345_v6 = vsel %vm302_vm1, %v5970_v7, -inf }
 0x51d   :  { %v5960_v18 = vmul.f32 0.5, %v2013_v11  ;;  %v5962_v20 = vmul.f32 0.5, %v2068_v17  ;;  %v4982_v12 = vpop.f32.mrb[18].mxu1  ;;  %v2339_v10 = vsel %vm302_vm1, %v5958_v15, -inf }
 0x51e   :  { %v2071_v24 = vpop.f32.mrb[19].mxu1  ;;  %2340 = vmax.xlane.f32.xlu0 %v2339_v10  ;;  %v5982_v23 = vmul.f32 0.5, %v4982_v12  ;;  %v2348_v33 = vsel %vm302_vm1, %v5974_v29, -inf  ;;  %v2357_v26 = vsel %vm302_vm1, %v5978_v38, -inf }
 0x51f   :  { %v5966_v52 = vmul.f32 0.5, %v2071_v24  ;;  %v2342_v3 = vsel %vm302_vm1, %v5960_v18, -inf  ;;  %v2351_v19 = vsel %vm302_vm1, %v5962_v20, -inf }
 0x520   :  { %2343 = vmax.xlane.f32.xlu1 %v2342_v3  ;;  %v2360_v49 = vsel %vm302_vm1, %v5982_v23, -inf }
 0x521   :  { %v4987_v13 = vpop.f32.mrb[20].mxu0  ;;  %v2354_v31 = vsel %vm302_vm1, %v5966_v52, -inf }
 0x522   :  { %2352 = vmax.xlane.f32.xlu0 %v2351_v19  ;;  %v2126_v25 = vpop.f32.mrb[21].mxu0  ;;  %v6002_v43 = vmul.f32 0.5, %v4987_v13 }
 0x523   :  { %v4988_v53 = vpop.f32.mrb[22].mxu0  ;;  %v4993_v57 = vpop.f32.mrb[20].mxu1  ;;  %v5986_v22 = vmul.f32 0.5, %v2126_v25 }
 0x524   :  { %v2184_v46 = vpop.f32.mrb[21].mxu1  ;;  %2355 = vmax.xlane.f32.xlu1 %v2354_v31  ;;  %v2129_v42 = vpop.f32.mrb[23].mxu0  ;;  %v6006_v63 = vmul.f32 0.5, %v4988_v53  ;;  %v6010_v1 = vmul.f32 0.5, %v4993_v57  ;;  %v2369_v5 = vsel %vm302_vm1, %v6002_v43, -inf }
 0x525   :  { %v4994_v59 = vpop.f32.mrb[22].mxu1  ;;  %v5990_v44 = vmul.f32 0.5, %v2129_v42  ;;  %v5994_v51 = vmul.f32 0.5, %v2184_v46  ;;  %v2363_v55 = vsel %vm302_vm1, %v5986_v22, -inf }
 0x526   :  { %v2187_v2 = vpop.f32.mrb[23].mxu1  ;;  %2346 = vmax.xlane.f32.xlu0 %v2345_v6  ;;  %v6014_v8 = vmul.f32 0.5, %v4994_v59  ;;  %v2372_v62 = vsel %vm302_vm1, %v6006_v63, -inf  ;;  %v2381_v9 = vsel %vm302_vm1, %v6010_v1, -inf }
 0x527   :  { %v5998_v41 = vmul.f32 0.5, %v2187_v2  ;;  %v2366_v47 = vsel %vm302_vm1, %v5990_v44, -inf  ;;  %v2375_v60 = vsel %vm302_vm1, %v5994_v51, -inf }
 0x528   :  { %2349 = vmax.xlane.f32.xlu1 %v2348_v33  ;;  %v2384_v11 = vsel %vm302_vm1, %v6014_v8, -inf }
 0x529   :  { %v4999_v27 = vpop.f32.mrb[24].mxu0  ;;  %v2378_v0 = vsel %vm302_vm1, %v5998_v41, -inf }
 0x52a   :  { %2358 = vmax.xlane.f32.xlu0 %v2357_v26  ;;  %v2242_v40 = vpop.f32.mrb[25].mxu0  ;;  %v6034_v3 = vmul.f32 0.5, %v4999_v27 }
 0x52b   :  { %v5000_v45 = vpop.f32.mrb[26].mxu0  ;;  %v5005_v48 = vpop.f32.mrb[24].mxu1  ;;  %v6018_v14 = vmul.f32 0.5, %v2242_v40 }
 0x52c   :  { %v2300_v50 = vpop.f32.mrb[25].mxu1  ;;  %2361 = vmax.xlane.f32.xlu1 %v2360_v49  ;;  %v2245_v30 = vpop.f32.mrb[27].mxu0  ;;  %v6038_v19 = vmul.f32 0.5, %v5000_v45  ;;  %v6042_v53 = vmul.f32 0.5, %v5005_v48  ;;  %v2393_v57 = vsel %vm302_vm1, %v6034_v3, -inf }
 0x52d   :  { %v5006_v54 = vpop.f32.mrb[26].mxu1  ;;  %v6022_v16 = vmul.f32 0.5, %v2245_v30  ;;  %v6026_v17 = vmul.f32 0.5, %v2300_v50  ;;  %v2387_v12 = vsel %vm302_vm1, %v6018_v14, -inf }
 0x52e   :  { %v2303_v58 = vpop.f32.mrb[27].mxu1  ;;  %2364 = vmax.xlane.f32.xlu0 %v2363_v55  ;;  %v6046_v31 = vmul.f32 0.5, %v5006_v54  ;;  %v2396_v46 = vsel %vm302_vm1, %v6038_v19, -inf  ;;  %v2405_v42 = vsel %vm302_vm1, %v6042_v53, -inf }
 0x52f   :  { %v6030_v10 = vmul.f32 0.5, %v2303_v58  ;;  %v2390_v24 = vsel %vm302_vm1, %v6022_v16, -inf  ;;  %v2399_v13 = vsel %vm302_vm1, %v6026_v17, -inf }
 0x530   :  { %2367 = vmax.xlane.f32.xlu1 %v2366_v47  ;;  %v2408_v59 = vsel %vm302_vm1, %v6046_v31, -inf }
 0x531   :  { %v2402_v25 = vsel %vm302_vm1, %v6030_v10, -inf }
 0x532   :  { %2376 = vmax.xlane.f32.xlu0 %v2375_v60 }
 0x534   :  { %2379 = vmax.xlane.f32.xlu1 %v2378_v0 }
 0x536   :  { %2370 = vmax.xlane.f32.xlu0 %v2369_v5 }
 0x538   :  { %2373 = vmax.xlane.f32.xlu1 %v2372_v62 }
 0x53a   :  { %2382 = vmax.xlane.f32.xlu0 %v2381_v9 }
 0x53c   :  { %2385 = vmax.xlane.f32.xlu1 %v2384_v11 }
 0x53e   :  { %2388 = vmax.xlane.f32.xlu0 %v2387_v12 }
 0x540   :  { %2391 = vmax.xlane.f32.xlu1 %v2390_v24 }
 0x542   :  { %2400 = vmax.xlane.f32.xlu0 %v2399_v13 }
 0x544   :  { %2403 = vmax.xlane.f32.xlu1 %v2402_v25 }
 0x546   :  { %2394 = vmax.xlane.f32.xlu0 %v2393_v57 }
 0x548   :  { %2397 = vmax.xlane.f32.xlu1 %v2396_v46 }
 0x54a   :  { %2406 = vmax.xlane.f32.xlu0 %v2405_v42 }
 0x54c   :  { %2409 = vmax.xlane.f32.xlu1 %v2408_v59 }
 0x5ab   :  { %v2341_v6 = vpop.xlane.xlu0 %2340 }
 0x5ac   :  { %v2411_v2 = vsub.f32 %v5958_v15, %v2341_v6 }
 0x5ad   :  { %v2344_v33 = vpop.xlane.xlu1 %2343 }
 0x5ae   :  { %v2435_v27 = vmul.f32 1.442695, %v2411_v2  ;;  %v2412_v26 = vsub.f32 %v5960_v18, %v2344_v33 }
 0x5af   :  { %v2353_v40 = vpop.xlane.xlu0 %2352 }
 0x5b0   :  { %5218 = vpow2.f32 %v2435_v27  ;;  %v2437_v45 = vmul.f32 1.442695, %v2412_v26  ;;  %v2415_v48 = vsub.f32 %v5962_v20, %v2353_v40 }
 0x5b1   :  { %v2356_v49 = vpop.xlane.xlu1 %2355 }
 0x5b2   :  { %5220 = vpow2.f32 %v2437_v45  ;;  %v2443_v50 = vmul.f32 1.442695, %v2415_v48  ;;  %v2416_v30 = vsub.f32 %v5966_v52, %v2356_v49 }
 0x5b3   :  { %v2347_v54 = vpop.xlane.xlu0 %2346 }
 0x5b4   :  { %5222 = vpow2.f32 %v2443_v50  ;;  %v2445_v55 = vmul.f32 1.442695, %v2416_v30  ;;  %v2413_v58 = vsub.f32 %v5970_v7, %v2347_v54 }
 0x5b5   :  { %v2350_v15 = vpop.xlane.xlu1 %2349 }
 0x5b6   :  { %5224 = vpow2.f32 %v2445_v55  ;;  %v2439_v47 = vmul.f32 1.442695, %v2413_v58  ;;  %v2414_v18 = vsub.f32 %v5974_v29, %v2350_v15 }
 0x5b7   :  { %v2359_v60 = vpop.xlane.xlu0 %2358 }
 0x5b8   :  { %5226 = vpow2.f32 %v2439_v47  ;;  %v2441_v0 = vmul.f32 1.442695, %v2414_v18  ;;  %v2417_v20 = vsub.f32 %v5978_v38, %v2359_v60 }
 0x5b9   :  { %v2362_v5 = vpop.xlane.xlu1 %2361 }
 0x5ba   :  { %v6061_v62 = vpop.eup %5218  ;;  %5228 = vpow2.f32 %v2441_v0  ;;  %v2447_v52 = vmul.f32 1.442695, %v2417_v20  ;;  %v2418_v9 = vsub.f32 %v5982_v23, %v2362_v5 }
 0x5bb   :  { %v2365_v11 = vpop.xlane.xlu0 %2364  ;;  %v2483_v7 = vsel %vm302_vm1, %v6061_v62, 0.0 }
 0x5bc   :  { %v6066_v12 = vpop.eup %5220  ;;  %5230 = vpow2.f32 %v2447_v52  ;;  %v2449_v29 = vmul.f32 1.442695, %v2418_v9  ;;  %v2419_v24 = vsub.f32 %v5986_v22, %v2365_v11  ;;  %2484 = vadd.xlane.f32.xlu0 %v2483_v7 }
 0x5bd   :  { %v2368_v13 = vpop.xlane.xlu1 %2367  ;;  %v2486_v38 = vsel %vm302_vm1, %v6066_v12, 0.0 }
 0x5be   :  { %v6071_v25 = vpop.eup %5222  ;;  %5232 = vpow2.f32 %v2449_v29  ;;  %v2451_v57 = vmul.f32 1.442695, %v2419_v24  ;;  %v2420_v23 = vsub.f32 %v5990_v44, %v2368_v13  ;;  %2487 = vadd.xlane.f32.xlu1 %v2486_v38 }
 0x5bf   :  { %v2377_v46 = vpop.xlane.xlu0 %2376  ;;  %v2495_v42 = vsel %vm302_vm1, %v6071_v25, 0.0 }
 0x5c0   :  { %v6076_v59 = vpop.eup %5224  ;;  %5234 = vpow2.f32 %v2451_v57  ;;  %v2453_v22 = vmul.f32 1.442695, %v2420_v23  ;;  %v2423_v6 = vsub.f32 %v5994_v51, %v2377_v46  ;;  %2496 = vadd.xlane.f32.xlu0 %v2495_v42 }
 0x5c1   :  { %v2380_v2 = vpop.xlane.xlu1 %2379  ;;  %v2498_v33 = vsel %vm302_vm1, %v6076_v59, 0.0 }
 0x5c2   :  { %v6081_v27 = vpop.eup %5226  ;;  %5236 = vpow2.f32 %v2453_v22  ;;  %v2459_v44 = vmul.f32 1.442695, %v2423_v6  ;;  %v2424_v26 = vsub.f32 %v5998_v41, %v2380_v2  ;;  %2499 = vadd.xlane.f32.xlu1 %v2498_v33 }
 0x5c3   :  { %v2371_v40 = vpop.xlane.xlu0 %2370  ;;  %v2489_v45 = vsel %vm302_vm1, %v6081_v27, 0.0 }
 0x5c4   :  { %v6086_v48 = vpop.eup %5228  ;;  %5238 = vpow2.f32 %v2459_v44  ;;  %v2461_v51 = vmul.f32 1.442695, %v2424_v26  ;;  %v2421_v49 = vsub.f32 %v6002_v43, %v2371_v40  ;;  %2490 = vadd.xlane.f32.xlu0 %v2489_v45 }
 0x5c5   :  { %v2374_v50 = vpop.xlane.xlu1 %2373  ;;  %v2492_v30 = vsel %vm302_vm1, %v6086_v48, 0.0 }
 0x5c6   :  { %v6091_v54 = vpop.eup %5230  ;;  %5240 = vpow2.f32 %v2461_v51  ;;  %v2455_v41 = vmul.f32 1.442695, %v2421_v49  ;;  %v2422_v55 = vsub.f32 %v6006_v63, %v2374_v50  ;;  %2493 = vadd.xlane.f32.xlu1 %v2492_v30 }
 0x5c7   :  { %v2383_v58 = vpop.xlane.xlu0 %2382  ;;  %v2501_v15 = vsel %vm302_vm1, %v6091_v54, 0.0 }
 0x5c8   :  { %v6096_v47 = vpop.eup %5232  ;;  %5242 = vpow2.f32 %v2455_v41  ;;  %v2457_v43 = vmul.f32 1.442695, %v2422_v55  ;;  %v2425_v18 = vsub.f32 %v6010_v1, %v2383_v58  ;;  %2502 = vadd.xlane.f32.xlu0 %v2501_v15 }
 0x5c9   :  { %v2386_v60 = vpop.xlane.xlu1 %2385  ;;  %v2504_v0 = vsel %vm302_vm1, %v6096_v47, 0.0 }
 0x5ca   :  { %v6101_v20 = vpop.eup %5234  ;;  %5244 = vpow2.f32 %v2457_v43  ;;  %v2463_v63 = vmul.f32 1.442695, %v2425_v18  ;;  %v2426_v5 = vsub.f32 %v6014_v8, %v2386_v60  ;;  %2505 = vadd.xlane.f32.xlu1 %v2504_v0 }
 0x5cb   :  { %v2389_v52 = vpop.xlane.xlu0 %2388  ;;  %v2507_v9 = vsel %vm302_vm1, %v6101_v20, 0.0 }
 0x5cc   :  { %v6106_v11 = vpop.eup %5236  ;;  %5246 = vpow2.f32 %v2463_v63  ;;  %v2465_v1 = vmul.f32 1.442695, %v2426_v5  ;;  %v2427_v7 = vsub.f32 %v6018_v14, %v2389_v52  ;;  %2508 = vadd.xlane.f32.xlu0 %v2507_v9 }
 0x5cd   :  { %v2392_v29 = vpop.xlane.xlu1 %2391  ;;  %v2510_v24 = vsel %vm302_vm1, %v6106_v11, 0.0 }
 0x5ce   :  { %v6111_v13 = vpop.eup %5238  ;;  %5248 = vpow2.f32 %v2465_v1  ;;  %v2467_v8 = vmul.f32 1.442695, %v2427_v7  ;;  %v2428_v38 = vsub.f32 %v6022_v16, %v2392_v29  ;;  %2511 = vadd.xlane.f32.xlu1 %v2510_v24 }
 0x5cf   :  { %v2401_v57 = vpop.xlane.xlu0 %2400  ;;  %v2519_v23 = vsel %vm302_vm1, %v6111_v13, 0.0 }
 0x5d0   :  { %v6116_v46 = vpop.eup %5240  ;;  %5250 = vpow2.f32 %v2467_v8  ;;  %v2469_v14 = vmul.f32 1.442695, %v2428_v38  ;;  %v2431_v42 = vsub.f32 %v6026_v17, %v2401_v57  ;;  %2520 = vadd.xlane.f32.xlu0 %v2519_v23 }
 0x5d1   :  { %v2404_v22 = vpop.xlane.xlu1 %2403  ;;  %v2522_v6 = vsel %vm302_vm1, %v6116_v46, 0.0 }
 0x5d2   :  { %v6121_v2 = vpop.eup %5242  ;;  %5252 = vpow2.f32 %v2469_v14  ;;  %v2475_v16 = vmul.f32 1.442695, %v2431_v42  ;;  %v2432_v33 = vsub.f32 %v6030_v10, %v2404_v22  ;;  %2523 = vadd.xlane.f32.xlu1 %v2522_v6 }
 0x5d3   :  { %v2395_v44 = vpop.xlane.xlu0 %2394  ;;  %v2513_v26 = vsel %vm302_vm1, %v6121_v2, 0.0 }
 0x5d4   :  { %v6126_v40 = vpop.eup %5244  ;;  %5254 = vpow2.f32 %v2475_v16  ;;  %v2477_v17 = vmul.f32 1.442695, %v2432_v33  ;;  %v2429_v45 = vsub.f32 %v6034_v3, %v2395_v44  ;;  %2514 = vadd.xlane.f32.xlu0 %v2513_v26 }
 0x5d5   :  { %v2398_v51 = vpop.xlane.xlu1 %2397  ;;  %v2516_v49 = vsel %vm302_vm1, %v6126_v40, 0.0 }
 0x5d6   :  { %v6131_v50 = vpop.eup %5246  ;;  %5256 = vpow2.f32 %v2477_v17  ;;  %v2471_v10 = vmul.f32 1.442695, %v2429_v45  ;;  %v2430_v30 = vsub.f32 %v6038_v19, %v2398_v51  ;;  %2517 = vadd.xlane.f32.xlu1 %v2516_v49 }
 0x5d7   :  { %v2407_v41 = vpop.xlane.xlu0 %2406  ;;  %v2525_v55 = vsel %vm302_vm1, %v6131_v50, 0.0 }
 0x5d8   :  { %v6136_v58 = vpop.eup %5248  ;;  %5258 = vpow2.f32 %v2471_v10  ;;  %v2473_v3 = vmul.f32 1.442695, %v2430_v30  ;;  %v2433_v15 = vsub.f32 %v6042_v53, %v2407_v41  ;;  %2526 = vadd.xlane.f32.xlu0 %v2525_v55 }
 0x5d9   :  { %v2410_v43 = vpop.xlane.xlu1 %2409  ;;  %v2528_v18 = vsel %vm302_vm1, %v6136_v58, 0.0 }
 0x5da   :  { %v6141_v60 = vpop.eup %5250  ;;  %5260 = vpow2.f32 %v2473_v3  ;;  %v2479_v19 = vmul.f32 1.442695, %v2433_v15  ;;  %v2434_v0 = vsub.f32 %v6046_v31, %v2410_v43  ;;  %2529 = vadd.xlane.f32.xlu1 %v2528_v18 }
 0x5db   :  { %v2531_v63 = vsel %vm302_vm1, %v6141_v60, 0.0 }
 0x5dc   :  { %v6146_v5 = vpop.eup %5252  ;;  %5262 = vpow2.f32 %v2479_v19  ;;  %v2481_v52 = vmul.f32 1.442695, %v2434_v0  ;;  %2532 = vadd.xlane.f32.xlu0 %v2531_v63 }
 0x5dd   :  { %v2534_v53 = vsel %vm302_vm1, %v6146_v5, 0.0 }
 0x5de   :  { %v6150_v9 = vpop.eup %5254  ;;  %5264 = vpow2.f32 %v2481_v52  ;;  %2535 = vadd.xlane.f32.xlu1 %v2534_v53 }
 0x5df   :  { %v2543_v1 = vsel %vm302_vm1, %v6150_v9, 0.0 }
 0x5e0   :  { %v6154_v31 = vpop.eup %5256  ;;  %2544 = vadd.xlane.f32.xlu0 %v2543_v1 }
 0x5e1   :  { %v2546_v7 = vsel %vm302_vm1, %v6154_v31, 0.0 }
 0x5e2   :  { %v6158_v29 = vpop.eup %5258  ;;  %2547 = vadd.xlane.f32.xlu1 %v2546_v7 }
 0x5e3   :  { %v2537_v24 = vsel %vm302_vm1, %v6158_v29, 0.0 }
 0x5e4   :  { %v6162_v8 = vpop.eup %5260  ;;  %2538 = vadd.xlane.f32.xlu0 %v2537_v24 }
 0x5e5   :  { %v2540_v38 = vsel %vm302_vm1, %v6162_v8, 0.0 }
 0x5e6   :  { %v6166_v57 = vpop.eup %5262  ;;  %2541 = vadd.xlane.f32.xlu1 %v2540_v38 }
 0x5e7   :  { %v2549_v23 = vsel %vm302_vm1, %v6166_v57, 0.0 }
 0x5e8   :  { %v6170_v14 = vpop.eup %5264  ;;  %2550 = vadd.xlane.f32.xlu0 %v2549_v23 }
 0x5e9   :  { %v2552_v42 = vsel %vm302_vm1, %v6170_v14, 0.0 }
 0x5ea   :  { %2553 = vadd.xlane.f32.xlu1 %v2552_v42 }
 0x649   :  { %v2485_v22 = vpop.xlane.xlu0 %2484 }
 0x64a   :  { %5266 = vrcp.f32 %v2485_v22 }
 0x64b   :  { %v2488_v6 = vpop.xlane.xlu1 %2487 }
 0x64c   :  { %5268 = vrcp.f32 %v2488_v6 }
 0x64d   :  { %v2497_v16 = vpop.xlane.xlu0 %2496 }
 0x64e   :  { %5270 = vrcp.f32 %v2497_v16 }
 0x64f   :  { %v2500_v33 = vpop.xlane.xlu1 %2499 }
 0x650   :  { %5272 = vrcp.f32 %v2500_v33 }
 0x651   :  { %v2491_v44 = vpop.xlane.xlu0 %2490 }
 0x652   :  { %5274 = vrcp.f32 %v2491_v44 }
 0x653   :  { %v2494_v26 = vpop.xlane.xlu1 %2493 }
 0x654   :  { %v5267_v17 = vpop.eup %5266  ;;  %5276 = vrcp.f32 %v2494_v26 }
 0x655   :  { %v2503_v45 = vpop.xlane.xlu0 %2502  ;;  %v2579_v51 = vmul.f32 %v5267_v17, %v6061_v62 }
 0x656   :  { %v5269_v49 = vpop.eup %5268  ;;  %5278 = vrcp.f32 %v2503_v45 }
 0x657   :  { %v2506_v10 = vpop.xlane.xlu1 %2505  ;;  %v2580_v30 = vmul.f32 %v5269_v49, %v6066_v12  ;;  %2603 = vst.msk [vmem:[#allocation6] sm:$0xff] %vm302_vm1, %v2579_v51 }
 0x658   :  { %v5271_v41 = vpop.eup %5270  ;;  %5280 = vrcp.f32 %v2506_v10 }
 0x659   :  { %v2509_v55 = vpop.xlane.xlu0 %2508  ;;  %2604 = vst.msk [vmem:[#allocation6 + $0x8] sm:$0xff] %vm302_vm1, %v2580_v30  ;;  %v2627_v3 = vpack.c.bf16 %v2580_v30, %v2579_v51  ;;  %v2583_v15 = vmul.f32 %v5271_v41, %v6071_v25 }
 0x65a   :  { %v5273_v43 = vpop.eup %5272  ;;  %5282 = vrcp.f32 %v2509_v55 }
 0x65b   :  { %v2512_v18 = vpop.xlane.xlu1 %2511  ;;  %v2642_v62 = vsel %vm302_vm1, %v2627_v3, 0  ;;  %v2584_v19 = vmul.f32 %v5273_v43, %v6076_v59  ;;  %2607 = vst.msk [vmem:[#allocation6 + $0x20] sm:$0xff] %vm302_vm1, %v2583_v15 }
 0x65c   :  { %v5275_v12 = vpop.eup %5274  ;;  %5284 = vrcp.f32 %v2512_v18  ;;  %5008 = vmatpush3.bf16.xpose.msra.mxu0 %v2642_v62 }
 0x65d   :  { %v2521_v0 = vpop.xlane.xlu0 %2520  ;;  %2608 = vst.msk [vmem:[#allocation6 + $0x28] sm:$0xff] %vm302_vm1, %v2584_v19  ;;  %v2629_v63 = vpack.c.bf16 %v2584_v19, %v2583_v15  ;;  %5009 = vmatprep.subr.bf16.mxu0 %v5396_v32  ;;  %v2581_v25 = vmul.f32 %v5275_v12, %v6081_v27 }
 0x65e   :  { %v5277_v52 = vpop.eup %5276  ;;  %5286 = vrcp.f32 %v2521_v0 }
 0x65f   :  { %v2524_v53 = vpop.xlane.xlu1 %2523  ;;  %v2690_v1 = vsel %vm302_vm1, %v2629_v63, 0  ;;  %v2582_v59 = vmul.f32 %v5277_v52, %v6086_v48  ;;  %2605 = vst.msk [vmem:[#allocation6 + $0x10] sm:$0xff] %vm302_vm1, %v2581_v25 }
 0x660   :  { %v5279_v7 = vpop.eup %5278  ;;  %5288 = vrcp.f32 %v2524_v53  ;;  %5016 = vmatpush3.bf16.xpose.msra.mxu1 %v2690_v1 }
 0x661   :  { %v2515_v24 = vpop.xlane.xlu0 %2514  ;;  %2606 = vst.msk [vmem:[#allocation6 + $0x18] sm:$0xff] %vm302_vm1, %v2582_v59  ;;  %v2628_v38 = vpack.c.bf16 %v2582_v59, %v2581_v25  ;;  %5017 = vmatprep.subr.bf16.mxu1 %v5396_v32  ;;  %v2585_v27 = vmul.f32 %v5279_v7, %v6091_v54 }
 0x662   :  { %v5281_v23 = vpop.eup %5280  ;;  %5290 = vrcp.f32 %v2515_v24 }
 0x663   :  { %v2518_v42 = vpop.xlane.xlu1 %2517  ;;  %v2645_v22 = vsel %vm302_vm1, %v2628_v38, 0  ;;  %v2586_v48 = vmul.f32 %v5281_v23, %v6096_v47  ;;  %2609 = vst.msk [vmem:[#allocation6 + $0x30] sm:$0xff] %vm302_vm1, %v2585_v27 }
 0x664   :  { %v5283_v6 = vpop.eup %5282  ;;  %5292 = vrcp.f32 %v2518_v42  ;;  %5010 = vmatpush3.bf16.xpose.msra.mxu0 %v2645_v22 }
 0x665   :  { %v2527_v16 = vpop.xlane.xlu0 %2526  ;;  %2610 = vst.msk [vmem:[#allocation6 + $0x38] sm:$0xff] %vm302_vm1, %v2586_v48  ;;  %v2630_v33 = vpack.c.bf16 %v2586_v48, %v2585_v27  ;;  %5023 = vmatprep.subr.bf16.mxu0 %v5396_v32  ;;  %v2587_v54 = vmul.f32 %v5283_v6, %v6101_v20 }
 0x666   :  { %v5285_v44 = vpop.eup %5284  ;;  %5294 = vrcp.f32 %v2527_v16 }
 0x667   :  { %v2530_v26 = vpop.xlane.xlu1 %2529  ;;  %v2693_v17 = vsel %vm302_vm1, %v2630_v33, 0  ;;  %v2588_v47 = vmul.f32 %v5285_v44, %v6106_v11  ;;  %2611 = vst.msk [vmem:[#allocation6 + $0x40] sm:$0xff] %vm302_vm1, %v2587_v54 }
 0x668   :  { %v5287_v45 = vpop.eup %5286  ;;  %5296 = vrcp.f32 %v2530_v26  ;;  %5018 = vmatpush3.bf16.xpose.msra.mxu1 %v2693_v17 }
 0x669   :  { %v2533_v51 = vpop.xlane.xlu0 %2532  ;;  %2612 = vst.msk [vmem:[#allocation6 + $0x48] sm:$0xff] %vm302_vm1, %v2588_v47  ;;  %v2631_v49 = vpack.c.bf16 %v2588_v47, %v2587_v54  ;;  %5031 = vmatprep.subr.bf16.mxu1 %v5396_v32  ;;  %v2591_v20 = vmul.f32 %v5287_v45, %v6111_v13 }
 0x66a   :  { %v5289_v10 = vpop.eup %5288  ;;  %5298 = vrcp.f32 %v2533_v51 }
 0x66b   :  { %5012 = vmatmul.mubr.msk.bf16.vlgmr.msra.gmra.mrb[28].mxu0 %vm302_vm1, %v5763_v28  ;;  %v2536_v30 = vpop.xlane.xlu1 %2535  ;;  %v2738_v11 = vsel %vm302_vm1, %v2631_v49, 0  ;;  %v2592_v41 = vmul.f32 %v5289_v10, %v6116_v46  ;;  %2615 = vst.msk [vmem:[#allocation6 + $0x60] sm:$0xff] %vm302_vm1, %v2591_v20 }
 0x66c   :  { %v5291_v55 = vpop.eup %5290  ;;  %5300 = vrcp.f32 %v2536_v30  ;;  %5024 = vmatpush3.bf16.xpose.msra.mxu0 %v2738_v11  ;;  %5027 = vmatprep.mubr.msk.bf16.mxu0 %vm5397_vm2, %v5396_v32 }
 0x66d   :  { %v2545_v3 = vpop.xlane.xlu0 %2544  ;;  %2616 = vst.msk [vmem:[#allocation6 + $0x68] sm:$0xff] %vm302_vm1, %v2592_v41  ;;  %v2633_v13 = vpack.c.bf16 %v2592_v41, %v2591_v20  ;;  %5025 = vmatprep.subr.bf16.mxu0 %v5396_v32  ;;  %v2589_v28 = vmul.f32 %v5291_v55, %v6121_v2 }
 0x66e   :  { %v5293_v15 = vpop.eup %5292  ;;  %5302 = vrcp.f32 %v2545_v3 }
 0x66f   :  { %5020 = vmatmul.mubr.msk.bf16.vlgmr.msra.gmra.mrb[28].mxu1 %vm302_vm1, %v5772_v35  ;;  %v2548_v46 = vpop.xlane.xlu1 %2547  ;;  %v2786_v43 = vsel %vm302_vm1, %v2633_v13, 0  ;;  %v2590_v18 = vmul.f32 %v5293_v15, %v6126_v40  ;;  %2613 = vst.msk [vmem:[#allocation6 + $0x50] sm:$0xff] %vm302_vm1, %v2589_v28 }
 0x670   :  { %v5295_v62 = vpop.eup %5294  ;;  %5304 = vrcp.f32 %v2548_v46  ;;  %5032 = vmatpush3.bf16.xpose.msra.mxu1 %v2786_v43  ;;  %5035 = vmatprep.mubr.msk.bf16.mxu1 %vm5397_vm2, %v5396_v32 }
 0x671   :  { %v2539_v19 = vpop.xlane.xlu0 %2538  ;;  %2614 = vst.msk [vmem:[#allocation6 + $0x58] sm:$0xff] %vm302_vm1, %v2590_v18  ;;  %v2632_v2 = vpack.c.bf16 %v2590_v18, %v2589_v28  ;;  %5033 = vmatprep.subr.bf16.mxu1 %v5396_v32  ;;  %v2593_v35 = vmul.f32 %v5295_v62, %v6131_v50 }
 0x672   :  { %v5297_v12 = vpop.eup %5296  ;;  %5306 = vrcp.f32 %v2539_v19 }
 0x673   :  { %v2542_v0 = vpop.xlane.xlu1 %2541  ;;  %v2741_v40 = vsel %vm302_vm1, %v2632_v2, 0  ;;  %v2594_v63 = vmul.f32 %v5297_v12, %v6136_v58  ;;  %2617 = vst.msk [vmem:[#allocation6 + $0x70] sm:$0xff] %vm302_vm1, %v2593_v35 }
 0x674   :  { %v5299_v25 = vpop.eup %5298  ;;  %5308 = vrcp.f32 %v2542_v0  ;;  %5026 = vmatpush3.bf16.xpose.msra.mxu0 %v2741_v40 }
 0x675   :  { %v2551_v52 = vpop.xlane.xlu0 %2550  ;;  %2618 = vst.msk [vmem:[#allocation6 + $0x78] sm:$0xff] %vm302_vm1, %v2594_v63  ;;  %v2634_v53 = vpack.c.bf16 %v2594_v63, %v2593_v35  ;;  %5039 = vmatprep.subr.bf16.mxu0 %v5396_v32  ;;  %v2595_v50 = vmul.f32 %v5299_v25, %v6141_v60 }
 0x676   :  { %v5301_v1 = vpop.eup %5300  ;;  %5310 = vrcp.f32 %v2551_v52 }
 0x677   :  { %v2554_v59 = vpop.xlane.xlu1 %2553  ;;  %v2789_v7 = vsel %vm302_vm1, %v2634_v53, 0  ;;  %v2596_v58 = vmul.f32 %v5301_v1, %v6146_v5  ;;  %2619 = vst.msk [vmem:[#allocation6 + $0x80] sm:$0xff] %vm302_vm1, %v2595_v50 }
 0x678   :  { %v5303_v24 = vpop.eup %5302  ;;  %5312 = vrcp.f32 %v2554_v59  ;;  %5034 = vmatpush3.bf16.xpose.msra.mxu1 %v2789_v7 }
 0x679   :  { %2620 = vst.msk [vmem:[#allocation6 + $0x88] sm:$0xff] %vm302_vm1, %v2596_v58  ;;  %v2635_v38 = vpack.c.bf16 %v2596_v58, %v2595_v50  ;;  %5047 = vmatprep.subr.bf16.mxu1 %v5396_v32  ;;  %v2599_v27 = vmul.f32 %v5303_v24, %v6150_v9 }
 0x67a   :  { %v5305_v60 = vpop.eup %5304 }
 0x67b   :  { %5028 = vmatmul.mubr.msk.bf16.vlgmr.msra.gmra.mrb[32].mxu0 %vm302_vm1, %v5774_v36  ;;  %v2834_v23 = vsel %vm302_vm1, %v2635_v38, 0  ;;  %v2600_v5 = vmul.f32 %v5305_v60, %v6154_v31  ;;  %2623 = vst.msk [vmem:[#allocation6 + $0xa0] sm:$0xff] %vm302_vm1, %v2599_v27 }
 0x67c   :  { %v5307_v42 = vpop.eup %5306  ;;  %5040 = vmatpush3.bf16.xpose.msra.mxu0 %v2834_v23  ;;  %5043 = vmatprep.mubr.msk.bf16.mxu0 %vm5397_vm2, %v5396_v32 }
 0x67d   :  { %2624 = vst.msk [vmem:[#allocation6 + $0xa8] sm:$0xff] %vm302_vm1, %v2600_v5  ;;  %v2637_v22 = vpack.c.bf16 %v2600_v5, %v2599_v27  ;;  %5041 = vmatprep.subr.bf16.mxu0 %v5396_v32  ;;  %v2597_v9 = vmul.f32 %v5307_v42, %v6158_v29 }
 0x67e   :  { %v5309_v48 = vpop.eup %5308 }
 0x67f   :  { %5036 = vmatmul.mubr.msk.bf16.vlgmr.msra.gmra.mrb[32].mxu1 %vm302_vm1, %v5784_v39  ;;  %v2882_v36 = vsel %vm302_vm1, %v2637_v22, 0  ;;  %v2598_v31 = vmul.f32 %v5309_v48, %v6162_v8  ;;  %2621 = vst.msk [vmem:[#allocation6 + $0x90] sm:$0xff] %vm302_vm1, %v2597_v9 }
 0x680   :  { %v5311_v6 = vpop.eup %5310  ;;  %5048 = vmatpush3.bf16.xpose.msra.mxu1 %v2882_v36  ;;  %5051 = vmatprep.mubr.msk.bf16.mxu1 %vm5397_vm2, %v5396_v32 }
 0x681   :  { %2622 = vst.msk [vmem:[#allocation6 + $0x98] sm:$0xff] %vm302_vm1, %v2598_v31  ;;  %v2636_v16 = vpack.c.bf16 %v2598_v31, %v2597_v9  ;;  %5049 = vmatprep.subr.bf16.mxu1 %v5396_v32  ;;  %v2601_v29 = vmul.f32 %v5311_v6, %v6166_v57 }
 0x682   :  { %v5313_v33 = vpop.eup %5312 }
 0x683   :  { %v2837_v39 = vsel %vm302_vm1, %v2636_v16, 0  ;;  %v2602_v54 = vmul.f32 %v5313_v33, %v6170_v14  ;;  %2625 = vst.msk [vmem:[#allocation6 + $0xb0] sm:$0xff] %vm302_vm1, %v2601_v29 }
 0x684   :  { %5042 = vmatpush3.bf16.xpose.msra.mxu0 %v2837_v39 }
 0x685   :  { %2626 = vst.msk [vmem:[#allocation6 + $0xb8] sm:$0xff] %vm302_vm1, %v2602_v54  ;;  %v2638_v8 = vpack.c.bf16 %v2602_v54, %v2601_v29  ;;  %5055 = vmatprep.subr.bf16.mxu0 %v5396_v32 }
 0x687   :  { %v2885_v44 = vsel %vm302_vm1, %v2638_v8, 0 }
 0x688   :  { %5050 = vmatpush3.bf16.xpose.msra.mxu1 %v2885_v44 }
 0x689   :  { %5063 = vmatprep.subr.bf16.mxu1 %v5396_v32 }
 0x68b   :  { %5044 = vmatmul.mubr.msk.bf16.vlgmr.msra.gmra.mrb[36].mxu0 %vm302_vm1, %v5766_v34 }
 0x68c   :  { %5059 = vmatprep.mubr.msk.bf16.mxu0 %vm5397_vm2, %v5396_v32 }
 0x68f   :  { %5052 = vmatmul.mubr.msk.bf16.vlgmr.msra.gmra.mrb[36].mxu1 %vm302_vm1, %v5776_v37 }
 0x690   :  { %5067 = vmatprep.mubr.msk.bf16.mxu1 %vm5397_vm2, %v5396_v32 }
 0x73e   :  { %v2681_v57 = vpop.f32.mrb[28].mxu0 }
 0x73f   :  { %v2927_v14 = vpack.c.bf16 %v2681_v57, %v2681_v57  ;;  %v5013_v26 = vpop.f32.mrb[29].mxu0 }
 0x740   :  { %v2684_v17 = vpop.f32.mrb[30].mxu0 }
 0x741   :  { %2979 = vxpose.xlu0.c.b16.start.end [1/1] (short) (narrow) %v2927_v14, 32  ;;  %v5014_v47 = vpop.f32.mrb[31].mxu0 }
 0x742   :  { %v2729_v45 = vpop.f32.mrb[28].mxu1 }
 0x743   :  { %v2928_v51 = vpack.c.bf16 %v2729_v45, %v2729_v45  ;;  %v5021_v49 = vpop.f32.mrb[29].mxu1 }
 0x744   :  { %v2732_v20 = vpop.f32.mrb[30].mxu1 }
 0x745   :  { %2995 = vxpose.xlu1.c.b16.start.end [1/1] (short) (narrow) %v2928_v51, 32  ;;  %v5022_v34 = vpop.f32.mrb[31].mxu1 }
 0x74e   :  { %v2777_v10 = vpop.f32.mrb[32].mxu0 }
 0x74f   :  { %v2929_v30 = vpack.c.bf16 %v2777_v10, %v2777_v10  ;;  %v5029_v11 = vpop.f32.mrb[33].mxu0 }
 0x750   :  { %v2780_v41 = vpop.f32.mrb[34].mxu0 }
 0x751   :  { %3011 = vxpose.xlu0.c.b16.start.end [1/1] (short) (narrow) %v2929_v30, 32  ;;  %v5030_v37 = vpop.f32.mrb[35].mxu0 }
 0x752   :  { %v2825_v55 = vpop.f32.mrb[32].mxu1 }
 0x753   :  { %v2930_v3 = vpack.c.bf16 %v2825_v55, %v2825_v55  ;;  %v5037_v13 = vpop.f32.mrb[33].mxu1 }
 0x754   :  { %v2828_v28 = vpop.f32.mrb[34].mxu1 }
 0x755   :  { %3027 = vxpose.xlu1.c.b16.start.end [1/1] (short) (narrow) %v2930_v3, 32  ;;  %v5038_v15 = vpop.f32.mrb[35].mxu1 }
 0x75e   :  { %v2873_v46 = vpop.f32.mrb[36].mxu0 }
 0x75f   :  { %v2931_v43 = vpack.c.bf16 %v2873_v46, %v2873_v46  ;;  %v4799_v18 = vpack.c.bf16 %v2873_v46, %v2681_v57  ;;  %v5045_v62 = vpop.f32.mrb[37].mxu0 }
 0x760   :  { %v2876_v19 = vpop.f32.mrb[38].mxu0 }
 0x761   :  { %v2940_v2 = vrot.slane %v4799_v18, %v5750_v61  ;;  %3043 = vxpose.xlu0.c.b16.start.end [1/1] (short) (narrow) %v2931_v43, 32  ;;  %v5046_v35 = vpop.f32.mrb[39].mxu0 }
 0x762   :  { %v2921_v12 = vpop.f32.mrb[36].mxu1 }
 0x763   :  { %v2941_v0 = vcombine.low %v2940_v2, %v2929_v30  ;;  %v2932_v40 = vpack.c.bf16 %v2921_v12, %v2921_v12  ;;  %v4800_v63 = vpack.c.bf16 %v2921_v12, %v2729_v45  ;;  %v5053_v25 = vpop.f32.mrb[37].mxu1 }
 0x764   :  { %v2924_v52 = vpop.f32.mrb[38].mxu1 }
 0x765   :  { %v2948_v53 = vrot.slane %v2941_v0, %v5753_v4  ;;  %v2957_v50 = vrot.slane %v4800_v63, %v5750_v61  ;;  %3059 = vxpose.xlu1.c.b16.start.end [1/1] (short) (narrow) %v2932_v40, 32  ;;  %v5054_v1 = vpop.f32.mrb[39].mxu1 }
 0x767   :  { %v2958_v59 = vcombine.low %v2957_v50, %v2930_v3  ;;  %v2949_v7 = vcombine.high %v2948_v53, %v5400_v21  ;;  %v2970_v24 = vshrl.u32 %v2948_v53, 16 }
 0x769   :  { %v2965_v58 = vrot.slane %v2958_v59, %v5753_v4  ;;  %v2976_v42 = vshrl.u32 %v2949_v7, 16 }
 0x76b   :  { %v2966_v38 = vcombine.high %v2965_v58, %v5400_v21  ;;  %v2971_v27 = vshrl.u32 %v2965_v58, 16  ;;  %v6276_v60 = vpack.i.b16 %v2965_v58, %v2948_v53 }
 0x76d   :  { %v6278_v23 = vpack.i.b16 %v2971_v27, %v2970_v24  ;;  %v6280_v5 = vpack.i.b16 %v2966_v38, %v2949_v7  ;;  %v2977_v22 = vshrl.u32 %v2966_v38, 16 }
 0x76f   :  { %v6282_v9 = vpack.i.b16 %v2977_v22, %v2976_v42 }
 0x7a7   :  { %v2987_v48 = vpop.trf.xlu0 }
 0x7a8   :  { %v3079_v8 = vshrl.u32 %v2987_v48, 16 }
 0x7ab   :  { %v3003_v36 = vpop.trf.xlu1  ;;  %v6284_v31 = vpop.trf.xlu0 }
 0x7ac   :  { %v3080_v44 = vshrl.u32 %v3003_v36, 16  ;;  %v3077_v47 = vpack.i.b16 %v3003_v36, %v2987_v48  ;;  %v3103_v36 = vshrl.u32 %v6284_v31, 16 }
 0x7ae   :  { %v3081_v20 = vpack.i.b16 %v3080_v44, %v3079_v8 }
 0x7af   :  { %v6286_v6 = vpop.trf.xlu1 }
 0x7b0   :  { %v3101_v8 = vpack.i.b16 %v6286_v6, %v6284_v31 }
 0x7b7   :  { %v3019_v16 = vpop.trf.xlu0 }
 0x7b8   :  { %v3087_v57 = vshrl.u32 %v3019_v16, 16 }
 0x7bb   :  { %v3035_v29 = vpop.trf.xlu1  ;;  %v6288_v33 = vpop.trf.xlu0 }
 0x7bc   :  { %v3088_v14 = vshrl.u32 %v3035_v29, 16  ;;  %v3085_v45 = vpack.i.b16 %v3035_v29, %v3019_v16  ;;  %v3104_v16 = vshrl.u32 %v6286_v6, 16 }
 0x7be   :  { %v3089_v34 = vpack.i.b16 %v3088_v14, %v3087_v57  ;;  %v3146_v11 = vrot.slane %v3085_v45, %v5750_v61  ;;  %v3139_v3 = vcombine.high %v3085_v45, %v5799_v56  ;;  %v3105_v14 = vpack.i.b16 %v3104_v16, %v3103_v36 }
 0x7bf   :  { %v6290_v39 = vpop.trf.xlu1 }
 0x7c0   :  { %v3213_v13 = vrot.slane %v3089_v34, %v5750_v61  ;;  %v3206_v43 = vcombine.high %v3089_v34, %v5799_v56  ;;  %v3153_v35 = vrot.slane %v3139_v3, %v5750_v61 }
 0x7c2   :  { %v3220_v63 = vrot.slane %v3206_v43, %v5750_v61 }
 0x7c7   :  { %v3051_v54 = vpop.trf.xlu0 }
 0x7c8   :  { %v3095_v26 = vshrl.u32 %v3051_v54, 16 }
 0x7cb   :  { %v3067_v17 = vpop.trf.xlu1  ;;  %v3052_v24 = vpop.trf.xlu0 }
 0x7cc   :  { %v3093_v51 = vpack.i.b16 %v3067_v17, %v3051_v54  ;;  %v3096_v49 = vshrl.u32 %v3067_v17, 16  ;;  %v3119_v42 = vshrl.u32 %v3052_v24, 16  ;;  %v3112_v17 = vshrl.u32 %v6290_v39, 16 }
 0x7ce   :  { %v3097_v10 = vpack.i.b16 %v3096_v49, %v3095_v26  ;;  %v3123_v30 = vcombine.low %v3077_v47, %v3093_v51  ;;  %v3124_v41 = vcombine.high %v3077_v47, %v3093_v51  ;;  %v3111_v26 = vshrl.u32 %v6288_v33, 16 }
 0x7cf   :  { %v3068_v38 = vpop.trf.xlu1  ;;  %v3109_v51 = vpack.i.b16 %v6290_v39, %v6288_v33 }
 0x7d0   :  { %v3131_v37 = vrot.slane %v3123_v30, %v5750_v61  ;;  %v3190_v55 = vcombine.low %v3081_v20, %v3097_v10  ;;  %v3191_v28 = vcombine.high %v3081_v20, %v3097_v10  ;;  %v3138_v18 = vrot.slane %v3124_v41, %v5750_v61 }
 0x7d1   :  { %v3120_v22 = vshrl.u32 %v3068_v38, 16  ;;  %v3117_v29 = vpack.i.b16 %v3068_v38, %v3052_v24  ;;  %v3113_v6 = vpack.i.b16 %v3112_v17, %v3111_v26  ;;  %v3280_v10 = vrot.slane %v3109_v51, %v5750_v61 }
 0x7d2   :  { %v3198_v15 = vrot.slane %v3190_v55, %v5750_v61  ;;  %v3154_v46 = vcombine.low %v3131_v37, %v3146_v11  ;;  %v3155_v2 = vcombine.high %v3131_v37, %v3146_v11  ;;  %v3205_v12 = vrot.slane %v3191_v28, %v5750_v61 }
 0x7d3   :  { %v3170_v52 = vcombine.low %v3138_v18, %v3153_v35  ;;  %v3171_v59 = vcombine.high %v3138_v18, %v3153_v35  ;;  %v3121_v44 = vpack.i.b16 %v3120_v22, %v3119_v42  ;;  %v3257_v47 = vcombine.low %v3101_v8, %v3117_v29 }
 0x7d4   :  { %v3162_v62 = vrot.slane %v3154_v46, %v5753_v4  ;;  %v3221_v19 = vcombine.low %v3198_v15, %v3213_v13  ;;  %v3222_v40 = vcombine.high %v3198_v15, %v3213_v13  ;;  %v3169_v25 = vrot.slane %v3155_v2, %v5753_v4 }
 0x7d5   :  { %v3237_v50 = vcombine.low %v3205_v12, %v3220_v63  ;;  %v3178_v1 = vrot.slane %v3170_v52, %v5753_v4  ;;  %v3238_v58 = vcombine.high %v3205_v12, %v3220_v63  ;;  %v3185_v27 = vrot.slane %v3171_v59, %v5753_v4 }
 0x7d6   :  { %3391 = vxpose.xlu0.c.b16.start.end [1/1] (short) (narrow) %v3162_v62, 16  ;;  %v3229_v0 = vrot.slane %v3221_v19, %v5753_v4  ;;  %v3236_v53 = vrot.slane %v3222_v40, %v5753_v4  ;;  %v3186_v54 = vcombine.high %v3162_v62, %v5400_v21  ;;  %v3187_v45 = vcombine.high %v3169_v25, %v5400_v21 }
 0x7d7   :  { %v3245_v7 = vrot.slane %v3237_v50, %v5753_v4  ;;  %v3252_v48 = vrot.slane %v3238_v58, %v5753_v4  ;;  %v3324_v49 = vcombine.low %v3105_v14, %v3121_v44  ;;  %v3265_v20 = vrot.slane %v3257_v47, %v5750_v61 }
 0x7d8   :  { %3407 = vxpose.xlu1.c.b16.start.end [1/1] (short) (narrow) %v3229_v0, 16  ;;  %v3253_v57 = vcombine.high %v3229_v0, %v5400_v21  ;;  %v3254_v31 = vcombine.high %v3236_v53, %v5400_v21  ;;  %v3188_v34 = vcombine.high %v3178_v1, %v5400_v21  ;;  %v3347_v41 = vrot.slane %v3113_v6, %v5750_v61 }
 0x7d9   :  { %v3332_v30 = vrot.slane %v3324_v49, %v5750_v61  ;;  %v3255_v11 = vcombine.high %v3245_v7, %v5400_v21  ;;  %v3258_v33 = vcombine.high %v3101_v8, %v3117_v29  ;;  %v3189_v39 = vcombine.high %v3185_v27, %v5400_v21 }
 0x7da   :  { %3455 = vxpose.xlu0.c.b16.start.end [1/1] (short) (narrow) %v3169_v25, 16  ;;  %v3288_v37 = vcombine.low %v3265_v20, %v3280_v10  ;;  %v3273_v55 = vcombine.high %v3109_v51, %v5799_v56  ;;  %v3325_v3 = vcombine.high %v3105_v14, %v3121_v44  ;;  %v3256_v13 = vcombine.high %v3252_v48, %v5400_v21 }
 0x7db   :  { %v3355_v28 = vcombine.low %v3332_v30, %v3347_v41  ;;  %v3340_v15 = vcombine.high %v3113_v6, %v5799_v56  ;;  %v3272_v46 = vrot.slane %v3258_v33, %v5750_v61  ;;  %v3289_v18 = vcombine.high %v3265_v20, %v3280_v10 }
 0x7dc   :  { %3471 = vxpose.xlu1.c.b16.start.end [1/1] (short) (narrow) %v3236_v53, 16  ;;  %v3296_v43 = vrot.slane %v3288_v37, %v5753_v4  ;;  %v3287_v62 = vrot.slane %v3273_v55, %v5750_v61  ;;  %v3339_v19 = vrot.slane %v3325_v3, %v5750_v61  ;;  %v3356_v35 = vcombine.high %v3332_v30, %v3347_v41 }
 0x7dd   :  { %v3363_v2 = vrot.slane %v3355_v28, %v5753_v4  ;;  %v3354_v12 = vrot.slane %v3340_v15, %v5750_v61  ;;  %v3303_v0 = vrot.slane %v3289_v18, %v5753_v4 }
 0x7de   :  { %3519 = vxpose.xlu0.c.b16.start.end [1/1] (short) (narrow) %v3178_v1, 16  ;;  %v3304_v56 = vcombine.low %v3272_v46, %v3287_v62  ;;  %v3370_v40 = vrot.slane %v3356_v35, %v5753_v4  ;;  %v3305_v52 = vcombine.high %v3272_v46, %v3287_v62 }
 0x7df   :  { %v3371_v63 = vcombine.low %v3339_v19, %v3354_v12  ;;  %v3372_v50 = vcombine.high %v3339_v19, %v3354_v12  ;;  %v3387_v58 = vcombine.high %v3363_v2, %v5400_v21  ;;  %v3321_v24 = vcombine.high %v3303_v0, %v5400_v21 }
 0x7e0   :  { %3535 = vxpose.xlu1.c.b16.start.end [1/1] (short) (narrow) %v3245_v7, 16  ;;  %v3312_v25 = vrot.slane %v3304_v56, %v5753_v4  ;;  %v3319_v1 = vrot.slane %v3305_v52, %v5753_v4  ;;  %v3320_v7 = vcombine.high %v3296_v43, %v5400_v21  ;;  %v3388_v38 = vcombine.high %v3370_v40, %v5400_v21 }
 0x7e1   :  { %v3379_v53 = vrot.slane %v3371_v63, %v5753_v4  ;;  %v3386_v59 = vrot.slane %v3372_v50, %v5753_v4 }
 0x7e2   :  { %3583 = vxpose.xlu0.c.b16.start.end [1/1] (short) (narrow) %v3185_v27, 16  ;;  %v3322_v27 = vcombine.high %v3312_v25, %v5400_v21  ;;  %v3323_v22 = vcombine.high %v3319_v1, %v5400_v21 }
 0x7e3   :  { %v3389_v42 = vcombine.high %v3379_v53, %v5400_v21 }
 0x7e4   :  { %3599 = vxpose.xlu1.c.b16.start.end [1/1] (short) (narrow) %v3252_v48, 16  ;;  %v3390_v48 = vcombine.high %v3386_v59, %v5400_v21 }
 0x7e6   :  { %3423 = vxpose.xlu0.c.b16.start.end [1/1] (short) (narrow) %v3186_v54, 16 }
 0x7e8   :  { %3439 = vxpose.xlu1.c.b16.start.end [1/1] (short) (narrow) %v3253_v57, 16 }
 0x7ea   :  { %3487 = vxpose.xlu0.c.b16.start.end [1/1] (short) (narrow) %v3187_v45, 16 }
 0x7ec   :  { %3503 = vxpose.xlu1.c.b16.start.end [1/1] (short) (narrow) %v3254_v31, 16 }
 0x7ee   :  { %3551 = vxpose.xlu0.c.b16.start.end [1/1] (short) (narrow) %v3188_v34, 16 }
 0x7f0   :  { %3567 = vxpose.xlu1.c.b16.start.end [1/1] (short) (narrow) %v3255_v11, 16 }
 0x7f2   :  { %3615 = vxpose.xlu0.c.b16.start.end [1/1] (short) (narrow) %v3189_v39, 16 }
 0x7f4   :  { %3631 = vxpose.xlu1.c.b16.start.end [1/1] (short) (narrow) %v3256_v13, 16 }
 0x7f6   :  { %3647 = vxpose.xlu0.c.b16.start.end [1/1] (short) (narrow) %v3296_v43, 16 }
 0x7f8   :  { %3663 = vxpose.xlu1.c.b16.start.end [1/1] (short) (narrow) %v3363_v2, 16 }
 0x7fa   :  { %3711 = vxpose.xlu0.c.b16.start.end [1/1] (short) (narrow) %v3303_v0, 16 }
 0x7fc   :  { %3727 = vxpose.xlu1.c.b16.start.end [1/1] (short) (narrow) %v3370_v40, 16 }
 0x7fe   :  { %3775 = vxpose.xlu0.c.b16.start.end [1/1] (short) (narrow) %v3312_v25, 16 }
 0x800   :  { %3791 = vxpose.xlu1.c.b16.start.end [1/1] (short) (narrow) %v3379_v53, 16 }
 0x802   :  { %3839 = vxpose.xlu0.c.b16.start.end [1/1] (short) (narrow) %v3319_v1, 16 }
 0x804   :  { %3855 = vxpose.xlu1.c.b16.start.end [1/1] (short) (narrow) %v3386_v59, 16 }
 0x806   :  { %3679 = vxpose.xlu0.c.b16.start.end [1/1] (short) (narrow) %v3320_v7, 16 }
 0x808   :  { %3695 = vxpose.xlu1.c.b16.start.end [1/1] (short) (narrow) %v3387_v58, 16 }
 0x80a   :  { %3743 = vxpose.xlu0.c.b16.start.end [1/1] (short) (narrow) %v3321_v24, 16 }
 0x80c   :  { %3759 = vxpose.xlu1.c.b16.start.end [1/1] (short) (narrow) %v3388_v38, 16 }
 0x80e   :  { %3807 = vxpose.xlu0.c.b16.start.end [1/1] (short) (narrow) %v3322_v27, 16 }
 0x810   :  { %3823 = vxpose.xlu1.c.b16.start.end [1/1] (short) (narrow) %v3389_v42, 16 }
 0x812   :  { %3871 = vxpose.xlu0.c.b16.start.end [1/1] (short) (narrow) %v3323_v22, 16 }
 0x814   :  { %3887 = vxpose.xlu1.c.b16.start.end [1/1] (short) (narrow) %v3390_v48, 16 }
 0x83c   :  { %v3399_v36 = vpop.trf.xlu0 }
 0x83e   :  { %v3415_v16 = vpop.trf.xlu1 }
 0x840   :  { %v3463_v29 = vpop.trf.xlu0 }
 0x841   :  { %v3903_v31 = vcombine.low %v3399_v36, %v3463_v29 }
 0x842   :  { %v3479_v54 = vpop.trf.xlu1 }
 0x843   :  { %v3953_v20 = vcombine.low %v3415_v16, %v3479_v54  ;;  %v3910_v11 = vrot.slane %v3903_v31, %v5750_v61 }
 0x844   :  { %v3527_v8 = vpop.trf.xlu0 }
 0x845   :  { %v3960_v37 = vrot.slane %v3953_v20, %v5750_v61 }
 0x846   :  { %v3543_v44 = vpop.trf.xlu1 }
 0x848   :  { %v3591_v57 = vpop.trf.xlu0 }
 0x849   :  { %v3919_v21 = vcombine.low %v3527_v8, %v3591_v57 }
 0x84a   :  { %v3607_v14 = vpop.trf.xlu1 }
 0x84b   :  { %v3969_v41 = vcombine.low %v3543_v44, %v3607_v14  ;;  %v3926_v3 = vrot.slane %v3919_v21, %v5750_v61 }
 0x84c   :  { %v3431_v26 = vpop.trf.xlu0 }
 0x84d   :  { %v3976_v43 = vrot.slane %v3969_v41, %v5750_v61 }
 0x84e   :  { %v3447_v17 = vpop.trf.xlu1 }
 0x850   :  { %v3495_v47 = vpop.trf.xlu0 }
 0x851   :  { %v3911_v51 = vcombine.low %v3431_v26, %v3495_v47 }
 0x852   :  { %v3511_v45 = vpop.trf.xlu1 }
 0x853   :  { %v3961_v6 = vcombine.low %v3447_v17, %v3511_v45  ;;  %v3918_v10 = vrot.slane %v3911_v51, %v5750_v61 }
 0x854   :  { %v3559_v49 = vpop.trf.xlu0 }
 0x855   :  { %v3968_v33 = vrot.slane %v3961_v6, %v5750_v61  ;;  %v3935_v13 = vcombine.low %v3910_v11, %v3918_v10 }
 0x856   :  { %v3575_v34 = vpop.trf.xlu1 }
 0x857   :  { %v3985_v18 = vcombine.low %v3960_v37, %v3968_v33  ;;  %v3942_v35 = vrot.slane %v3935_v13, %v5753_v4 }
 0x858   :  { %v3623_v30 = vpop.trf.xlu0 }
 0x859   :  { %v3927_v39 = vcombine.low %v3559_v49, %v3623_v30  ;;  %v3992_v40 = vrot.slane %v3985_v18, %v5753_v4 }
 0x85a   :  { %v3639_v55 = vpop.trf.xlu1 }
 0x85b   :  { %v3934_v28 = vrot.slane %v3927_v39, %v5750_v61  ;;  %v3977_v15 = vcombine.low %v3575_v34, %v3639_v55 }
 0x85c   :  { %v3655_v46 = vpop.trf.xlu0 }
 0x85d   :  { %v3943_v62 = vcombine.low %v3926_v3, %v3934_v28  ;;  %v3984_v19 = vrot.slane %v3977_v15, %v5750_v61 }
 0x85e   :  { %v3671_v2 = vpop.trf.xlu1 }
 0x85f   :  { %v3950_v12 = vrot.slane %v3943_v62, %v5753_v4  ;;  %v3993_v0 = vcombine.low %v3976_v43, %v3984_v19 }
 0x860   :  { %v3719_v56 = vpop.trf.xlu0 }
 0x861   :  { %v3951_v63 = vcombine.low %v3942_v35, %v3950_v12  ;;  %v4000_v25 = vrot.slane %v3993_v0, %v5753_v4  ;;  %v4003_v54 = vcombine.low %v3655_v46, %v3719_v56  ;;  %v3952_v43 = vcombine.high %v3942_v35, %v3950_v12  ;;  %v4352_v12 = vld [vmem:[%s6548_s2] sm:$0xff] }
 0x862   :  { %v3735_v52 = vpop.trf.xlu1 }
 0x863   :  { %v4001_v53 = vcombine.low %v3992_v40, %v4000_v25  ;;  %v4107_v59 = vshrl.u32 %v3951_v63, 16  ;;  %v4053_v44 = vcombine.low %v3671_v2, %v3735_v52  ;;  %v4010_v47 = vrot.slane %v4003_v54, %v5750_v61  ;;  %v4365_v54 = vld [vmem:[%s6548_s2 + $0x68] sm:$0xff] }
 0x864   :  { %v3783_v50 = vpop.trf.xlu0  ;;  %v4002_v15 = vcombine.high %v3992_v40, %v4000_v25  ;;  %v4115_v52 = vshrl.u32 %v3952_v43, 16  ;;  %v4353_v40 = vld [vmem:[%s6548_s2 + $0x8] sm:$0xff] }
 0x865   :  { %v4105_v1 = vpack.i.b16 %v4001_v53, %v3951_v63  ;;  %v4108_v7 = vshrl.u32 %v4001_v53, 16  ;;  %v4060_v31 = vrot.slane %v4053_v44, %v5750_v61  ;;  %v4362_v44 = vld [vmem:[%s6548_s2 + $0x50] sm:$0xff] }
 0x866   :  { %v3799_v58 = vpop.trf.xlu1  ;;  %v4113_v63 = vpack.i.b16 %v4002_v15, %v3952_v43 }
 0x867   :  { %5056 = vmatpush3.bf16.msra.mxu0 %v4105_v1  ;;  %v4109_v24 = vpack.i.b16 %v4108_v7, %v4107_v59  ;;  %v4357_v1 = vld [vmem:[%s6548_s2 + $0x28] sm:$0xff]  ;;  %v4368_v7 = vpack.c.bf16 %v4353_v40, %v4352_v12 }
 0x868   :  { %v3847_v38 = vpop.trf.xlu0  ;;  %5057 = vmatprep.subr.bf16.mxu0 %v5396_v32 }
 0x869   :  { %5064 = vmatpush3.bf16.msra.mxu1 %v4109_v24  ;;  %v4019_v14 = vcombine.low %v3783_v50, %v3847_v38  ;;  %v4356_v50 = vld [vmem:[%s6548_s2 + $0x20] sm:$0xff]  ;;  %v4355_v24 = vld [vmem:[%s6548_s2 + $0x18] sm:$0xff] }
 0x86a   :  { %v3863_v27 = vpop.trf.xlu1  ;;  %5065 = vmatprep.subr.bf16.mxu1 %v5396_v32  ;;  %v4370_v38 = vpack.c.bf16 %v4357_v1, %v4356_v50 }
 0x86b   :  { %v4069_v45 = vcombine.low %v3799_v58, %v3863_v27  ;;  %v4026_v20 = vrot.slane %v4019_v14, %v5750_v61  ;;  %v4354_v58 = vld [vmem:[%s6548_s2 + $0x10] sm:$0xff] }
 0x86c   :  { %v3687_v42 = vpop.trf.xlu0  ;;  %v4358_v27 = vld [vmem:[%s6548_s2 + $0x30] sm:$0xff] }
 0x86d   :  { %v4076_v30 = vrot.slane %v4069_v45, %v5750_v61 }
 0x86e   :  { %v3703_v22 = vpop.trf.xlu1 }
 0x870   :  { %v3751_v48 = vpop.trf.xlu0 }
 0x871   :  { %v4011_v16 = vcombine.low %v3687_v42, %v3751_v48  ;;  %v4359_v42 = vld [vmem:[%s6548_s2 + $0x38] sm:$0xff]  ;;  %v4360_v48 = vld [vmem:[%s6548_s2 + $0x40] sm:$0xff] }
 0x872   :  { %v3767_v36 = vpop.trf.xlu1 }
 0x873   :  { %v4061_v8 = vcombine.low %v3703_v22, %v3767_v36  ;;  %v4018_v26 = vrot.slane %v4011_v16, %v5750_v61  ;;  %v4369_v22 = vpack.c.bf16 %v4355_v24, %v4354_v58  ;;  %v4361_v36 = vld [vmem:[%s6548_s2 + $0x48] sm:$0xff]  ;;  %v4371_v16 = vpack.c.bf16 %v4359_v42, %v4358_v27 }
 0x874   :  { %v3815_v29 = vpop.trf.xlu0 }
 0x875   :  { %v4068_v51 = vrot.slane %v4061_v8, %v5750_v61  ;;  %v4035_v34 = vcombine.low %v4010_v47, %v4018_v26  ;;  %v4372_v8 = vpack.c.bf16 %v4361_v36, %v4360_v48  ;;  %v4366_v26 = vld [vmem:[%s6548_s2 + $0x70] sm:$0xff]  ;;  %v4545_v48 = vld [vmem:[%s6551_s5] sm:$0x3] }
 0x876   :  { %v3831_v57 = vpop.trf.xlu1  ;;  %v4623_v36 = vld [vmem:[%s6552_s6] sm:$0x3f] }
 0x877   :  { %v4085_v11 = vcombine.low %v4060_v31, %v4068_v51  ;;  %v4042_v39 = vrot.slane %v4035_v34, %v5753_v4 }
 0x878   :  { %v3879_v17 = vpop.trf.xlu0 }
 0x879   :  { %v4027_v49 = vcombine.low %v3815_v29, %v3879_v17  ;;  %v4092_v3 = vrot.slane %v4085_v11, %v5753_v4  ;;  %v4364_v29 = vld [vmem:[%s6548_s2 + $0x60] sm:$0xff]  ;;  %v4367_v17 = vld [vmem:[%s6548_s2 + $0x78] sm:$0xff] }
 0x87a   :  { %v3895_v6 = vpop.trf.xlu1  ;;  %v4374_v14 = vpack.c.bf16 %v4365_v54, %v4364_v29 }
 0x87b   :  { %v4034_v21 = vrot.slane %v4027_v49, %v5750_v61  ;;  %v4077_v10 = vcombine.low %v3831_v57, %v3895_v6  ;;  %v4363_v57 = vld [vmem:[%s6548_s2 + $0x58] sm:$0xff] }
 0x87c   :  { %v4373_v47 = vpack.c.bf16 %v4363_v57, %v4362_v44 }
 0x87d   :  { %v4043_v41 = vcombine.low %v4026_v20, %v4034_v21  ;;  %v4084_v33 = vrot.slane %v4077_v10, %v5750_v61  ;;  %v4116_v61 = vshrl.u32 %v4002_v15, 16 }
 0x87f   :  { %v4050_v37 = vrot.slane %v4043_v41, %v5753_v4  ;;  %v4093_v55 = vcombine.low %v4076_v30, %v4084_v33 }
 0x881   :  { %v4051_v13 = vcombine.low %v4042_v39, %v4050_v37  ;;  %v4100_v28 = vrot.slane %v4093_v55, %v5753_v4  ;;  %v4052_v56 = vcombine.high %v4042_v39, %v4050_v37  ;;  %v4117_v4 = vpack.i.b16 %v4116_v61, %v4115_v52 }
 0x883   :  { %v4101_v46 = vcombine.low %v4092_v3, %v4100_v28  ;;  %v4123_v62 = vshrl.u32 %v4051_v13, 16  ;;  %v4102_v2 = vcombine.high %v4092_v3, %v4100_v28  ;;  %v4131_v53 = vshrl.u32 %v4052_v56, 16 }
 0x885   :  { %v4121_v18 = vpack.i.b16 %v4101_v46, %v4051_v13  ;;  %v4124_v19 = vshrl.u32 %v4101_v46, 16  ;;  %v4132_v35 = vshrl.u32 %v4102_v2, 16  ;;  %v4129_v25 = vpack.i.b16 %v4102_v2, %v4052_v56 }
 0x887   :  { %5058 = vmatpush3.bf16.msra.mxu0 %v4121_v18  ;;  %v4125_v0 = vpack.i.b16 %v4124_v19, %v4123_v62  ;;  %v4133_v59 = vpack.i.b16 %v4132_v35, %v4131_v53 }
 0x888   :  { %5071 = vmatprep.subr.bf16.mxu0 %v5396_v32 }
 0x889   :  { %5066 = vmatpush3.bf16.msra.mxu1 %v4125_v0 }
 0x88a   :  { %5060 = vmatmul.mubr.msk.bf16.vlgmr.msra.gmra.mrb[40].mxu0 %vm302_vm1, %v6276_v60  ;;  %5079 = vmatprep.subr.bf16.mxu1 %v5396_v32 }
 0x88b   :  { %5072 = vmatpush3.bf16.msra.mxu0 %v4113_v63  ;;  %5075 = vmatprep.mubr.msk.bf16.mxu0 %vm5397_vm2, %v5396_v32 }
 0x88c   :  { %5068 = vmatmul.mubr.msk.bf16.vlgmr.msra.gmra.mrb[40].mxu1 %vm302_vm1, %v6278_v23  ;;  %5073 = vmatprep.subr.bf16.mxu0 %v5396_v32 }
 0x88d   :  { %5080 = vmatpush3.bf16.msra.mxu1 %v4117_v4  ;;  %5083 = vmatprep.mubr.msk.bf16.mxu1 %vm5397_vm2, %v5396_v32 }
 0x88e   :  { %5081 = vmatprep.subr.bf16.mxu1 %v5396_v32 }
 0x88f   :  { %5074 = vmatpush3.bf16.msra.mxu0 %v4129_v25 }
 0x890   :  { %5087 = vmatprep.subr.bf16.mxu0 %v5396_v32 }
 0x891   :  { %5082 = vmatpush3.bf16.msra.mxu1 %v4133_v59 }
 0x892   :  { %5076 = vmatmul.mubr.msk.bf16.vlgmr.msra.gmra.mrb[44].mxu0 %vm302_vm1, %v6280_v5  ;;  %5095 = vmatprep.subr.bf16.mxu1 %v5396_v32 }
 0x893   :  { %5088 = vmatpush3.bf16.msra.mxu0 %v4368_v7  ;;  %5091 = vmatprep.mubr.msk.bf16.mxu0 %vm5397_vm2, %v5396_v32  ;;  %v4543_v7 = vld [vmem:[%s6550_s4] sm:$0x3f]  ;;  %s5401_s4 = smov 125  }
 0x894   :  { %5084 = vmatmul.mubr.msk.bf16.vlgmr.msra.gmra.mrb[44].mxu1 %vm302_vm1, %v6282_v9  ;;  %5089 = vmatprep.subr.bf16.mxu0 %v5396_v32 }
 0x895   :  { %5096 = vmatpush3.bf16.msra.mxu1 %v4370_v38  ;;  %5099 = vmatprep.mubr.msk.bf16.mxu1 %vm5397_vm2, %v5396_v32 }
 0x896   :  { %5097 = vmatprep.subr.bf16.mxu1 %v5396_v32 }
 0x897   :  { %5090 = vmatpush3.bf16.msra.mxu0 %v4369_v22 }
 0x898   :  { %5103 = vmatprep.subr.bf16.mxu0 %v5396_v32 }
 0x899   :  { %5098 = vmatpush3.bf16.msra.mxu1 %v4371_v16 }
 0x89a   :  { %5092 = vmatmul.mubr.msk.bf16.vlgmr.msra.gmra.mrb[48].mxu0 %vm302_vm1, %v6276_v60  ;;  %5111 = vmatprep.subr.bf16.mxu1 %v5396_v32  ;;  %v4375_v60 = vpack.c.bf16 %v4367_v17, %v4366_v26 }
 0x89b   :  { %5104 = vmatpush3.bf16.msra.mxu0 %v4372_v8  ;;  %5107 = vmatprep.mubr.msk.bf16.mxu0 %vm5397_vm2, %v5396_v32 }
 0x89c   :  { %5100 = vmatmul.mubr.msk.bf16.vlgmr.msra.gmra.mrb[48].mxu1 %vm302_vm1, %v6278_v23  ;;  %5105 = vmatprep.subr.bf16.mxu0 %v5396_v32 }
 0x89d   :  { %5112 = vmatpush3.bf16.msra.mxu1 %v4374_v14  ;;  %5115 = vmatprep.mubr.msk.bf16.mxu1 %vm5397_vm2, %v5396_v32 }
 0x89e   :  { %5113 = vmatprep.subr.bf16.mxu1 %v5396_v32 }
 0x89f   :  { %5106 = vmatpush3.bf16.msra.mxu0 %v4373_v47 }
 0x8a0   :  { %5119 = vmatprep.subr.mxu0 %v5396_v32 }
 0x8a1   :  { %5114 = vmatpush3.bf16.msra.mxu1 %v4375_v60 }
 0x8a2   :  { %5108 = vmatmul.mubr.msk.bf16.vlgmr.msra.gmra.mrb[52].mxu0 %vm302_vm1, %v6280_v5  ;;  %5124 = vmatprep.subr.mxu1 %v5396_v32 }
 0x8a3   :  { %5121 = vmatprep.mubr.msk.f32.mxu0 %vm5397_vm2, %v5396_v32 }
 0x8a4   :  { %5116 = vmatmul.mubr.msk.bf16.vlgmr.msra.gmra.mrb[52].mxu1 %vm302_vm1, %v6282_v9 }
 0x8a5   :  { %5126 = vmatprep.mubr.msk.f32.mxu1 %vm5397_vm2, %v5396_v32  ;;  %5125 = vmatpush3.msk.msra.mxu1 %vm4549_vm8, %v4623_v36 }
 0x95d   :  { %v4172_v23 = vpop.f32.mrb[40].mxu0 }
 0x95e   :  { %v5061_v45 = vpop.f32.mrb[41].mxu0  ;;  %v4308_v31 = vsel %vm4307_vm5, %v4172_v23, 0.0 }
 0x95f   :  { %v4175_v51 = vpop.f32.mrb[42].mxu0  ;;  %v4215_v49 = vpop.f32.mrb[40].mxu1 }
 0x960   :  { %v4309_v5 = vsel %vm4307_vm5, %v4215_v49, 0.0  ;;  %v5062_v6 = vpop.f32.mrb[43].mxu0  ;;  %v5069_v20 = vpop.f32.mrb[41].mxu1 }
 0x961   :  { %v4310_v34 = vadd.f32 %v4309_v5, %v4308_v31  ;;  %v4218_v21 = vpop.f32.mrb[42].mxu1  ;;  %v4812_v6 = vld [vmem:[%s6549_s3] ss:$0 sm:$0xff]  ;;  %s5326_s3 = scalar_lea.vmem %s4736_s28, 2048 }
 0x962   :  { %v5070_v10 = vpop.f32.mrb[43].mxu1  ;;  %p5327_p0 = scmp.ne.s32.totalorder %s4736_s28, %s5326_s3  ;;  %p5332_p2 = scmp.lt.s32.totalorder %s5326_s3, %s5326_s3 }
 0x964   :  { %p5333_p3 = por %p5332_p2, %p5331_p1 }
 0x965   :  { %v4258_v30 = vpop.f32.mrb[44].mxu0 }
 0x966   :  { %v4311_v9 = vsel %vm4307_vm5, %v4258_v30, 0.0  ;;  %v5077_v11 = vpop.f32.mrb[45].mxu0  ;;  %p5334_p4 = pnand %p5333_p3, %p5327_p0 }
 0x967   :  { %v4312_v41 = vadd.f32 %v4311_v9, %v4310_v34  ;;  %v4261_v32 = vpop.f32.mrb[46].mxu0  ;;  %v4301_v33 = vpop.f32.mrb[44].mxu1 }
 0x968   :  { %v4313_v39 = vsel %vm4307_vm5, %v4301_v33, 0.0  ;;  %v5078_v37 = vpop.f32.mrb[47].mxu0  ;;  %v5085_v55 = vpop.f32.mrb[45].mxu1 }
 0x969   :  { %v4314_v3 = vadd.f32 %v4313_v39, %v4312_v41  ;;  %v4304_v13 = vpop.f32.mrb[46].mxu1 }
 0x96a   :  { %v5086_v28 = vpop.f32.mrb[47].mxu1 }
 0x96b   :  { %v4315_v15 = vmul.f32 0.088388346, %v4314_v3 }
 0x96d   :  { %v4410_v46 = vpop.f32.mrb[48].mxu0  ;;  %v4330_v43 = vsel %vm4329_vm6, %v4315_v15, -inf  ;;  %v4317_v4 = vsel %vm4316_vm7, %v4315_v15, -inf }
 0x96e   :  { %4331 = vmax.xlane.f32.xlu0 %v4330_v43  ;;  %v5093_v18 = vpop.f32.mrb[49].mxu0  ;;  %v4536_v2 = vsel %vm4307_vm5, %v4410_v46, 0.0 }
 0x96f   :  { %v4413_v62 = vpop.f32.mrb[50].mxu0  ;;  %v4450_v19 = vpop.f32.mrb[48].mxu1 }
 0x970   :  { %v4537_v0 = vsel %vm4307_vm5, %v4450_v19, 0.0  ;;  %v5094_v61 = vpop.f32.mrb[51].mxu0  ;;  %v5101_v56 = vpop.f32.mrb[49].mxu1 }
 0x971   :  { %v4538_v63 = vadd.f32 %v4537_v0, %v4536_v2  ;;  %v4453_v52 = vpop.f32.mrb[50].mxu1 }
 0x972   :  { %v5102_v35 = vpop.f32.mrb[51].mxu1  ;;  %4318 = vmax.xlane.f32.xlu0 %v4317_v4 }
 0x975   :  { %v4490_v12 = vpop.f32.mrb[52].mxu0 }
 0x976   :  { %v4539_v40 = vsel %vm4307_vm5, %v4490_v12, 0.0  ;;  %v5109_v25 = vpop.f32.mrb[53].mxu0 }
 0x977   :  { %v4540_v53 = vadd.f32 %v4539_v40, %v4538_v63  ;;  %v4493_v50 = vpop.f32.mrb[54].mxu0  ;;  %v4530_v1 = vpop.f32.mrb[52].mxu1 }
 0x978   :  { %v4541_v59 = vsel %vm4307_vm5, %v4530_v1, 0.0  ;;  %v5110_v58 = vpop.f32.mrb[55].mxu0  ;;  %v5117_v24 = vpop.f32.mrb[53].mxu1 }
 0x979   :  { %v4542_v38 = vadd.f32 %v4541_v59, %v4540_v53  ;;  %v4533_v27 = vpop.f32.mrb[54].mxu1 }
 0x97a   :  { %v5118_v42 = vpop.f32.mrb[55].mxu1 }
 0x97b   :  { %v4544_v22 = vmul.f32 %v4543_v7, %v4542_v38 }
 0x97d   :  { %5120 = vmatpush3.msk.msra.mxu0 %vm4549_vm8, %v4544_v22 }
 0x97e   :  { %5122 = vmatmul.mubr.msk.f32.vlgmr.msra.gmra.mrb[56].mxu0 %vm65_vm0, %v4545_v48 }
 0x9fb   :  { %v4332_v16 = vpop.xlane.xlu0 %4331 }
 0x9fc   :  { %v4333_v29 = vsub.f32 %v4315_v15, %v4332_v16 }
 0x9fe   :  { %v4334_v54 = vmul.f32 1.442695, %v4333_v29 }
 0x9ff   :  { %v4319_v14 = vpop.xlane.xlu0 %4318 }
 0xa00   :  { %5314 = vpow2.f32 %v4334_v54  ;;  %v4320_v26 = vsub.f32 %v4315_v15, %v4319_v14 }
 0xa02   :  { %v4321_v17 = vmul.f32 1.442695, %v4320_v26 }
 0xa04   :  { %5316 = vpow2.f32 %v4321_v17 }
 0xa0a   :  { %v5315_v8 = vpop.eup %5314 }
 0xa0b   :  { %4337 = vrot.lane.b32.xlu1 %v5315_v8, %s5401_s4 }
 0xa0e   :  { %v5317_v23 = vpop.eup %5316 }
 0xa0f   :  { %v4323_v45 = vsel %vm4316_vm7, %v5317_v23, 0.0 }
 0xa51   :  { %v4619_v44 = vpop.f32.mrb[56].mxu0 }
 0xa52   :  { %5127 = vmatmul.mubr.msk.f32.vlgmr.msra.gmra.mrb[56].mxu1 %vm65_vm0, %v4619_v44  ;;  %v5123_v57 = vpop.f32.mrb[57].mxu0 }
 0xa7d   :  { %v4338_v47 = vpop.permute.xlu1 %4337 }
 0xa7e   :  { %v4341_v60 = vsel %vm4340_vm9, %v4338_v47, 0.0 }
 0xa7f   :  { %4342 = vadd.xlane.f32.xlu0 %v4341_v60 }
 0xa83   :  { %4324 = vadd.xlane.f32.xlu0 %v4323_v45 }
 0xb0c   :  { %v4343_v51 = vpop.xlane.xlu0 %4342 }
 0xb10   :  { %v4325_v49 = vpop.xlane.xlu0 %4324 }
 0xb11   :  { %5318 = vrcp.f32 %v4325_v49 }
 0xb1b   :  { %v5319_v31 = vpop.eup %5318 }
 0xb1c   :  { %v4327_v5 = vmul.f32 %v5319_v31, %v5317_v23 }
 0xb1e   :  { %4328 = vst.msk [vmem:[%s6556_s10] sm:$0x7] %vm4316_vm7, %v4327_v5 }
 0xb25   :  { %v4703_v20 = vpop.f32.mrb[56].mxu1 }
 0xb26   :  { %v4704_v34 = vadd.f32 %v4812_v6, %v4703_v20  ;;  %v5128_v21 = vpop.f32.mrb[57].mxu1 }
 0xb28   :  { %v4708_v10 = vsel %vm4707_vm10, %v4704_v34, -inf }
 0xb29   :  { %4709 = vmax.xlane.f32.xlu1 %v4708_v10 }
 0xbb6   :  { %v4710_v30 = vpop.xlane.xlu1 %4709 }
 0xbb7   :  { %v4711_v9 = vsub.f32 %v4704_v34, %v4710_v30 }
 0xbb9   :  { %v4712_v11 = vmul.f32 1.442695, %v4711_v9 }
 0xbbb   :  { %5320 = vpow2.f32 %v4712_v11 }
 0xbbc   :  { %5322 = vrcp.f32 %v4343_v51 }
 0xbc5   :  { %v5321_v41 = vpop.eup %5320 }
 0xbc6   :  { %v4714_v32 = vsel %vm4707_vm10, %v5321_v41, 0.0  ;;  %v5323_v33 = vpop.eup %5322 }
 0xbc7   :  { %4715 = vadd.xlane.f32.xlu0 %v4714_v32  ;;  %v4345_v39 = vmul.f32 %v5323_v33, %v5315_v8 }
 0xbc8   :  { %5337 = shalt.err (!%p5334_p4)
}
 0xbc9   :  { %s5338_s11 = scalar_lea.hbm %s6554_s8, 2048 }
 0xbca   :  { %p5339_p5 = scmp.ne.s32.totalorder %s6554_s8, %s5338_s11  ;;  %p5342_p6 = scmp.lt.u32.totalorder %s5338_s11, %s6554_s8 }
 0xbcc   :  { %p5344_p7 = pnand %p5342_p6, %p5339_p5 }
 0xbce   :  { %5347 = shalt.err (!%p5344_p7)
}
 0xbcf   :  { %s5403_s15 = smov 128   ;;  %s5404_s16 = smov 8  }
 0xbd0   :  { %4741 = dma.vmem_to_hbm [thread:$0]  %s4736_s28, 2048, %s6554_s8, [#allocation5], %s5403_s15, %s5403_s15, %s5404_s16  }
 0xbd1   :  { %s5405_s19 = smov [#allocation6]  }
 0xbd2   :  { %s4747_s20 = sshll.u32 %s5405_s19, 4  ;;  %s4748_s20 = int_to_ptr.vmem [resolvable:$true] %s4747_s20 }
 0xbd3   :  { %s5348_s2 = scalar_lea.vmem %s4748_s20, 3072  ;;  %p5353_p9 = scmp.lt.s32.totalorder %s4748_s20, %s4748_s20 }
 0xbd4   :  { %p5349_p8 = scmp.ne.s32.totalorder %s4748_s20, %s5348_s2  ;;  %p5354_p10 = scmp.lt.s32.totalorder %s5348_s2, %s5348_s2 }
 0xbd6   :  { %p5355_p11 = por %p5354_p10, %p5353_p9 }
 0xbd8   :  { %p5356_p12 = pnand %p5355_p11, %p5349_p8 }
 0xbdd   :  { %4347 = vrot.lane.b32.xlu0 %v4345_v39, %s5401_s4 }
 0xbde   :  { %5359 = shalt.err (!%p5356_p12)
}
 0xbdf   :  { %s5360_s23 = scalar_lea.hbm %s6555_s9, 3072 }
 0xbe0   :  { %p5361_p13 = scmp.ne.s32.totalorder %s6555_s9, %s5360_s23  ;;  %p5364_p0 = scmp.lt.u32.totalorder %s5360_s23, %s6555_s9 }
 0xbe2   :  { %p5366_p1 = pnand %p5364_p0, %p5361_p13 }
 0xbe4   :  { %5369 = shalt.err (!%p5366_p1)
}
 0xbe5   :  { %4753 = dma.vmem_to_hbm [thread:$0]  %s4748_s20, 3072, %s6555_s9, [#allocation5], %s5403_s15, %s5403_s15, %s5404_s16  }
 0xbe6   :  { %s5406_s27 = smov [#allocation2]  }
 0xbe7   :  { %s4726_s28 = sshll.u32 %s5406_s27, 4  ;;  %s4727_s28 = int_to_ptr.vmem [resolvable:$true] %s4726_s28 }
 0xbe8   :  { %s5370_s3 = scalar_lea.vmem %s4727_s28, 32  ;;  %p5375_p3 = scmp.lt.s32.totalorder %s4727_s28, %s4727_s28 }
 0xbe9   :  { %p5371_p2 = scmp.ne.s32.totalorder %s4727_s28, %s5370_s3  ;;  %p5376_p4 = scmp.lt.s32.totalorder %s5370_s3, %s5370_s3 }
 0xbeb   :  { %p5377_p5 = por %p5376_p4, %p5375_p3 }
 0xbed   :  { %p5378_p6 = pnand %p5377_p5, %p5371_p2 }
 0xc54   :  { %v4716_v37 = vpop.xlane.xlu0 %4715 }
 0xc55   :  { %5324 = vrcp.f32 %v4716_v37 }
 0xc58   :  { %v4348_v55 = vpop.permute.xlu0 %4347 }
 0xc59   :  { %4805 = vst.msk [vmem:[%s6556_s10 + $0x1] sm:$0x38] %vm4340_vm9, %v4348_v55 }
 0xc5f   :  { %v5325_v3 = vpop.eup %5324 }
 0xc60   :  { %v4718_v13 = vmul.f32 %v5325_v3, %v5321_v41 }
 0xc62   :  { %4719 = vst.msk [vmem:[#allocation2] sm:$0x3] %vm4707_vm10, %v4718_v13 }
 0xc63   :  { %5381 = shalt.err (!%p5378_p6)
}
 0xc64   :  { %s5382_s30 = scalar_lea.hbm %s6553_s7, 32 }
 0xc65   :  { %p5383_p7 = scmp.ne.s32.totalorder %s6553_s7, %s5382_s30  ;;  %p5386_p8 = scmp.lt.u32.totalorder %s5382_s30, %s6553_s7 }
 0xc67   :  { %p5388_p9 = pnand %p5386_p8, %p5383_p7 }
 0xc69   :  { %5391 = shalt.err (!%p5388_p9)
}
 0xc6a   :  { %4729 = dma.vmem_to_hbm [thread:$0]  %s4727_s28, 32, %s6553_s7, [#allocation3]  }
 0xc6b   :  { %5392 = dma.done.wait [#allocation3], 32  }
 0xc6c   :  { %5393 = vsyncadd [#allocation3], 4294967264 }
 0xc6d   :  { %5394 = dma.done.wait [#allocation5], 5120  }
 0xc6e   :  { %5395 = vsyncadd [#allocation5], 4294962176 }
 0xc6f   :  { %4767 = vsyncpa [#allocation3], 1 }
 0xc70   :  { %4768 = vsyncpa [#allocation5], 1 }

// kernel: _sfta_forward.1
= control target key start
LH: loop header
LB: loop body
LE: loop exit
PB: predicated region body
PF: predicated region fallthrough
CT: control target
= control target key end

     0   :  { %13 = vsyncpa [#allocation3], 0  ;;  %vm43_vm0 = vcmask 48128   ;;  %s6086_s0 = inlined_call_operand.vmem [shape: f32[4,32,6], index: 0, kind: input, shape index: {}]   ;;  %s6087_s1 = inlined_call_operand.vmem [shape: f32[4,6,32], index: 1, kind: input, shape index: {}]   ;;  %s6088_s2 = inlined_call_operand.vmem [shape: f32[4,32,6], index: 2, kind: input, shape index: {}]   ;;  %s6089_s3 = inlined_call_operand.vmem [shape: f32[1,2], index: 3, kind: input, shape index: {}]   ;;  %s6090_s4 = inlined_call_operand.hbm [shape: f32[2,2], index: 4, kind: output, shape index: {0}]   ;;  %s6091_s5 = inlined_call_operand.hbm [shape: f32[4,32,32], index: 5, kind: output, shape index: {1}]   ;;  %s6092_s6 = inlined_call_operand.hbm [shape: f32[6,32,32], index: 6, kind: output, shape index: {2}]   ;;  %s6093_s7 = inlined_call_operand.vmem [shape: f32[2,3,3], index: 7, kind: output, shape index: {3}]  }
   0x1   :  { %v23_v0 = vld [vmem:[%s6086_s0] sm:$0xff]  ;;  %v24_v1 = vld [vmem:[%s6086_s0 + $0x8] sm:$0xff]  ;;  %vm5269_vm1 = vmpackc.low %vm43_vm0, %vm43_vm0 }
   0x2   :  { %v27_v2 = vld [vmem:[%s6086_s0 + $0x20] sm:$0xff]  ;;  %v4768_v3 = vpack.c.bf16 %v24_v1, %v23_v0  ;;  %v28_v5 = vld [vmem:[%s6086_s0 + $0x28] sm:$0xff]  ;;  %v25_v6 = vld [vmem:[%s6086_s0 + $0x10] sm:$0xff]  ;;  %4434 = vmatprep.mubr.msk.f32.mxu0 %vm43_vm0, %v23_v0 }
   0x3   :  { %4448 = vmatprep.mubr.msk.f32.mxu1 %vm43_vm0, %v27_v2  ;;  %v4780_v7 = vpack.c.bf16 %v28_v5, %v27_v2  ;;  %v26_v8 = vld [vmem:[%s6086_s0 + $0x18] sm:$0xff]  ;;  %v29_v9 = vld [vmem:[%s6086_s0 + $0x30] sm:$0xff] }
   0x4   :  { %v30_v10 = vld [vmem:[%s6086_s0 + $0x38] sm:$0xff]  ;;  %4770 = vmatprep.subr.msk.bf16.mxu0 %vm5269_vm1, %v4768_v3  ;;  %v4774_v11 = vpack.c.bf16 %v26_v8, %v25_v6 }
   0x5   :  { %v4786_v12 = vpack.c.bf16 %v30_v10, %v29_v9  ;;  %4782 = vmatprep.subr.msk.bf16.mxu1 %vm5269_vm1, %v4780_v7  ;;  %4773 = vmatpush3.bf16.xpose.msk.msra.mxu0 %vm5269_vm1, %v4768_v3 }
   0x6   :  { %4785 = vmatpush3.bf16.xpose.msk.msra.mxu1 %vm5269_vm1, %v4780_v7  ;;  %4776 = vmatprep.subr.msk.bf16.mxu0 %vm5269_vm1, %v4774_v11 }
   0x7   :  { %14 = vsyncpa [#allocation5], 0  ;;  %4788 = vmatprep.subr.msk.bf16.mxu1 %vm5269_vm1, %v4786_v12  ;;  %v31_v13 = vld [vmem:[%s6086_s0 + $0x40] sm:$0xff]  ;;  %v32_v14 = vld [vmem:[%s6086_s0 + $0x48] sm:$0xff]  ;;  %vm448_vm2 = vcmask 261120   ;;  %vm5209_vm3 = vmmov 0  }
   0x8   :  { %v35_v15 = vld [vmem:[%s6086_s0 + $0x60] sm:$0xff]  ;;  %v36_v16 = vld [vmem:[%s6086_s0 + $0x68] sm:$0xff]  ;;  %v4792_v17 = vpack.c.bf16 %v32_v14, %v31_v13  ;;  %v33_v19 = vld [vmem:[%s6086_s0 + $0x50] sm:$0xff]  ;;  %vm990_vm5 = vcmask 1040384   ;;  %vm992_vm6 = vcmask 1041408   ;;  %vm994_vm7 = vcmask 1042432  }
   0x9   :  { %v4804_v18 = vpack.c.bf16 %v36_v16, %v35_v15  ;;  %v34_v20 = vld [vmem:[%s6086_s0 + $0x58] sm:$0xff]  ;;  %v37_v21 = vld [vmem:[%s6086_s0 + $0x70] sm:$0xff]  ;;  %vm5516_vm4 = vmpackc.low %vm448_vm2, %vm448_vm2  ;;  %vm1041_vm8 = vcmask 1043456   ;;  %vm1028_vm9 = vcmask 31744   ;;  %s5212_s23 = smov 126   ;;  %vm2985_vm10 = vcmask 18432  }
   0xa   :  { %v38_v22 = vld [vmem:[%s6086_s0 + $0x78] sm:$0xff]  ;;  %v4798_v23 = vpack.c.bf16 %v34_v20, %v33_v19  ;;  %vm4035_vm11 = vcmask 9216  }
   0xb   :  { %v4810_v24 = vpack.c.bf16 %v38_v22, %v37_v21 }
   0xd   :  { %4779 = vmatpush3.bf16.xpose.msk.msra.mxu0 %vm5269_vm1, %v4774_v11 }
   0xe   :  { %4791 = vmatpush3.bf16.xpose.msk.msra.mxu1 %vm5269_vm1, %v4786_v12  ;;  %4794 = vmatprep.subr.msk.bf16.mxu0 %vm5269_vm1, %v4792_v17 }
   0xf   :  { %4806 = vmatprep.subr.msk.bf16.mxu1 %vm5269_vm1, %v4804_v18 }
  0x14   :  { %4435 = vmatmul.mubr.msk.f32.vlgmr.msra.gmra.mrb[0].mxu0 %vm43_vm0, %v24_v1 }
  0x15   :  { %4449 = vmatmul.mubr.msk.f32.vlgmr.msra.gmra.mrb[0].mxu1 %vm43_vm0, %v28_v5  ;;  %4797 = vmatpush3.bf16.xpose.msk.msra.mxu0 %vm5269_vm1, %v4792_v17 }
  0x16   :  { %4809 = vmatpush3.bf16.xpose.msk.msra.mxu1 %vm5269_vm1, %v4804_v18  ;;  %4437 = vmatprep.mubr.msk.f32.mxu0 %vm43_vm0, %v25_v6 }
  0x17   :  { %4800 = vmatprep.subr.msk.bf16.mxu0 %vm5269_vm1, %v4798_v23  ;;  %4451 = vmatprep.mubr.msk.f32.mxu1 %vm43_vm0, %v29_v9 }
  0x18   :  { %4438 = vmatmul.mubr.msk.f32.gmra.mrb[2].mxu0 %vm43_vm0, %v26_v8  ;;  %4812 = vmatprep.subr.msk.bf16.mxu1 %vm5269_vm1, %v4810_v24 }
  0x19   :  { %4452 = vmatmul.mubr.msk.f32.gmra.mrb[2].mxu1 %vm43_vm0, %v30_v10  ;;  %4462 = vmatprep.mubr.msk.f32.mxu0 %vm43_vm0, %v31_v13 }
  0x1a   :  { %4476 = vmatprep.mubr.msk.f32.mxu1 %vm43_vm0, %v35_v15 }
  0x1d   :  { %4803 = vmatpush3.bf16.xpose.msk.msra.mxu0 %vm5269_vm1, %v4798_v23 }
  0x1e   :  { %4815 = vmatpush3.bf16.xpose.msk.msra.mxu1 %vm5269_vm1, %v4810_v24 }
  0x24   :  { %4463 = vmatmul.mubr.msk.f32.vlgmr.msra.gmra.mrb[4].mxu0 %vm43_vm0, %v32_v14 }
  0x25   :  { %4477 = vmatmul.mubr.msk.f32.vlgmr.msra.gmra.mrb[4].mxu1 %vm43_vm0, %v36_v16  ;;  %4465 = vmatprep.mubr.msk.f32.mxu0 %vm43_vm0, %v33_v19 }
  0x26   :  { %4479 = vmatprep.mubr.msk.f32.mxu1 %vm43_vm0, %v37_v21 }
  0x28   :  { %4466 = vmatmul.mubr.msk.f32.gmra.mrb[6].mxu0 %vm43_vm0, %v34_v20 }
  0x29   :  { %4480 = vmatmul.mubr.msk.f32.gmra.mrb[6].mxu1 %vm43_vm0, %v38_v22 }
  0xe7   :  { %v4436_v25 = vpop.f32.mrb[0].mxu0 }
  0xe8   :  { %v4450_v26 = vpop.f32.mrb[0].mxu1  ;;  %v122_v27 = vpop.f32.mrb[1].mxu0  ;;  %v5366_v32 = vmul.f32 0.4082483, %v4436_v25 }
  0xe9   :  { %v5360_v28 = vmul.f32 0.4082483, %v4450_v26  ;;  %v5362_v29 = vmul.f32 0.4082483, %v122_v27  ;;  %v219_v30 = vpop.f32.mrb[1].mxu1 }
  0xea   :  { %v5364_v31 = vmul.f32 0.4082483, %v219_v30  ;;  %v452_v42 = vsel %vm448_vm2, %v5366_v32, -inf }
  0xeb   :  { %v464_v33 = vsel %vm448_vm2, %v5360_v28, -inf  ;;  %v449_v34 = vsel %vm448_vm2, %v5362_v29, -inf  ;;  %v4439_v35 = vpop.f32.mrb[2].mxu0 }
  0xec   :  { %465 = vmax.xlane.f32.xlu1 %v464_v33  ;;  %450 = vmax.xlane.f32.xlu0 %v449_v34  ;;  %v132_v36 = vpop.f32.mrb[3].mxu0  ;;  %v4453_v37 = vpop.f32.mrb[2].mxu1  ;;  %v461_v38 = vsel %vm448_vm2, %v5364_v31, -inf  ;;  %v5374_v39 = vmul.f32 0.4082483, %v4439_v35 }
  0xed   :  { %v5376_v40 = vmul.f32 0.4082483, %v132_v36  ;;  %v229_v41 = vpop.f32.mrb[3].mxu1  ;;  %v5380_v43 = vmul.f32 0.4082483, %v4453_v37 }
  0xee   :  { %v458_v44 = vsel %vm448_vm2, %v5374_v39, -inf  ;;  %v5384_v45 = vmul.f32 0.4082483, %v229_v41 }
  0xef   :  { %v455_v46 = vsel %vm448_vm2, %v5376_v40, -inf  ;;  %v470_v47 = vsel %vm448_vm2, %v5380_v43, -inf }
  0xf0   :  { %462 = vmax.xlane.f32.xlu1 %v461_v38  ;;  %453 = vmax.xlane.f32.xlu0 %v452_v42  ;;  %v467_v48 = vsel %vm448_vm2, %v5384_v45, -inf }
  0xf4   :  { %459 = vmax.xlane.f32.xlu1 %v458_v44  ;;  %456 = vmax.xlane.f32.xlu0 %v455_v46 }
  0xf7   :  { %v4464_v49 = vpop.f32.mrb[4].mxu0 }
  0xf8   :  { %471 = vmax.xlane.f32.xlu1 %v470_v47  ;;  %v5392_v50 = vmul.f32 0.4082483, %v4464_v49  ;;  %468 = vmax.xlane.f32.xlu0 %v467_v48  ;;  %v316_v51 = vpop.f32.mrb[5].mxu0  ;;  %v4478_v52 = vpop.f32.mrb[4].mxu1 }
  0xf9   :  { %v5394_v53 = vmul.f32 0.4082483, %v316_v51  ;;  %v5396_v54 = vmul.f32 0.4082483, %v4478_v52  ;;  %v413_v55 = vpop.f32.mrb[5].mxu1 }
  0xfa   :  { %v476_v56 = vsel %vm448_vm2, %v5392_v50, -inf  ;;  %v5400_v57 = vmul.f32 0.4082483, %v413_v55 }
  0xfb   :  { %v473_v58 = vsel %vm448_vm2, %v5394_v53, -inf  ;;  %v4467_v59 = vpop.f32.mrb[6].mxu0  ;;  %v488_v60 = vsel %vm448_vm2, %v5396_v54, -inf }
  0xfc   :  { %477 = vmax.xlane.f32.xlu1 %v476_v56  ;;  %474 = vmax.xlane.f32.xlu0 %v473_v58  ;;  %v326_v61 = vpop.f32.mrb[7].mxu0  ;;  %v4481_v62 = vpop.f32.mrb[6].mxu1  ;;  %v5406_v63 = vmul.f32 0.4082483, %v4467_v59  ;;  %v485_v0 = vsel %vm448_vm2, %v5400_v57, -inf }
  0xfd   :  { %v5410_v1 = vmul.f32 0.4082483, %v326_v61  ;;  %v423_v2 = vpop.f32.mrb[7].mxu1  ;;  %v5412_v3 = vmul.f32 0.4082483, %v4481_v62 }
  0xfe   :  { %v482_v4 = vsel %vm448_vm2, %v5406_v63, -inf  ;;  %v5416_v5 = vmul.f32 0.4082483, %v423_v2 }
  0xff   :  { %v479_v6 = vsel %vm448_vm2, %v5410_v1, -inf  ;;  %v494_v7 = vsel %vm448_vm2, %v5412_v3, -inf }
 0x100   :  { %489 = vmax.xlane.f32.xlu1 %v488_v60  ;;  %486 = vmax.xlane.f32.xlu0 %v485_v0  ;;  %v491_v8 = vsel %vm448_vm2, %v5416_v5, -inf }
 0x104   :  { %483 = vmax.xlane.f32.xlu1 %v482_v4  ;;  %480 = vmax.xlane.f32.xlu0 %v479_v6 }
 0x108   :  { %495 = vmax.xlane.f32.xlu1 %v494_v7  ;;  %492 = vmax.xlane.f32.xlu0 %v491_v8 }
 0x179   :  { %v466_v9 = vpop.xlane.xlu1 %465  ;;  %v451_v10 = vpop.xlane.xlu0 %450 }
 0x17a   :  { %v497_v11 = vsub.f32 %v5362_v29, %v451_v10  ;;  %v502_v13 = vsub.f32 %v5360_v28, %v466_v9 }
 0x17c   :  { %v513_v12 = vmul.f32 1.442695, %v497_v11  ;;  %v523_v20 = vmul.f32 1.442695, %v502_v13 }
 0x17d   :  { %v463_v14 = vpop.xlane.xlu1 %462  ;;  %v454_v15 = vpop.xlane.xlu0 %453 }
 0x17e   :  { %v501_v16 = vsub.f32 %v5364_v31, %v463_v14  ;;  %v498_v17 = vsub.f32 %v5366_v32, %v454_v15  ;;  %4966 = vpow2.f32 %v513_v12 }
 0x180   :  { %v521_v18 = vmul.f32 1.442695, %v501_v16  ;;  %v515_v19 = vmul.f32 1.442695, %v498_v17 }
 0x181   :  { %v460_v21 = vpop.xlane.xlu1 %459  ;;  %v457_v22 = vpop.xlane.xlu0 %456 }
 0x182   :  { %4968 = vpow2.f32 %v521_v18  ;;  %v500_v23 = vsub.f32 %v5374_v39, %v460_v21  ;;  %v499_v24 = vsub.f32 %v5376_v40, %v457_v22 }
 0x183   :  { %4970 = vpow2.f32 %v515_v19 }
 0x184   :  { %v517_v25 = vmul.f32 1.442695, %v499_v24  ;;  %4972 = vpow2.f32 %v523_v20  ;;  %v519_v26 = vmul.f32 1.442695, %v500_v23 }
 0x185   :  { %v472_v27 = vpop.xlane.xlu1 %471  ;;  %v469_v28 = vpop.xlane.xlu0 %468 }
 0x186   :  { %v504_v29 = vsub.f32 %v5380_v43, %v472_v27  ;;  %v503_v30 = vsub.f32 %v5384_v45, %v469_v28  ;;  %4974 = vpow2.f32 %v517_v25  ;;  %v5208_v25 = vmov 0.0|0.0  }
 0x187   :  { %4976 = vpow2.f32 %v519_v26  ;;  %4816 = vmatprep.subr.bf16.mxu0 %v5208_v25  ;;  %4824 = vmatprep.subr.bf16.mxu1 %v5208_v25  ;;  %v5210_v26 = vmov 0.0  }
 0x188   :  { %v525_v31 = vmul.f32 1.442695, %v503_v30  ;;  %v5432_v32 = vpop.eup %4966  ;;  %v527_v33 = vmul.f32 1.442695, %v504_v29  ;;  %4490 = vmatprep.mubr.msk.f32.mxu0 %vm5209_vm3, %v5210_v26  ;;  %4501 = vmatprep.mubr.msk.f32.mxu1 %vm5209_vm3, %v5210_v26 }
 0x189   :  { %v478_v34 = vpop.xlane.xlu1 %477  ;;  %v475_v35 = vpop.xlane.xlu0 %474  ;;  %v545_v38 = vsel %vm448_vm2, %v5432_v32, 0.0 }
 0x18a   :  { %v506_v36 = vsub.f32 %v5392_v50, %v478_v34  ;;  %v505_v37 = vsub.f32 %v5394_v53, %v475_v35  ;;  %4978 = vpow2.f32 %v525_v31  ;;  %546 = vadd.xlane.f32.xlu0 %v545_v38 }
 0x18b   :  { %4980 = vpow2.f32 %v527_v33 }
 0x18c   :  { %v5438_v39 = vpop.eup %4968  ;;  %v529_v40 = vmul.f32 1.442695, %v505_v37  ;;  %v531_v42 = vmul.f32 1.442695, %v506_v36 }
 0x18d   :  { %v5440_v41 = vpop.eup %4970  ;;  %v490_v43 = vpop.xlane.xlu1 %489  ;;  %v557_v45 = vsel %vm448_vm2, %v5438_v39, 0.0 }
 0x18e   :  { %v487_v44 = vpop.xlane.xlu0 %486  ;;  %v510_v46 = vsub.f32 %v5396_v54, %v490_v43  ;;  %v548_v48 = vsel %vm448_vm2, %v5440_v41, 0.0  ;;  %v5448_v49 = vpop.eup %4972  ;;  %4982 = vpow2.f32 %v529_v40  ;;  %558 = vadd.xlane.f32.xlu0 %v557_v45  ;;  %v4223_v45 = vld [vmem:[%s6088_s2 + $0x40] sm:$0xff] }
 0x18f   :  { %v509_v47 = vsub.f32 %v5400_v57, %v487_v44  ;;  %549 = vadd.xlane.f32.xlu1 %v548_v48  ;;  %4984 = vpow2.f32 %v531_v42  ;;  %v560_v57 = vsel %vm448_vm2, %v5448_v49, 0.0 }
 0x190   :  { %v5450_v51 = vpop.eup %4974  ;;  %v539_v52 = vmul.f32 1.442695, %v510_v46 }
 0x191   :  { %v537_v50 = vmul.f32 1.442695, %v509_v47  ;;  %v484_v53 = vpop.xlane.xlu1 %483  ;;  %v551_v58 = vsel %vm448_vm2, %v5450_v51, 0.0  ;;  %v5458_v59 = vpop.eup %4976 }
 0x192   :  { %v481_v55 = vpop.xlane.xlu0 %480  ;;  %v508_v56 = vsub.f32 %v5406_v63, %v484_v53  ;;  %552 = vadd.xlane.f32.xlu0 %v551_v58  ;;  %v554_v4 = vsel %vm448_vm2, %v5458_v59, 0.0 }
 0x193   :  { %v507_v54 = vsub.f32 %v5410_v1, %v481_v55  ;;  %4986 = vpow2.f32 %v537_v50  ;;  %561 = vadd.xlane.f32.xlu1 %v560_v57 }
 0x194   :  { %v5460_v61 = vpop.eup %4978  ;;  %4988 = vpow2.f32 %v539_v52  ;;  %v535_v62 = vmul.f32 1.442695, %v508_v56 }
 0x195   :  { %v533_v60 = vmul.f32 1.442695, %v507_v54  ;;  %v496_v0 = vpop.xlane.xlu1 %495  ;;  %v563_v6 = vsel %vm448_vm2, %v5460_v61, 0.0  ;;  %v5468_v7 = vpop.eup %4980 }
 0x196   :  { %v493_v63 = vpop.xlane.xlu0 %492  ;;  %v512_v1 = vsub.f32 %v5412_v3, %v496_v0  ;;  %564 = vadd.xlane.f32.xlu0 %v563_v6  ;;  %v566_v3 = vsel %vm448_vm2, %v5468_v7, 0.0 }
 0x197   :  { %v511_v2 = vsub.f32 %v5416_v5, %v493_v63  ;;  %4990 = vpow2.f32 %v533_v60  ;;  %555 = vadd.xlane.f32.xlu1 %v554_v4 }
 0x198   :  { %v5470_v9 = vpop.eup %4982  ;;  %4992 = vpow2.f32 %v535_v62  ;;  %v543_v10 = vmul.f32 1.442695, %v512_v1 }
 0x199   :  { %v541_v8 = vmul.f32 1.442695, %v511_v2  ;;  %v569_v5 = vsel %vm448_vm2, %v5470_v9, 0.0  ;;  %v5476_v11 = vpop.eup %4984 }
 0x19a   :  { %570 = vadd.xlane.f32.xlu0 %v569_v5  ;;  %v572_v13 = vsel %vm448_vm2, %v5476_v11, 0.0 }
 0x19b   :  { %4994 = vpow2.f32 %v541_v8  ;;  %567 = vadd.xlane.f32.xlu1 %v566_v3 }
 0x19c   :  { %4996 = vpow2.f32 %v543_v10 }
 0x19d   :  { %v5478_v12 = vpop.eup %4986 }
 0x19e   :  { %v581_v14 = vsel %vm448_vm2, %v5478_v12, 0.0  ;;  %v5484_v15 = vpop.eup %4988 }
 0x19f   :  { %573 = vadd.xlane.f32.xlu1 %v572_v13  ;;  %582 = vadd.xlane.f32.xlu0 %v581_v14  ;;  %v584_v17 = vsel %vm448_vm2, %v5484_v15, 0.0 }
 0x1a1   :  { %v5486_v16 = vpop.eup %4990 }
 0x1a2   :  { %v575_v18 = vsel %vm448_vm2, %v5486_v16, 0.0  ;;  %v5492_v19 = vpop.eup %4992 }
 0x1a3   :  { %585 = vadd.xlane.f32.xlu1 %v584_v17  ;;  %576 = vadd.xlane.f32.xlu0 %v575_v18  ;;  %v578_v21 = vsel %vm448_vm2, %v5492_v19, 0.0 }
 0x1a5   :  { %v5494_v20 = vpop.eup %4994 }
 0x1a6   :  { %v587_v22 = vsel %vm448_vm2, %v5494_v20, 0.0  ;;  %v5500_v23 = vpop.eup %4996 }
 0x1a7   :  { %579 = vadd.xlane.f32.xlu1 %v578_v21  ;;  %588 = vadd.xlane.f32.xlu0 %v587_v22  ;;  %v590_v24 = vsel %vm448_vm2, %v5500_v23, 0.0 }
 0x1ab   :  { %591 = vadd.xlane.f32.xlu1 %v590_v24 }
 0x217   :  { %v547_v27 = vpop.xlane.xlu0 %546 }
 0x218   :  { %4998 = vrcp.f32 %v547_v27 }
 0x21b   :  { %v559_v29 = vpop.xlane.xlu0 %558 }
 0x21c   :  { %v550_v28 = vpop.xlane.xlu1 %549 }
 0x21d   :  { %5000 = vrcp.f32 %v550_v28 }
 0x21e   :  { %5002 = vrcp.f32 %v559_v29 }
 0x21f   :  { %v553_v31 = vpop.xlane.xlu0 %552 }
 0x220   :  { %v562_v30 = vpop.xlane.xlu1 %561 }
 0x221   :  { %5004 = vrcp.f32 %v562_v30 }
 0x222   :  { %5006 = vrcp.f32 %v553_v31  ;;  %v4999_v33 = vpop.eup %4998 }
 0x223   :  { %v609_v34 = vmul.f32 %v4999_v33, %v5432_v32  ;;  %v565_v36 = vpop.xlane.xlu0 %564 }
 0x224   :  { %v556_v35 = vpop.xlane.xlu1 %555 }
 0x225   :  { %5008 = vrcp.f32 %v556_v35  ;;  %625 = vst.msk [vmem:[#allocation4] sm:$0xff] %vm448_vm2, %v609_v34 }
 0x226   :  { %5010 = vrcp.f32 %v565_v36 }
 0x227   :  { %v5001_v37 = vpop.eup %5000  ;;  %v571_v43 = vpop.xlane.xlu0 %570 }
 0x228   :  { %v5003_v38 = vpop.eup %5002  ;;  %v610_v40 = vmul.f32 %v5001_v37, %v5440_v41  ;;  %v568_v42 = vpop.xlane.xlu1 %567 }
 0x229   :  { %v613_v44 = vmul.f32 %v5003_v38, %v5438_v39  ;;  %5012 = vrcp.f32 %v568_v42 }
 0x22a   :  { %626 = vst.msk [vmem:[#allocation4 + $0x8] sm:$0xff] %vm448_vm2, %v610_v40  ;;  %5014 = vrcp.f32 %v571_v43  ;;  %v4817_v32 = vpack.c.bf16 %v610_v40, %v609_v34 }
 0x22b   :  { %v5005_v46 = vpop.eup %5004  ;;  %629 = vst.msk [vmem:[#allocation4 + $0x20] sm:$0xff] %vm448_vm2, %v613_v44 }
 0x22c   :  { %v5007_v47 = vpop.eup %5006  ;;  %v614_v41 = vmul.f32 %v5005_v46, %v5448_v49  ;;  %v574_v48 = vpop.xlane.xlu1 %573  ;;  %4819 = vmatpush3.bf16.xpose.msk.msra.mxu0 %vm5516_vm4, %v4817_v32 }
 0x22d   :  { %v583_v39 = vpop.xlane.xlu0 %582  ;;  %v611_v50 = vmul.f32 %v5007_v47, %v5450_v51  ;;  %5016 = vrcp.f32 %v574_v48  ;;  %4820 = vmatprep.subr.bf16.mxu0 %v5208_v25 }
 0x22e   :  { %630 = vst.msk [vmem:[#allocation4 + $0x28] sm:$0xff] %vm448_vm2, %v614_v41  ;;  %5018 = vrcp.f32 %v583_v39  ;;  %v4825_v52 = vpack.c.bf16 %v614_v41, %v613_v44 }
 0x22f   :  { %v5009_v53 = vpop.eup %5008  ;;  %627 = vst.msk [vmem:[#allocation4 + $0x10] sm:$0xff] %vm448_vm2, %v611_v50 }
 0x230   :  { %v5011_v55 = vpop.eup %5010  ;;  %v612_v49 = vmul.f32 %v5009_v53, %v5458_v59  ;;  %v586_v56 = vpop.xlane.xlu1 %585  ;;  %4827 = vmatpush3.bf16.xpose.msk.msra.mxu1 %vm5516_vm4, %v4825_v52 }
 0x231   :  { %v577_v54 = vpop.xlane.xlu0 %576  ;;  %v615_v51 = vmul.f32 %v5011_v55, %v5460_v61  ;;  %5020 = vrcp.f32 %v586_v56  ;;  %4828 = vmatprep.subr.bf16.mxu1 %v5208_v25 }
 0x232   :  { %628 = vst.msk [vmem:[#allocation4 + $0x18] sm:$0xff] %vm448_vm2, %v612_v49  ;;  %5022 = vrcp.f32 %v577_v54  ;;  %v4821_v57 = vpack.c.bf16 %v612_v49, %v611_v50 }
 0x233   :  { %v5013_v58 = vpop.eup %5012  ;;  %631 = vst.msk [vmem:[#allocation4 + $0x30] sm:$0xff] %vm448_vm2, %v615_v51 }
 0x234   :  { %v5015_v60 = vpop.eup %5014  ;;  %v616_v59 = vmul.f32 %v5013_v58, %v5468_v7  ;;  %v580_v62 = vpop.xlane.xlu1 %579  ;;  %4823 = vmatpush3.bf16.xpose.msk.msra.mxu0 %vm5516_vm4, %v4821_v57  ;;  %v39_v7 = vld [vmem:[%s6087_s1] sm:$0x3f] }
 0x235   :  { %v589_v0 = vpop.xlane.xlu0 %588  ;;  %v617_v61 = vmul.f32 %v5015_v60, %v5470_v9  ;;  %5024 = vrcp.f32 %v580_v62  ;;  %4832 = vmatprep.subr.bf16.mxu0 %v5208_v25 }
 0x236   :  { %632 = vst.msk [vmem:[#allocation4 + $0x38] sm:$0xff] %vm448_vm2, %v616_v59  ;;  %5026 = vrcp.f32 %v589_v0  ;;  %v4829_v63 = vpack.c.bf16 %v616_v59, %v615_v51 }
 0x237   :  { %v5017_v1 = vpop.eup %5016  ;;  %633 = vst.msk [vmem:[#allocation4 + $0x40] sm:$0xff] %vm448_vm2, %v617_v61 }
 0x238   :  { %v5019_v2 = vpop.eup %5018  ;;  %v618_v4 = vmul.f32 %v5017_v1, %v5476_v11  ;;  %v592_v6 = vpop.xlane.xlu1 %591  ;;  %4831 = vmatpush3.bf16.xpose.msk.msra.mxu1 %vm5516_vm4, %v4829_v63  ;;  %v40_v11 = vld [vmem:[%s6087_s1 + $0x8] sm:$0x3f] }
 0x239   :  { %v621_v8 = vmul.f32 %v5019_v2, %v5478_v12  ;;  %5028 = vrcp.f32 %v592_v6  ;;  %4840 = vmatprep.subr.bf16.mxu1 %v5208_v25 }
 0x23a   :  { %634 = vst.msk [vmem:[#allocation4 + $0x48] sm:$0xff] %vm448_vm2, %v618_v4  ;;  %v4833_v9 = vpack.c.bf16 %v618_v4, %v617_v61 }
 0x23b   :  { %v5021_v10 = vpop.eup %5020  ;;  %637 = vst.msk [vmem:[#allocation4 + $0x60] sm:$0xff] %vm448_vm2, %v621_v8  ;;  %4491 = vmatmul.mubr.msk.f32.vlgmr.msra.gmra.mrb[8].mxu0 %vm448_vm2, %v39_v7 }
 0x23c   :  { %v5023_v3 = vpop.eup %5022  ;;  %v622_v5 = vmul.f32 %v5021_v10, %v5484_v15  ;;  %4835 = vmatpush3.bf16.xpose.msk.msra.mxu0 %vm5516_vm4, %v4833_v9  ;;  %4512 = vmatprep.mubr.msk.f32.mxu0 %vm5209_vm3, %v5210_v26 }
 0x23d   :  { %v619_v12 = vmul.f32 %v5023_v3, %v5486_v16  ;;  %4836 = vmatprep.subr.bf16.mxu0 %v5208_v25 }
 0x23e   :  { %638 = vst.msk [vmem:[#allocation4 + $0x68] sm:$0xff] %vm448_vm2, %v622_v5  ;;  %v4841_v13 = vpack.c.bf16 %v622_v5, %v621_v8 }
 0x23f   :  { %v5025_v14 = vpop.eup %5024  ;;  %635 = vst.msk [vmem:[#allocation4 + $0x50] sm:$0xff] %vm448_vm2, %v619_v12  ;;  %4502 = vmatmul.mubr.msk.f32.vlgmr.msra.gmra.mrb[8].mxu1 %vm448_vm2, %v40_v11 }
 0x240   :  { %v5027_v15 = vpop.eup %5026  ;;  %v620_v17 = vmul.f32 %v5025_v14, %v5492_v19  ;;  %4843 = vmatpush3.bf16.xpose.msk.msra.mxu1 %vm5516_vm4, %v4841_v13  ;;  %4523 = vmatprep.mubr.msk.f32.mxu1 %vm5209_vm3, %v5210_v26 }
 0x241   :  { %v623_v16 = vmul.f32 %v5027_v15, %v5494_v20  ;;  %4844 = vmatprep.subr.bf16.mxu1 %v5208_v25  ;;  %v41_v20 = vld [vmem:[%s6087_s1 + $0x10] sm:$0x3f] }
 0x242   :  { %636 = vst.msk [vmem:[#allocation4 + $0x58] sm:$0xff] %vm448_vm2, %v620_v17  ;;  %v4837_v18 = vpack.c.bf16 %v620_v17, %v619_v12 }
 0x243   :  { %v5029_v21 = vpop.eup %5028  ;;  %639 = vst.msk [vmem:[#allocation4 + $0x70] sm:$0xff] %vm448_vm2, %v623_v16 }
 0x244   :  { %v624_v22 = vmul.f32 %v5029_v21, %v5500_v23  ;;  %4839 = vmatpush3.bf16.xpose.msk.msra.mxu0 %vm5516_vm4, %v4837_v18  ;;  %v42_v23 = vld [vmem:[%s6087_s1 + $0x18] sm:$0x3f] }
 0x246   :  { %640 = vst.msk [vmem:[#allocation4 + $0x78] sm:$0xff] %vm448_vm2, %v624_v22  ;;  %v4845_v19 = vpack.c.bf16 %v624_v22, %v623_v16 }
 0x248   :  { %4847 = vmatpush3.bf16.xpose.msk.msra.mxu1 %vm5516_vm4, %v4845_v19 }
 0x249   :  { %4848 = vmatprep.subr.bf16.mxu1 %v5208_v25 }
 0x24b   :  { %4513 = vmatmul.mubr.msk.f32.vlgmr.msra.gmra.mrb[10].mxu0 %vm448_vm2, %v41_v20 }
 0x24f   :  { %4524 = vmatmul.mubr.msk.f32.vlgmr.msra.gmra.mrb[10].mxu1 %vm448_vm2, %v42_v23 }
 0x250   :  { %4542 = vmatprep.mubr.msk.f32.mxu1 %vm5209_vm3, %v5210_v26 }
 0x30e   :  { %v722_v24 = vpop.f32.mrb[8].mxu0 }
 0x30f   :  { %v4492_v27 = vpop.f32.mrb[9].mxu0  ;;  %v1267_v28 = vrot.slane %v722_v24, 1  ;;  %v1545_v29 = vrot.slane %v722_v24, 2  ;;  %v1823_v30 = vrot.slane %v722_v24, 3  ;;  %v2101_v31 = vrot.slane %v722_v24, 4 }
 0x310   :  { %v2381_v33 = vrot.slane %v722_v24, 5 }
 0x312   :  { %v807_v34 = vpop.f32.mrb[8].mxu1 }
 0x313   :  { %v982_v35 = vrot.slane %v807_v34, 7  ;;  %v1547_v36 = vrot.slane %v807_v34, 1  ;;  %v1825_v37 = vrot.slane %v807_v34, 2  ;;  %v2103_v38 = vrot.slane %v807_v34, 3  ;;  %v4503_v40 = vpop.f32.mrb[9].mxu1 }
 0x314   :  { %v2383_v42 = vrot.slane %v807_v34, 4  ;;  %v1273_v43 = vsel %vm990_vm5, %v1267_v28, %v807_v34 }
 0x315   :  { %v991_v44 = vsel %vm990_vm5, %v722_v24, %v982_v35  ;;  %v1829_v32 = vsel %vm990_vm5, %v1823_v30, %v1825_v37  ;;  %v1551_v46 = vsel %vm990_vm5, %v1545_v29, %v1547_v36  ;;  %v2109_v47 = vsel %vm990_vm5, %v2101_v31, %v2103_v38 }
 0x316   :  { %v2389_v41 = vsel %vm990_vm5, %v2381_v33, %v2383_v42 }
 0x31e   :  { %v892_v48 = vpop.f32.mrb[10].mxu0 }
 0x31f   :  { %v4514_v39 = vpop.f32.mrb[11].mxu0  ;;  %v1269_v50 = vrot.slane %v892_v48, 7  ;;  %v985_v52 = vrot.slane %v892_v48, 6  ;;  %v1827_v53 = vrot.slane %v892_v48, 1  ;;  %v1552_v55 = vsel %vm992_vm6, %v1551_v46, %v892_v48 }
 0x320   :  { %v2385_v49 = vrot.slane %v892_v48, 3  ;;  %v2105_v56 = vrot.slane %v892_v48, 2 }
 0x321   :  { %v1274_v54 = vsel %vm992_vm6, %v1273_v43, %v1269_v50  ;;  %v993_v51 = vsel %vm992_vm6, %v991_v44, %v985_v52  ;;  %v1830_v57 = vsel %vm992_vm6, %v1829_v32, %v1827_v53 }
 0x322   :  { %v977_v58 = vpop.f32.mrb[10].mxu1  ;;  %v2390_v60 = vsel %vm992_vm6, %v2389_v41, %v2385_v49  ;;  %v2110_v59 = vsel %vm992_vm6, %v2109_v47, %v2105_v56 }
 0x323   :  { %v4525_v62 = vpop.f32.mrb[11].mxu1  ;;  %v1271_v0 = vrot.slane %v977_v58, 6  ;;  %v988_v61 = vrot.slane %v977_v58, 5  ;;  %v5606_v63 = vsel %vm994_vm7, %v1830_v57, %v977_v58  ;;  %v1549_v1 = vrot.slane %v977_v58, 7 }
 0x324   :  { %v2387_v2 = vrot.slane %v977_v58, 2  ;;  %v2107_v4 = vrot.slane %v977_v58, 1 }
 0x325   :  { %v5609_v6 = vsel %vm994_vm7, %v1274_v54, %v1271_v0  ;;  %v5612_v7 = vsel %vm994_vm7, %v993_v51, %v988_v61  ;;  %v5615_v8 = vsel %vm994_vm7, %v1552_v55, %v1549_v1 }
 0x326   :  { %1276 = vxpose.xlu1.b32.start.end [1/1] (short) (narrow) %v5609_v6, 32  ;;  %996 = vxpose.xlu0.b32.start.end [1/1] (short) (narrow) %v5612_v7, 32  ;;  %v5620_v9 = vsel %vm994_vm7, %v2390_v60, %v2387_v2  ;;  %v5623_v10 = vsel %vm994_vm7, %v2110_v59, %v2107_v4 }
 0x327   :  { %4526 = vmatprep.subr.msk.mxu0 %vm1041_vm8, %v5612_v7 }
 0x328   :  { %4527 = vmatpush3.msk.msra.mxu0 %vm1041_vm8, %v5612_v7 }
 0x329   :  { %4545 = vmatprep.subr.msk.mxu0 %vm1041_vm8, %v5609_v6 }
 0x3a6   :  { %v1012_v3 = vpop.trf.xlu0  ;;  %v1292_v5 = vpop.trf.xlu1 }
 0x3a7   :  { %4528 = vmatprep.mubr.msk.f32.mxu0 %vm1028_vm9, %v1012_v3 }
 0x3aa   :  { %v1013_v11 = vpop.trf.xlu0  ;;  %v1293_v12 = vpop.trf.xlu1 }
 0x3ab   :  { %4529 = vmatmul.mubr.msk.f32.vlgmr.msra.gmra.mrb[12].mxu0 %vm1028_vm9, %v1013_v11 }
 0x3ac   :  { %4546 = vmatpush3.msk.msra.mxu0 %vm1041_vm8, %v5609_v6 }
 0x3ad   :  { %4856 = vmatprep.subr.bf16.mxu0 %v5208_v25 }
 0x3ae   :  { %v1014_v13 = vpop.trf.xlu0  ;;  %v1294_v15 = vpop.trf.xlu1 }
 0x3af   :  { %4531 = vmatprep.mubr.msk.f32.mxu0 %vm1028_vm9, %v1014_v13 }
 0x3b2   :  { %v1015_v14 = vpop.trf.xlu0  ;;  %v1295_v17 = vpop.trf.xlu1 }
 0x3b3   :  { %4532 = vmatmul.mubr.msk.f32.gmra.mrb[14].mxu0 %vm1028_vm9, %v1015_v14 }
 0x3b4   :  { %4547 = vmatprep.mubr.msk.f32.mxu0 %vm1028_vm9, %v1292_v5 }
 0x3b7   :  { %4548 = vmatmul.mubr.msk.f32.vlgmr.msra.gmra.mrb[16].mxu0 %vm1028_vm9, %v1293_v12 }
 0x3b8   :  { %4550 = vmatprep.mubr.msk.f32.mxu0 %vm1028_vm9, %v1294_v15 }
 0x3bb   :  { %4551 = vmatmul.mubr.msk.f32.gmra.mrb[18].mxu0 %vm1028_vm9, %v1295_v17 }
 0x3bc   :  { %4561 = vmatprep.mubr.msk.f32.mxu0 %vm5209_vm3, %v5210_v26 }
 0x47e   :  { %v4530_v16 = vpop.f32.mrb[12].mxu0 }
 0x47f   :  { %v1111_v18 = vpop.f32.mrb[13].mxu0  ;;  %v1131_v27 = vmul.f32 0.5, %v4530_v16 }
 0x480   :  { %v1130_v29 = vmul.f32 0.5, %v1111_v18 }
 0x481   :  { %v1137_v36 = vsel %vm448_vm2, %v1131_v27, -inf }
 0x482   :  { %v1134_v37 = vsel %vm448_vm2, %v1130_v29, -inf }
 0x486   :  { %v4533_v21 = vpop.f32.mrb[14].mxu0 }
 0x487   :  { %v1121_v22 = vpop.f32.mrb[15].mxu0  ;;  %v1133_v42 = vmul.f32 0.5, %v4533_v21 }
 0x488   :  { %v1132_v43 = vmul.f32 0.5, %v1121_v22 }
 0x489   :  { %v1143_v44 = vsel %vm448_vm2, %v1133_v42, -inf }
 0x48a   :  { %v4549_v19 = vpop.f32.mrb[16].mxu0  ;;  %v1140_v32 = vsel %vm448_vm2, %v1132_v43, -inf }
 0x48b   :  { %v1409_v20 = vmul.f32 0.5, %v4549_v19  ;;  %v1389_v23 = vpop.f32.mrb[17].mxu0 }
 0x48c   :  { %v1408_v24 = vmul.f32 0.5, %v1389_v23 }
 0x48d   :  { %v1415_v28 = vsel %vm448_vm2, %v1409_v20, -inf }
 0x48e   :  { %1416 = vmax.xlane.f32.xlu1 %v1415_v28  ;;  %v1412_v30 = vsel %vm448_vm2, %v1408_v24, -inf  ;;  %v4552_v31 = vpop.f32.mrb[18].mxu0 }
 0x48f   :  { %1413 = vmax.xlane.f32.xlu0 %v1412_v30  ;;  %v1411_v33 = vmul.f32 0.5, %v4552_v31  ;;  %v1399_v34 = vpop.f32.mrb[19].mxu0 }
 0x490   :  { %v1410_v35 = vmul.f32 0.5, %v1399_v34 }
 0x491   :  { %v1421_v38 = vsel %vm448_vm2, %v1411_v33, -inf }
 0x492   :  { %1138 = vmax.xlane.f32.xlu1 %v1137_v36  ;;  %v1418_v40 = vsel %vm448_vm2, %v1410_v35, -inf }
 0x493   :  { %1135 = vmax.xlane.f32.xlu0 %v1134_v37 }
 0x496   :  { %1422 = vmax.xlane.f32.xlu1 %v1421_v38 }
 0x497   :  { %1419 = vmax.xlane.f32.xlu0 %v1418_v40 }
 0x49a   :  { %1144 = vmax.xlane.f32.xlu1 %v1143_v44 }
 0x49b   :  { %1141 = vmax.xlane.f32.xlu0 %v1140_v32 }
 0x51b   :  { %v1417_v46 = vpop.xlane.xlu1 %1416 }
 0x51c   :  { %v1425_v47 = vsub.f32 %v1409_v20, %v1417_v46  ;;  %v1414_v41 = vpop.xlane.xlu0 %1413 }
 0x51d   :  { %v1424_v48 = vsub.f32 %v1408_v24, %v1414_v41 }
 0x51e   :  { %v1430_v39 = vmul.f32 1.442695, %v1425_v47 }
 0x51f   :  { %v1428_v50 = vmul.f32 1.442695, %v1424_v48  ;;  %v1139_v52 = vpop.xlane.xlu1 %1138 }
 0x520   :  { %5030 = vpow2.f32 %v1430_v39  ;;  %v1147_v53 = vsub.f32 %v1131_v27, %v1139_v52  ;;  %v1136_v55 = vpop.xlane.xlu0 %1135 }
 0x521   :  { %5032 = vpow2.f32 %v1428_v50  ;;  %v1146_v49 = vsub.f32 %v1130_v29, %v1136_v55 }
 0x522   :  { %v1152_v56 = vmul.f32 1.442695, %v1147_v53 }
 0x523   :  { %v1150_v54 = vmul.f32 1.442695, %v1146_v49  ;;  %v1423_v51 = vpop.xlane.xlu1 %1422 }
 0x524   :  { %5034 = vpow2.f32 %v1152_v56  ;;  %v1427_v57 = vsub.f32 %v1411_v33, %v1423_v51  ;;  %v1420_v58 = vpop.xlane.xlu0 %1419 }
 0x525   :  { %5036 = vpow2.f32 %v1150_v54  ;;  %v1426_v60 = vsub.f32 %v1410_v35, %v1420_v58 }
 0x526   :  { %v1434_v59 = vmul.f32 1.442695, %v1427_v57 }
 0x527   :  { %v1432_v62 = vmul.f32 1.442695, %v1426_v60  ;;  %v1145_v0 = vpop.xlane.xlu1 %1144 }
 0x528   :  { %5038 = vpow2.f32 %v1434_v59  ;;  %v1149_v61 = vsub.f32 %v1133_v42, %v1145_v0  ;;  %v1142_v1 = vpop.xlane.xlu0 %1141 }
 0x529   :  { %5040 = vpow2.f32 %v1432_v62  ;;  %v1148_v2 = vsub.f32 %v1132_v43, %v1142_v1 }
 0x52a   :  { %v5031_v4 = vpop.eup %5030  ;;  %v1156_v3 = vmul.f32 1.442695, %v1149_v61 }
 0x52b   :  { %v5033_v5 = vpop.eup %5032  ;;  %v1154_v11 = vmul.f32 1.442695, %v1148_v2  ;;  %v1439_v12 = vsel %vm448_vm2, %v5031_v4, 0.0 }
 0x52c   :  { %5042 = vpow2.f32 %v1156_v3  ;;  %1440 = vadd.xlane.f32.xlu1 %v1439_v12  ;;  %v1436_v13 = vsel %vm448_vm2, %v5033_v5, 0.0 }
 0x52d   :  { %5044 = vpow2.f32 %v1154_v11  ;;  %1437 = vadd.xlane.f32.xlu0 %v1436_v13 }
 0x52e   :  { %v5035_v14 = vpop.eup %5034 }
 0x52f   :  { %v5037_v15 = vpop.eup %5036  ;;  %v1161_v17 = vsel %vm448_vm2, %v5035_v14, 0.0 }
 0x530   :  { %1162 = vadd.xlane.f32.xlu1 %v1161_v17  ;;  %v1158_v16 = vsel %vm448_vm2, %v5037_v15, 0.0 }
 0x531   :  { %1159 = vadd.xlane.f32.xlu0 %v1158_v16 }
 0x532   :  { %v5039_v18 = vpop.eup %5038 }
 0x533   :  { %v5041_v21 = vpop.eup %5040  ;;  %v1445_v22 = vsel %vm448_vm2, %v5039_v18, 0.0 }
 0x534   :  { %1446 = vadd.xlane.f32.xlu1 %v1445_v22  ;;  %v1442_v19 = vsel %vm448_vm2, %v5041_v21, 0.0 }
 0x535   :  { %1443 = vadd.xlane.f32.xlu0 %v1442_v19 }
 0x536   :  { %v5043_v20 = vpop.eup %5042 }
 0x537   :  { %v5045_v23 = vpop.eup %5044  ;;  %v1167_v24 = vsel %vm448_vm2, %v5043_v20, 0.0 }
 0x538   :  { %1168 = vadd.xlane.f32.xlu1 %v1167_v24  ;;  %v1164_v27 = vsel %vm448_vm2, %v5045_v23, 0.0 }
 0x539   :  { %1165 = vadd.xlane.f32.xlu0 %v1164_v27 }
 0x566   :  { %1832 = vxpose.xlu0.b32.start.end [1/1] (short) (narrow) %v5606_v63, 32 }
 0x56b   :  { %1554 = vxpose.xlu1.b32.start.end [1/1] (short) (narrow) %v5615_v8, 32 }
 0x5b9   :  { %v1441_v28 = vpop.xlane.xlu1 %1440 }
 0x5ba   :  { %5046 = vrcp.f32 %v1441_v28  ;;  %v1438_v29 = vpop.xlane.xlu0 %1437 }
 0x5bb   :  { %5048 = vrcp.f32 %v1438_v29 }
 0x5bd   :  { %v1163_v30 = vpop.xlane.xlu1 %1162 }
 0x5be   :  { %5050 = vrcp.f32 %v1163_v30  ;;  %v1160_v31 = vpop.xlane.xlu0 %1159 }
 0x5bf   :  { %5052 = vrcp.f32 %v1160_v31 }
 0x5c1   :  { %v1447_v33 = vpop.xlane.xlu1 %1446 }
 0x5c2   :  { %5054 = vrcp.f32 %v1447_v33  ;;  %v1444_v34 = vpop.xlane.xlu0 %1443 }
 0x5c3   :  { %5056 = vrcp.f32 %v1444_v34 }
 0x5c4   :  { %v5047_v35 = vpop.eup %5046 }
 0x5c5   :  { %v5049_v36 = vpop.eup %5048  ;;  %v1453_v37 = vmul.f32 %v5047_v35, %v5031_v4  ;;  %v1169_v38 = vpop.xlane.xlu1 %1168 }
 0x5c6   :  { %v1452_v40 = vmul.f32 %v5049_v36, %v5033_v5  ;;  %5058 = vrcp.f32 %v1169_v38  ;;  %v1166_v42 = vpop.xlane.xlu0 %1165 }
 0x5c7   :  { %1458 = vst.msk [vmem:[#allocation6 + $0x28] sm:$0xff] %vm448_vm2, %v1453_v37  ;;  %5060 = vrcp.f32 %v1166_v42 }
 0x5c8   :  { %v5051_v43 = vpop.eup %5050  ;;  %1457 = vst.msk [vmem:[#allocation6 + $0x20] sm:$0xff] %vm448_vm2, %v1452_v40  ;;  %v4857_v44 = vpack.c.bf16 %v1453_v37, %v1452_v40 }
 0x5c9   :  { %v5053_v32 = vpop.eup %5052  ;;  %v1175_v46 = vmul.f32 %v5051_v43, %v5035_v14 }
 0x5ca   :  { %v1174_v47 = vmul.f32 %v5053_v32, %v5037_v15  ;;  %4859 = vmatpush3.bf16.xpose.msk.msra.mxu0 %vm5516_vm4, %v4857_v44 }
 0x5cb   :  { %1179 = vst.msk [vmem:[#allocation6 + $0x8] sm:$0xff] %vm448_vm2, %v1175_v46  ;;  %4860 = vmatprep.subr.bf16.mxu0 %v5208_v25 }
 0x5cc   :  { %v5055_v41 = vpop.eup %5054  ;;  %1178 = vst.msk [vmem:[#allocation6] sm:$0xff] %vm448_vm2, %v1174_v47  ;;  %v4849_v48 = vpack.c.bf16 %v1175_v46, %v1174_v47 }
 0x5cd   :  { %v5057_v39 = vpop.eup %5056  ;;  %v1455_v50 = vmul.f32 %v5055_v41, %v5039_v18 }
 0x5ce   :  { %v1454_v52 = vmul.f32 %v5057_v39, %v5041_v21  ;;  %4851 = vmatpush3.bf16.xpose.msk.msra.mxu1 %vm5516_vm4, %v4849_v48 }
 0x5cf   :  { %1460 = vst.msk [vmem:[#allocation6 + $0x38] sm:$0xff] %vm448_vm2, %v1455_v50  ;;  %4852 = vmatprep.subr.bf16.mxu1 %v5208_v25 }
 0x5d0   :  { %v5059_v53 = vpop.eup %5058  ;;  %1459 = vst.msk [vmem:[#allocation6 + $0x30] sm:$0xff] %vm448_vm2, %v1454_v52  ;;  %v4861_v55 = vpack.c.bf16 %v1455_v50, %v1454_v52 }
 0x5d1   :  { %v5061_v49 = vpop.eup %5060  ;;  %v1177_v56 = vmul.f32 %v5059_v53, %v5043_v20 }
 0x5d2   :  { %v1176_v54 = vmul.f32 %v5061_v49, %v5045_v23  ;;  %4863 = vmatpush3.bf16.xpose.msk.msra.mxu0 %vm5516_vm4, %v4861_v55 }
 0x5d3   :  { %1181 = vst.msk [vmem:[#allocation6 + $0x18] sm:$0xff] %vm448_vm2, %v1177_v56  ;;  %4583 = vmatprep.subr.msk.mxu0 %vm1041_vm8, %v5606_v63 }
 0x5d4   :  { %1180 = vst.msk [vmem:[#allocation6 + $0x10] sm:$0xff] %vm448_vm2, %v1176_v54  ;;  %v4853_v51 = vpack.c.bf16 %v1177_v56, %v1176_v54 }
 0x5d6   :  { %4855 = vmatpush3.bf16.xpose.msk.msra.mxu1 %vm5516_vm4, %v4853_v51 }
 0x5d7   :  { %4564 = vmatprep.subr.msk.mxu1 %vm1041_vm8, %v5615_v8 }
 0x5d9   :  { %4562 = vmatmul.mubr.msk.f32.vlgmr.msra.gmra.mrb[20].mxu0 %vm448_vm2, %v5609_v6 }
 0x5da   :  { %4584 = vmatpush3.msk.msra.mxu0 %vm1041_vm8, %v5606_v63 }
 0x5db   :  { %4872 = vmatprep.subr.bf16.mxu0 %v5208_v25 }
 0x5dd   :  { %4543 = vmatmul.mubr.msk.f32.vlgmr.msra.gmra.mrb[12].mxu1 %vm448_vm2, %v5612_v7 }
 0x5de   :  { %4565 = vmatpush3.msk.msra.mxu1 %vm1041_vm8, %v5615_v8 }
 0x5df   :  { %4864 = vmatprep.subr.bf16.mxu1 %v5208_v25 }
 0x5e6   :  { %v1848_v57 = vpop.trf.xlu0 }
 0x5e7   :  { %4585 = vmatprep.mubr.msk.f32.mxu0 %vm1028_vm9, %v1848_v57 }
 0x5ea   :  { %v1849_v58 = vpop.trf.xlu0 }
 0x5eb   :  { %v1570_v60 = vpop.trf.xlu1  ;;  %4586 = vmatmul.mubr.msk.f32.vlgmr.msra.gmra.mrb[22].mxu0 %vm1028_vm9, %v1849_v58 }
 0x5ec   :  { %4566 = vmatprep.mubr.msk.f32.mxu1 %vm1028_vm9, %v1570_v60 }
 0x5ee   :  { %v1850_v6 = vpop.trf.xlu0 }
 0x5ef   :  { %v1571_v59 = vpop.trf.xlu1  ;;  %4588 = vmatprep.mubr.msk.f32.mxu0 %vm1028_vm9, %v1850_v6 }
 0x5f0   :  { %4567 = vmatmul.mubr.msk.f32.vlgmr.msra.gmra.mrb[14].mxu1 %vm1028_vm9, %v1571_v59 }
 0x5f2   :  { %v1851_v7 = vpop.trf.xlu0 }
 0x5f3   :  { %v1572_v62 = vpop.trf.xlu1  ;;  %4589 = vmatmul.mubr.msk.f32.gmra.mrb[24].mxu0 %vm1028_vm9, %v1851_v7 }
 0x5f4   :  { %4569 = vmatprep.mubr.msk.f32.mxu1 %vm1028_vm9, %v1572_v62  ;;  %4599 = vmatprep.mubr.msk.f32.mxu0 %vm5209_vm3, %v5210_v26 }
 0x5f7   :  { %v1573_v0 = vpop.trf.xlu1 }
 0x5f8   :  { %4570 = vmatmul.mubr.msk.f32.gmra.mrb[16].mxu1 %vm1028_vm9, %v1573_v0 }
 0x5f9   :  { %4580 = vmatprep.mubr.msk.f32.mxu1 %vm5209_vm3, %v5210_v26 }
 0x6ac   :  { %v1541_v61 = vpop.f32.mrb[20].mxu0 }
 0x6ad   :  { %v4563_v1 = vpop.f32.mrb[21].mxu0  ;;  %v2662_v2 = vrot.slane %v1541_v61, 7  ;;  %v2678_v4 = vrot.slane %v1541_v61, 1  ;;  %v2684_v3 = vrot.slane %v1541_v61, 2 }
 0x6b0   :  { %v1262_v5 = vpop.f32.mrb[12].mxu1 }
 0x6b1   :  { %v5707_v11 = vsel %vm990_vm5, %v1262_v5, %v2662_v2  ;;  %v2670_v12 = vrot.slane %v1262_v5, 1  ;;  %v2676_v13 = vrot.slane %v1262_v5, 2  ;;  %v2682_v14 = vrot.slane %v1262_v5, 3  ;;  %v4544_v15 = vpop.f32.mrb[13].mxu1 }
 0x6b3   :  { %v5710_v17 = vsel %vm990_vm5, %v2670_v12, %v1541_v61  ;;  %v5713_v16 = vsel %vm990_vm5, %v2676_v13, %v2678_v4  ;;  %v5716_v18 = vsel %vm990_vm5, %v2682_v14, %v2684_v3 }
 0x6be   :  { %v4587_v21 = vpop.f32.mrb[22].mxu0 }
 0x6bf   :  { %v1965_v22 = vmul.f32 0.5, %v4587_v21  ;;  %v1945_v19 = vpop.f32.mrb[23].mxu0 }
 0x6c0   :  { %v1964_v20 = vmul.f32 0.5, %v1945_v19 }
 0x6c1   :  { %v1971_v23 = vsel %vm448_vm2, %v1965_v22, -inf }
 0x6c2   :  { %1972 = vmax.xlane.f32.xlu1 %v1971_v23  ;;  %v1968_v24 = vsel %vm448_vm2, %v1964_v20, -inf }
 0x6c3   :  { %1969 = vmax.xlane.f32.xlu0 %v1968_v24  ;;  %v4568_v27 = vpop.f32.mrb[14].mxu1 }
 0x6c4   :  { %v1687_v28 = vmul.f32 0.5, %v4568_v27  ;;  %v1667_v29 = vpop.f32.mrb[15].mxu1 }
 0x6c5   :  { %v1686_v30 = vmul.f32 0.5, %v1667_v29 }
 0x6c6   :  { %v4590_v31 = vpop.f32.mrb[24].mxu0  ;;  %v1693_v33 = vsel %vm448_vm2, %v1687_v28, -inf }
 0x6c7   :  { %v1967_v34 = vmul.f32 0.5, %v4590_v31  ;;  %v1955_v35 = vpop.f32.mrb[25].mxu0  ;;  %1694 = vmax.xlane.f32.xlu1 %v1693_v33  ;;  %v1690_v36 = vsel %vm448_vm2, %v1686_v30, -inf }
 0x6c8   :  { %v1966_v37 = vmul.f32 0.5, %v1955_v35  ;;  %1691 = vmax.xlane.f32.xlu0 %v1690_v36 }
 0x6c9   :  { %v1977_v38 = vsel %vm448_vm2, %v1967_v34, -inf }
 0x6ca   :  { %v1974_v40 = vsel %vm448_vm2, %v1966_v37, -inf }
 0x6cb   :  { %1978 = vmax.xlane.f32.xlu1 %v1977_v38  ;;  %v4571_v42 = vpop.f32.mrb[16].mxu1 }
 0x6cc   :  { %v1689_v43 = vmul.f32 0.5, %v4571_v42  ;;  %1975 = vmax.xlane.f32.xlu0 %v1974_v40  ;;  %v1677_v44 = vpop.f32.mrb[17].mxu1 }
 0x6cd   :  { %v1688_v32 = vmul.f32 0.5, %v1677_v44 }
 0x6ce   :  { %v1699_v46 = vsel %vm448_vm2, %v1689_v43, -inf }
 0x6cf   :  { %1700 = vmax.xlane.f32.xlu1 %v1699_v46  ;;  %v1696_v47 = vsel %vm448_vm2, %v1688_v32, -inf }
 0x6d0   :  { %1697 = vmax.xlane.f32.xlu0 %v1696_v47 }
 0x74f   :  { %v1973_v41 = vpop.xlane.xlu1 %1972 }
 0x750   :  { %v1981_v48 = vsub.f32 %v1965_v22, %v1973_v41  ;;  %v1970_v39 = vpop.xlane.xlu0 %1969 }
 0x751   :  { %v1980_v50 = vsub.f32 %v1964_v20, %v1970_v39 }
 0x752   :  { %v1986_v52 = vmul.f32 1.442695, %v1981_v48 }
 0x753   :  { %v1984_v53 = vmul.f32 1.442695, %v1980_v50 }
 0x754   :  { %5062 = vpow2.f32 %v1986_v52  ;;  %v1695_v55 = vpop.xlane.xlu1 %1694 }
 0x755   :  { %5064 = vpow2.f32 %v1984_v53  ;;  %v1703_v49 = vsub.f32 %v1687_v28, %v1695_v55  ;;  %v1692_v56 = vpop.xlane.xlu0 %1691 }
 0x756   :  { %v1702_v54 = vsub.f32 %v1686_v30, %v1692_v56 }
 0x757   :  { %v1708_v51 = vmul.f32 1.442695, %v1703_v49 }
 0x758   :  { %v1706_v57 = vmul.f32 1.442695, %v1702_v54  ;;  %v1979_v58 = vpop.xlane.xlu1 %1978 }
 0x759   :  { %5066 = vpow2.f32 %v1708_v51  ;;  %v1983_v60 = vsub.f32 %v1967_v34, %v1979_v58  ;;  %v1976_v6 = vpop.xlane.xlu0 %1975 }
 0x75a   :  { %5068 = vpow2.f32 %v1706_v57  ;;  %v1982_v59 = vsub.f32 %v1966_v37, %v1976_v6 }
 0x75b   :  { %v1990_v7 = vmul.f32 1.442695, %v1983_v60 }
 0x75c   :  { %v1988_v62 = vmul.f32 1.442695, %v1982_v59  ;;  %v1701_v0 = vpop.xlane.xlu1 %1700 }
 0x75d   :  { %5070 = vpow2.f32 %v1990_v7  ;;  %v1705_v61 = vsub.f32 %v1689_v43, %v1701_v0  ;;  %v1698_v1 = vpop.xlane.xlu0 %1697 }
 0x75e   :  { %v5063_v2 = vpop.eup %5062  ;;  %5072 = vpow2.f32 %v1988_v62  ;;  %v1704_v4 = vsub.f32 %v1688_v32, %v1698_v1 }
 0x75f   :  { %v5065_v3 = vpop.eup %5064  ;;  %v1712_v5 = vmul.f32 1.442695, %v1705_v61  ;;  %v1995_v12 = vsel %vm448_vm2, %v5063_v2, 0.0 }
 0x760   :  { %v1710_v13 = vmul.f32 1.442695, %v1704_v4  ;;  %1996 = vadd.xlane.f32.xlu1 %v1995_v12  ;;  %v1992_v14 = vsel %vm448_vm2, %v5065_v3, 0.0 }
 0x761   :  { %5074 = vpow2.f32 %v1712_v5  ;;  %1993 = vadd.xlane.f32.xlu0 %v1992_v14 }
 0x762   :  { %5076 = vpow2.f32 %v1710_v13 }
 0x763   :  { %v5067_v15 = vpop.eup %5066 }
 0x764   :  { %v5069_v21 = vpop.eup %5068  ;;  %v1717_v22 = vsel %vm448_vm2, %v5067_v15, 0.0 }
 0x765   :  { %1718 = vadd.xlane.f32.xlu1 %v1717_v22  ;;  %v1714_v19 = vsel %vm448_vm2, %v5069_v21, 0.0 }
 0x766   :  { %1715 = vadd.xlane.f32.xlu0 %v1714_v19 }
 0x767   :  { %v5071_v20 = vpop.eup %5070 }
 0x768   :  { %v5073_v23 = vpop.eup %5072  ;;  %v2001_v24 = vsel %vm448_vm2, %v5071_v20, 0.0 }
 0x769   :  { %2002 = vadd.xlane.f32.xlu1 %v2001_v24  ;;  %v1998_v27 = vsel %vm448_vm2, %v5073_v23, 0.0 }
 0x76a   :  { %1999 = vadd.xlane.f32.xlu0 %v1998_v27 }
 0x76b   :  { %v5075_v28 = vpop.eup %5074 }
 0x76c   :  { %v5077_v29 = vpop.eup %5076  ;;  %v1723_v30 = vsel %vm448_vm2, %v5075_v28, 0.0 }
 0x76d   :  { %1724 = vadd.xlane.f32.xlu1 %v1723_v30  ;;  %v1720_v31 = vsel %vm448_vm2, %v5077_v29, 0.0 }
 0x76e   :  { %1721 = vadd.xlane.f32.xlu0 %v1720_v31 }
 0x79b   :  { %2392 = vxpose.xlu0.b32.start.end [1/1] (short) (narrow) %v5620_v9, 32 }
 0x7a0   :  { %2112 = vxpose.xlu1.b32.start.end [1/1] (short) (narrow) %v5623_v10, 32 }
 0x7ed   :  { %v1997_v33 = vpop.xlane.xlu1 %1996 }
 0x7ee   :  { %5078 = vrcp.f32 %v1997_v33  ;;  %v1994_v34 = vpop.xlane.xlu0 %1993 }
 0x7ef   :  { %5080 = vrcp.f32 %v1994_v34 }
 0x7f2   :  { %v1719_v35 = vpop.xlane.xlu1 %1718 }
 0x7f3   :  { %5082 = vrcp.f32 %v1719_v35  ;;  %v1716_v36 = vpop.xlane.xlu0 %1715 }
 0x7f4   :  { %5084 = vrcp.f32 %v1716_v36 }
 0x7f6   :  { %v2003_v37 = vpop.xlane.xlu1 %2002 }
 0x7f7   :  { %5086 = vrcp.f32 %v2003_v37  ;;  %v2000_v38 = vpop.xlane.xlu0 %1999 }
 0x7f8   :  { %v5079_v40 = vpop.eup %5078  ;;  %5088 = vrcp.f32 %v2000_v38 }
 0x7f9   :  { %v5081_v42 = vpop.eup %5080  ;;  %v2009_v43 = vmul.f32 %v5079_v40, %v5063_v2 }
 0x7fa   :  { %v2008_v44 = vmul.f32 %v5081_v42, %v5065_v3  ;;  %v1725_v32 = vpop.xlane.xlu1 %1724 }
 0x7fb   :  { %2014 = vst.msk [vmem:[#allocation6 + $0x68] sm:$0xff] %vm448_vm2, %v2009_v43  ;;  %5090 = vrcp.f32 %v1725_v32  ;;  %v1722_v46 = vpop.xlane.xlu0 %1721 }
 0x7fc   :  { %2013 = vst.msk [vmem:[#allocation6 + $0x60] sm:$0xff] %vm448_vm2, %v2008_v44  ;;  %5092 = vrcp.f32 %v1722_v46  ;;  %v4873_v47 = vpack.c.bf16 %v2009_v43, %v2008_v44 }
 0x7fd   :  { %v5083_v41 = vpop.eup %5082 }
 0x7fe   :  { %v5085_v48 = vpop.eup %5084  ;;  %v1731_v39 = vmul.f32 %v5083_v41, %v5067_v15  ;;  %4875 = vmatpush3.bf16.xpose.msk.msra.mxu0 %vm5516_vm4, %v4873_v47 }
 0x7ff   :  { %v1730_v50 = vmul.f32 %v5085_v48, %v5069_v21  ;;  %4876 = vmatprep.subr.bf16.mxu0 %v5208_v25 }
 0x800   :  { %1736 = vst.msk [vmem:[#allocation6 + $0x48] sm:$0xff] %vm448_vm2, %v1731_v39 }
 0x801   :  { %v5087_v52 = vpop.eup %5086  ;;  %1735 = vst.msk [vmem:[#allocation6 + $0x40] sm:$0xff] %vm448_vm2, %v1730_v50  ;;  %v4865_v53 = vpack.c.bf16 %v1731_v39, %v1730_v50 }
 0x802   :  { %v5089_v55 = vpop.eup %5088  ;;  %v2011_v49 = vmul.f32 %v5087_v52, %v5071_v20 }
 0x803   :  { %v2010_v56 = vmul.f32 %v5089_v55, %v5073_v23  ;;  %4867 = vmatpush3.bf16.xpose.msk.msra.mxu1 %vm5516_vm4, %v4865_v53 }
 0x804   :  { %2016 = vst.msk [vmem:[#allocation6 + $0x78] sm:$0xff] %vm448_vm2, %v2011_v49  ;;  %4868 = vmatprep.subr.bf16.mxu1 %v5208_v25 }
 0x805   :  { %v5091_v54 = vpop.eup %5090  ;;  %2015 = vst.msk [vmem:[#allocation6 + $0x70] sm:$0xff] %vm448_vm2, %v2010_v56  ;;  %v4877_v51 = vpack.c.bf16 %v2011_v49, %v2010_v56 }
 0x806   :  { %v5093_v57 = vpop.eup %5092  ;;  %v1733_v58 = vmul.f32 %v5091_v54, %v5075_v28 }
 0x807   :  { %v1732_v60 = vmul.f32 %v5093_v57, %v5077_v29  ;;  %4879 = vmatpush3.bf16.xpose.msk.msra.mxu0 %vm5516_vm4, %v4877_v51 }
 0x808   :  { %1738 = vst.msk [vmem:[#allocation6 + $0x58] sm:$0xff] %vm448_vm2, %v1733_v58  ;;  %4621 = vmatprep.subr.msk.mxu0 %vm1041_vm8, %v5620_v9 }
 0x809   :  { %1737 = vst.msk [vmem:[#allocation6 + $0x50] sm:$0xff] %vm448_vm2, %v1732_v60  ;;  %v4869_v6 = vpack.c.bf16 %v1733_v58, %v1732_v60 }
 0x80b   :  { %4871 = vmatpush3.bf16.xpose.msk.msra.mxu1 %vm5516_vm4, %v4869_v6 }
 0x80c   :  { %4602 = vmatprep.subr.msk.mxu1 %vm1041_vm8, %v5623_v10 }
 0x80e   :  { %4600 = vmatmul.mubr.msk.f32.vlgmr.msra.gmra.mrb[26].mxu0 %vm448_vm2, %v5606_v63 }
 0x80f   :  { %4622 = vmatpush3.msk.msra.mxu0 %vm1041_vm8, %v5620_v9 }
 0x810   :  { %4888 = vmatprep.subr.bf16.mxu0 %v5208_v25 }
 0x812   :  { %4581 = vmatmul.mubr.msk.f32.vlgmr.msra.gmra.mrb[18].mxu1 %vm448_vm2, %v5615_v8 }
 0x813   :  { %4603 = vmatpush3.msk.msra.mxu1 %vm1041_vm8, %v5623_v10 }
 0x814   :  { %4880 = vmatprep.subr.bf16.mxu1 %v5208_v25 }
 0x81b   :  { %v2408_v59 = vpop.trf.xlu0 }
 0x81c   :  { %4623 = vmatprep.mubr.msk.f32.mxu0 %vm1028_vm9, %v2408_v59 }
 0x81f   :  { %v2409_v7 = vpop.trf.xlu0 }
 0x820   :  { %v2128_v62 = vpop.trf.xlu1  ;;  %4624 = vmatmul.mubr.msk.f32.vlgmr.msra.gmra.mrb[28].mxu0 %vm1028_vm9, %v2409_v7 }
 0x821   :  { %4604 = vmatprep.mubr.msk.f32.mxu1 %vm1028_vm9, %v2128_v62 }
 0x823   :  { %v2410_v63 = vpop.trf.xlu0 }
 0x824   :  { %v2129_v0 = vpop.trf.xlu1  ;;  %4626 = vmatprep.mubr.msk.f32.mxu0 %vm1028_vm9, %v2410_v63 }
 0x825   :  { %4605 = vmatmul.mubr.msk.f32.vlgmr.msra.gmra.mrb[20].mxu1 %vm1028_vm9, %v2129_v0 }
 0x827   :  { %v2411_v8 = vpop.trf.xlu0 }
 0x828   :  { %v2130_v61 = vpop.trf.xlu1  ;;  %4627 = vmatmul.mubr.msk.f32.gmra.mrb[30].mxu0 %vm1028_vm9, %v2411_v8 }
 0x829   :  { %4607 = vmatprep.mubr.msk.f32.mxu1 %vm1028_vm9, %v2130_v61  ;;  %4637 = vmatprep.mubr.msk.f32.mxu0 %vm5209_vm3, %v5210_v26 }
 0x82c   :  { %v2131_v1 = vpop.trf.xlu1 }
 0x82d   :  { %4608 = vmatmul.mubr.msk.f32.gmra.mrb[22].mxu1 %vm1028_vm9, %v2131_v1 }
 0x82e   :  { %4618 = vmatprep.mubr.msk.f32.mxu1 %vm5209_vm3, %v5210_v26 }
 0x8e1   :  { %v5780_v2 = vpop.f32.mrb[26].mxu0 }
 0x8e2   :  { %v4601_v4 = vpop.f32.mrb[27].mxu0 }
 0x8e5   :  { %v1819_v3 = vpop.f32.mrb[18].mxu1 }
 0x8e6   :  { %v2665_v5 = vrot.slane %v1819_v3, 6  ;;  %v2672_v12 = vrot.slane %v1819_v3, 7  ;;  %v2686_v13 = vrot.slane %v1819_v3, 1  ;;  %v4582_v14 = vpop.f32.mrb[19].mxu1  ;;  %v5784_v15 = vsel %vm992_vm6, %v5713_v16, %v1819_v3 }
 0x8e8   :  { %v5788_v21 = vsel %vm992_vm6, %v5710_v17, %v2672_v12  ;;  %v5792_v22 = vsel %vm992_vm6, %v5707_v11, %v2665_v5  ;;  %v5796_v19 = vsel %vm992_vm6, %v5716_v18, %v2686_v13 }
 0x8f3   :  { %v4625_v20 = vpop.f32.mrb[28].mxu0 }
 0x8f4   :  { %v2525_v23 = vmul.f32 0.5, %v4625_v20  ;;  %v2505_v24 = vpop.f32.mrb[29].mxu0 }
 0x8f5   :  { %v2524_v27 = vmul.f32 0.5, %v2505_v24 }
 0x8f6   :  { %v2531_v28 = vsel %vm448_vm2, %v2525_v23, -inf }
 0x8f7   :  { %2532 = vmax.xlane.f32.xlu1 %v2531_v28  ;;  %v2528_v16 = vsel %vm448_vm2, %v2524_v27, -inf }
 0x8f8   :  { %v4606_v29 = vpop.f32.mrb[20].mxu1  ;;  %2529 = vmax.xlane.f32.xlu0 %v2528_v16 }
 0x8f9   :  { %v2245_v17 = vmul.f32 0.5, %v4606_v29  ;;  %v2225_v30 = vpop.f32.mrb[21].mxu1 }
 0x8fa   :  { %v2244_v31 = vmul.f32 0.5, %v2225_v30 }
 0x8fb   :  { %v4628_v11 = vpop.f32.mrb[30].mxu0  ;;  %v2251_v33 = vsel %vm448_vm2, %v2245_v17, -inf }
 0x8fc   :  { %v2527_v34 = vmul.f32 0.5, %v4628_v11  ;;  %2252 = vmax.xlane.f32.xlu1 %v2251_v33  ;;  %v2515_v18 = vpop.f32.mrb[31].mxu0  ;;  %v2248_v35 = vsel %vm448_vm2, %v2244_v31, -inf }
 0x8fd   :  { %v2526_v36 = vmul.f32 0.5, %v2515_v18  ;;  %2249 = vmax.xlane.f32.xlu0 %v2248_v35 }
 0x8fe   :  { %v2537_v37 = vsel %vm448_vm2, %v2527_v34, -inf }
 0x8ff   :  { %v2534_v38 = vsel %vm448_vm2, %v2526_v36, -inf }
 0x900   :  { %v4609_v40 = vpop.f32.mrb[22].mxu1  ;;  %2538 = vmax.xlane.f32.xlu1 %v2537_v37 }
 0x901   :  { %v2247_v42 = vmul.f32 0.5, %v4609_v40  ;;  %v2235_v43 = vpop.f32.mrb[23].mxu1  ;;  %2535 = vmax.xlane.f32.xlu0 %v2534_v38 }
 0x902   :  { %v2246_v44 = vmul.f32 0.5, %v2235_v43 }
 0x903   :  { %v2257_v32 = vsel %vm448_vm2, %v2247_v42, -inf }
 0x904   :  { %2258 = vmax.xlane.f32.xlu1 %v2257_v32  ;;  %v2254_v46 = vsel %vm448_vm2, %v2246_v44, -inf }
 0x905   :  { %2255 = vmax.xlane.f32.xlu0 %v2254_v46 }
 0x984   :  { %v2533_v47 = vpop.xlane.xlu1 %2532 }
 0x985   :  { %v2541_v41 = vsub.f32 %v2525_v23, %v2533_v47  ;;  %v2530_v48 = vpop.xlane.xlu0 %2529 }
 0x986   :  { %v2540_v39 = vsub.f32 %v2524_v27, %v2530_v48 }
 0x987   :  { %v2546_v50 = vmul.f32 1.442695, %v2541_v41 }
 0x988   :  { %v2544_v52 = vmul.f32 1.442695, %v2540_v39 }
 0x989   :  { %5094 = vpow2.f32 %v2546_v50  ;;  %v2253_v53 = vpop.xlane.xlu1 %2252 }
 0x98a   :  { %5096 = vpow2.f32 %v2544_v52  ;;  %v2261_v55 = vsub.f32 %v2245_v17, %v2253_v53  ;;  %v2250_v49 = vpop.xlane.xlu0 %2249 }
 0x98b   :  { %v2260_v56 = vsub.f32 %v2244_v31, %v2250_v49 }
 0x98c   :  { %v2266_v54 = vmul.f32 1.442695, %v2261_v55 }
 0x98d   :  { %v2264_v51 = vmul.f32 1.442695, %v2260_v56  ;;  %v2539_v57 = vpop.xlane.xlu1 %2538 }
 0x98e   :  { %5098 = vpow2.f32 %v2266_v54  ;;  %v2543_v58 = vsub.f32 %v2527_v34, %v2539_v57  ;;  %v2536_v60 = vpop.xlane.xlu0 %2535 }
 0x98f   :  { %5100 = vpow2.f32 %v2264_v51  ;;  %v2542_v6 = vsub.f32 %v2526_v36, %v2536_v60  ;;  %v3000_v60 = vld [vmem:[%s6088_s2 + $0x8] sm:$0xff] }
 0x990   :  { %v2550_v59 = vmul.f32 1.442695, %v2543_v58  ;;  %v2999_v58 = vld [vmem:[%s6088_s2] sm:$0xff] }
 0x991   :  { %v2548_v7 = vmul.f32 1.442695, %v2542_v6  ;;  %v2259_v62 = vpop.xlane.xlu1 %2258 }
 0x992   :  { %5102 = vpow2.f32 %v2550_v59  ;;  %v2263_v63 = vsub.f32 %v2247_v42, %v2259_v62  ;;  %v2256_v0 = vpop.xlane.xlu0 %2255  ;;  %v5839_v59 = vpack.c.bf16 %v3000_v60, %v2999_v58  ;;  %v3002_v62 = vld [vmem:[%s6088_s2 + $0x18] sm:$0xff] }
 0x993   :  { %v5095_v8 = vpop.eup %5094  ;;  %5104 = vpow2.f32 %v2548_v7  ;;  %v2262_v61 = vsub.f32 %v2246_v44, %v2256_v0  ;;  %v3001_v7 = vld [vmem:[%s6088_s2 + $0x10] sm:$0xff]  ;;  %v4224_v0 = vld [vmem:[%s6088_s2 + $0x48] sm:$0xff] }
 0x994   :  { %v5097_v1 = vpop.eup %5096  ;;  %v2270_v4 = vmul.f32 1.442695, %v2263_v63  ;;  %v2555_v3 = vsel %vm448_vm2, %v5095_v8, 0.0  ;;  %v4900_v63 = vpack.c.bf16 %v3002_v62, %v3001_v7  ;;  %v2998_v7 = vld [vmem:[%s6089_s3] sm:$0x1] }
 0x995   :  { %v2268_v5 = vmul.f32 1.442695, %v2262_v61  ;;  %2556 = vadd.xlane.f32.xlu1 %v2555_v3  ;;  %v2552_v12 = vsel %vm448_vm2, %v5097_v1, 0.0  ;;  %v4226_v61 = vld [vmem:[%s6088_s2 + $0x58] sm:$0xff] }
 0x996   :  { %5106 = vpow2.f32 %v2270_v4  ;;  %2553 = vadd.xlane.f32.xlu0 %v2552_v12  ;;  %v4221_v3 = vld [vmem:[%s6088_s2 + $0x38] sm:$0xff]  ;;  %v4228_v12 = vld [vmem:[%s6088_s2 + $0x60] sm:$0xff] }
 0x997   :  { %5108 = vpow2.f32 %v2268_v5 }
 0x998   :  { %v5099_v13 = vpop.eup %5098 }
 0x999   :  { %v5101_v14 = vpop.eup %5100  ;;  %v2275_v20 = vsel %vm448_vm2, %v5099_v13, 0.0 }
 0x99a   :  { %2276 = vadd.xlane.f32.xlu1 %v2275_v20  ;;  %v2272_v23 = vsel %vm448_vm2, %v5101_v14, 0.0  ;;  %v4230_v20 = vld [vmem:[%s6088_s2 + $0x70] sm:$0xff] }
 0x99b   :  { %2273 = vadd.xlane.f32.xlu0 %v2272_v23  ;;  %v4231_v23 = vld [vmem:[%s6088_s2 + $0x78] sm:$0xff] }
 0x99c   :  { %v5103_v24 = vpop.eup %5102 }
 0x99d   :  { %v5105_v27 = vpop.eup %5104  ;;  %v2561_v28 = vsel %vm448_vm2, %v5103_v24, 0.0 }
 0x99e   :  { %2562 = vadd.xlane.f32.xlu1 %v2561_v28  ;;  %v2558_v16 = vsel %vm448_vm2, %v5105_v27, 0.0  ;;  %v3355_v28 = vrot.slane %v5780_v2, 1 }
 0x99f   :  { %2559 = vadd.xlane.f32.xlu0 %v2558_v16  ;;  %v3361_v16 = vrot.slane %v5780_v2, 2 }
 0x9a0   :  { %v5107_v29 = vpop.eup %5106 }
 0x9a1   :  { %v5109_v17 = vpop.eup %5108  ;;  %v2281_v30 = vsel %vm448_vm2, %v5107_v29, 0.0 }
 0x9a2   :  { %2282 = vadd.xlane.f32.xlu1 %v2281_v30  ;;  %v2278_v31 = vsel %vm448_vm2, %v5109_v17, 0.0 }
 0x9a3   :  { %2279 = vadd.xlane.f32.xlu0 %v2278_v31 }
 0xa22   :  { %v2557_v11 = vpop.xlane.xlu1 %2556 }
 0xa23   :  { %5110 = vrcp.f32 %v2557_v11  ;;  %v2554_v33 = vpop.xlane.xlu0 %2553 }
 0xa24   :  { %5112 = vrcp.f32 %v2554_v33 }
 0xa27   :  { %v2277_v34 = vpop.xlane.xlu1 %2276 }
 0xa28   :  { %5114 = vrcp.f32 %v2277_v34  ;;  %v2274_v18 = vpop.xlane.xlu0 %2273 }
 0xa29   :  { %5116 = vrcp.f32 %v2274_v18 }
 0xa2b   :  { %v2563_v35 = vpop.xlane.xlu1 %2562 }
 0xa2c   :  { %5118 = vrcp.f32 %v2563_v35  ;;  %v2560_v36 = vpop.xlane.xlu0 %2559 }
 0xa2d   :  { %v5111_v37 = vpop.eup %5110  ;;  %5120 = vrcp.f32 %v2560_v36 }
 0xa2e   :  { %v5113_v38 = vpop.eup %5112  ;;  %v2569_v40 = vmul.f32 %v5111_v37, %v5095_v8  ;;  %v4225_v8 = vld [vmem:[%s6088_s2 + $0x50] sm:$0xff] }
 0xa2f   :  { %v2568_v42 = vmul.f32 %v5113_v38, %v5097_v1  ;;  %v2283_v43 = vpop.xlane.xlu1 %2282  ;;  %v4219_v1 = vld [vmem:[%s6088_s2 + $0x28] sm:$0xff] }
 0xa30   :  { %2574 = vst.msk [vmem:[#allocation6 + $0xa8] sm:$0xff] %vm448_vm2, %v2569_v40  ;;  %5122 = vrcp.f32 %v2283_v43  ;;  %v2280_v44 = vpop.xlane.xlu0 %2279 }
 0xa31   :  { %2573 = vst.msk [vmem:[#allocation6 + $0xa0] sm:$0xff] %vm448_vm2, %v2568_v42  ;;  %5124 = vrcp.f32 %v2280_v44  ;;  %v4889_v32 = vpack.c.bf16 %v2569_v40, %v2568_v42 }
 0xa32   :  { %v5115_v46 = vpop.eup %5114 }
 0xa33   :  { %v5117_v47 = vpop.eup %5116  ;;  %v2289_v41 = vmul.f32 %v5115_v46, %v5099_v13  ;;  %4891 = vmatpush3.bf16.xpose.msk.msra.mxu0 %vm5516_vm4, %v4889_v32  ;;  %v4229_v13 = vld [vmem:[%s6088_s2 + $0x68] sm:$0xff] }
 0xa34   :  { %v2288_v48 = vmul.f32 %v5117_v47, %v5101_v14  ;;  %4892 = vmatprep.subr.bf16.mxu0 %v5208_v25  ;;  %v4915_v14 = vpack.c.bf16 %v4229_v13, %v4228_v12 }
 0xa35   :  { %2294 = vst.msk [vmem:[#allocation6 + $0x88] sm:$0xff] %vm448_vm2, %v2289_v41 }
 0xa36   :  { %v5119_v39 = vpop.eup %5118  ;;  %2293 = vst.msk [vmem:[#allocation6 + $0x80] sm:$0xff] %vm448_vm2, %v2288_v48  ;;  %v4881_v50 = vpack.c.bf16 %v2289_v41, %v2288_v48 }
 0xa37   :  { %v5121_v52 = vpop.eup %5120  ;;  %v2571_v53 = vmul.f32 %v5119_v39, %v5103_v24  ;;  %v5943_v24 = vpack.c.bf16 %v4231_v23, %v4230_v20 }
 0xa38   :  { %v2570_v55 = vmul.f32 %v5121_v52, %v5105_v27  ;;  %4883 = vmatpush3.bf16.xpose.msk.msra.mxu1 %vm5516_vm4, %v4881_v50 }
 0xa39   :  { %2576 = vst.msk [vmem:[#allocation6 + $0xb8] sm:$0xff] %vm448_vm2, %v2571_v53  ;;  %4884 = vmatprep.subr.bf16.mxu1 %v5208_v25 }
 0xa3a   :  { %v5123_v49 = vpop.eup %5122  ;;  %2575 = vst.msk [vmem:[#allocation6 + $0xb0] sm:$0xff] %vm448_vm2, %v2570_v55  ;;  %v4893_v56 = vpack.c.bf16 %v2571_v53, %v2570_v55 }
 0xa3b   :  { %v5125_v54 = vpop.eup %5124  ;;  %v2291_v51 = vmul.f32 %v5123_v49, %v5107_v29  ;;  %v3367_v29 = vrot.slane %v5780_v2, 3 }
 0xa3c   :  { %v2290_v57 = vmul.f32 %v5125_v54, %v5109_v17  ;;  %4895 = vmatpush3.bf16.xpose.msk.msra.mxu0 %vm5516_vm4, %v4893_v56 }
 0xa3d   :  { %2296 = vst.msk [vmem:[#allocation6 + $0x98] sm:$0xff] %vm448_vm2, %v2291_v51  ;;  %4896 = vmatprep.subr.bf16.mxu0 %v5208_v25 }
 0xa3e   :  { %2295 = vst.msk [vmem:[#allocation6 + $0x90] sm:$0xff] %vm448_vm2, %v2290_v57  ;;  %v4885_v6 = vpack.c.bf16 %v2291_v51, %v2290_v57 }
 0xa40   :  { %4887 = vmatpush3.bf16.xpose.msk.msra.mxu1 %vm5516_vm4, %v4885_v6 }
 0xa41   :  { %4640 = vmatprep.subr.mxu1 %v5210_v26 }
 0xa43   :  { %4638 = vmatmul.mubr.msk.f32.vlgmr.msra.gmra.mrb[32].mxu0 %vm448_vm2, %v5620_v9  ;;  %v5864_v9 = vpack.c.bf16 %v4224_v0, %v4223_v45 }
 0xa44   :  { %4898 = vmatpush3.bf16.msra.mxu0 %v5839_v59  ;;  %4668 = vmatprep.mubr.msk.f32.mxu0 %vm5209_vm3, %v5210_v26 }
 0xa45   :  { %4899 = vmatprep.subr.bf16.mxu0 %v5208_v25 }
 0xa47   :  { %4619 = vmatmul.mubr.msk.f32.vlgmr.msra.gmra.mrb[24].mxu1 %vm448_vm2, %v5623_v10  ;;  %v5883_v10 = vpack.c.bf16 %v4226_v61, %v4225_v8 }
 0xa48   :  { %4641 = vmatpush3.xpose.msk.msra.mxu1 %vm448_vm2, %v5788_v21  ;;  %4901 = vmatpush3.bf16.msra.mxu0 %v4900_v63 }
 0xa49   :  { %4642 = vmatprep.mubr.msk.f32.mxu1 %vm5209_vm3, %v5210_v26  ;;  %4645 = vmatprep.subr.mxu1 %v5210_v26 }
 0xa4a   :  { %4908 = vmatprep.subr.bf16.mxu0 %v5208_v25 }
 0xa4b   :  { %4643 = vmatmul.mubr.msk.f32.vlgmr.msra.gmra.mrb[26].mxu1 %vm448_vm2, %v5788_v21  ;;  %4669 = vmatmul.mubr.msk.f32.vlgmr.msra.gmra.mrb[34].mxu0 %vm448_vm2, %v5792_v22 }
 0xa4c   :  { %4646 = vmatpush3.xpose.msk.msra.mxu1 %vm448_vm2, %v5792_v22  ;;  %4910 = vmatpush3.bf16.msra.mxu0 %v5864_v9 }
 0xa4d   :  { %4911 = vmatprep.subr.bf16.mxu0 %v5208_v25  ;;  %4647 = vmatprep.mubr.msk.f32.mxu1 %vm5209_vm3, %v5210_v26 }
 0xa4e   :  { %4650 = vmatprep.subr.mxu1 %v5210_v26  ;;  %4690 = vmatprep.mubr.msk.f32.mxu0 %vm5209_vm3, %v5210_v26 }
 0xa50   :  { %4913 = vmatpush3.bf16.msra.mxu0 %v5883_v10 }
 0xa51   :  { %4704 = vmatprep.subr.mxu0 %v5210_v26 }
 0xa53   :  { %4648 = vmatmul.mubr.msk.f32.vlgmr.msra.gmra.mrb[26].mxu1 %vm448_vm2, %v5792_v22  ;;  %4691 = vmatmul.mubr.msk.f32.vlgmr.msra.gmra.mrb[36].mxu0 %vm448_vm2, %v5784_v15  ;;  %v4218_v22 = vld [vmem:[%s6088_s2 + $0x20] sm:$0xff] }
 0xa54   :  { %4651 = vmatpush3.xpose.msk.msra.mxu1 %vm448_vm2, %v5784_v15  ;;  %4652 = vmatprep.mubr.msk.f32.mxu1 %vm5209_vm3, %v5210_v26  ;;  %v4903_v4 = vpack.c.bf16 %v4219_v1, %v4218_v22 }
 0xa55   :  { %4655 = vmatprep.subr.mxu1 %v5210_v26  ;;  %4706 = vmatprep.mubr.msk.f32.mxu0 %vm5209_vm3, %v5210_v26 }
 0xa5b   :  { %4653 = vmatmul.mubr.msk.f32.vlgmr.msra.gmra.mrb[26].mxu1 %vm448_vm2, %v5784_v15  ;;  %v4220_v15 = vld [vmem:[%s6088_s2 + $0x30] sm:$0xff]  ;;  %s5211_s2 = smov 124  }
 0xa5c   :  { %4656 = vmatpush3.xpose.msk.msra.mxu1 %vm448_vm2, %v5796_v19  ;;  %4657 = vmatprep.mubr.msk.f32.mxu1 %vm5209_vm3, %v5210_v26  ;;  %v4906_v5 = vpack.c.bf16 %v4221_v3, %v4220_v15 }
 0xa5d   :  { %4902 = vmatprep.subr.bf16.mxu1 %v5208_v25 }
 0xa63   :  { %4658 = vmatmul.mubr.msk.f32.vlgmr.msra.gmra.mrb[26].mxu1 %vm448_vm2, %v5796_v19 }
 0xa64   :  { %4904 = vmatpush3.bf16.msra.mxu1 %v4903_v4  ;;  %4679 = vmatprep.mubr.msk.f32.mxu1 %vm5209_vm3, %v5210_v26 }
 0xa65   :  { %4905 = vmatprep.subr.bf16.mxu1 %v5208_v25 }
 0xa68   :  { %4907 = vmatpush3.bf16.msra.mxu1 %v4906_v5 }
 0xa69   :  { %4914 = vmatprep.subr.bf16.mxu1 %v5208_v25 }
 0xa6b   :  { %4680 = vmatmul.mubr.msk.f32.vlgmr.msra.gmra.mrb[28].mxu1 %vm448_vm2, %v5788_v21 }
 0xa6c   :  { %4916 = vmatpush3.bf16.msra.mxu1 %v4915_v14  ;;  %4701 = vmatprep.mubr.msk.f32.mxu1 %vm5209_vm3, %v5210_v26 }
 0xa6d   :  { %4917 = vmatprep.subr.bf16.mxu1 %v5208_v25 }
 0xa70   :  { %4919 = vmatpush3.bf16.msra.mxu1 %v5943_v24 }
 0xa71   :  { %4920 = vmatprep.subr.bf16.mxu1 %v5208_v25 }
 0xa73   :  { %4702 = vmatmul.mubr.msk.f32.vlgmr.msra.gmra.mrb[30].mxu1 %vm448_vm2, %v5796_v19 }
 0xa74   :  { %4922 = vmatpush3.bf16.msra.mxu1 %v5839_v59  ;;  %4732 = vmatprep.mubr.msk.f32.mxu1 %vm5209_vm3, %v5210_v26 }
 0xa75   :  { %4923 = vmatprep.subr.bf16.mxu1 %v5208_v25 }
 0xa78   :  { %4925 = vmatpush3.bf16.msra.mxu1 %v4900_v63 }
 0xa79   :  { %4926 = vmatprep.subr.bf16.mxu1 %v5208_v25 }
 0xb16   :  { %v2657_v21 = vpop.f32.mrb[32].mxu0 }
 0xb17   :  { %v4639_v27 = vpop.f32.mrb[33].mxu0  ;;  %v3357_v17 = vrot.slane %v2657_v21, 7  ;;  %v3350_v18 = vrot.slane %v2657_v21, 6  ;;  %v3371_v35 = vrot.slane %v2657_v21, 1 }
 0xb1a   :  { %v2377_v19 = vpop.f32.mrb[24].mxu1 }
 0xb1b   :  { %v3347_v30 = vrot.slane %v2377_v19, 7  ;;  %v3359_v31 = vsel %vm990_vm5, %v3355_v28, %v2377_v19  ;;  %v3363_v11 = vrot.slane %v2377_v19, 1  ;;  %v3369_v33 = vrot.slane %v2377_v19, 2  ;;  %v4620_v34 = vpop.f32.mrb[25].mxu1 }
 0xb1c   :  { %v3360_v36 = vsel %vm992_vm6, %v3359_v31, %v3357_v17 }
 0xb1d   :  { %4705 = vmatpush3.xpose.msk.msra.mxu0 %vm448_vm2, %v3360_v36  ;;  %v3352_v37 = vsel %vm990_vm5, %v5780_v2, %v3347_v30  ;;  %v3365_v38 = vsel %vm990_vm5, %v3361_v16, %v3363_v11  ;;  %v3373_v40 = vsel %vm990_vm5, %v3367_v29, %v3369_v33 }
 0xb1e   :  { %v3069_v42 = vpop.f32.mrb[34].mxu0  ;;  %v3353_v43 = vsel %vm992_vm6, %v3352_v37, %v3350_v18  ;;  %4709 = vmatprep.subr.mxu0 %v5210_v26  ;;  %v3366_v44 = vsel %vm992_vm6, %v3365_v38, %v2657_v21  ;;  %v3374_v32 = vsel %vm992_vm6, %v3373_v40, %v3371_v35 }
 0xb1f   :  { %v3074_v46 = vrot.slane %v3069_v42, 1  ;;  %v3079_v47 = vrot.slane %v3069_v42, 2  ;;  %v4670_v41 = vpop.f32.mrb[35].mxu0  ;;  %4733 = vmatmul.mubr.msk.f32.vlgmr.msra.gmra.mrb[32].mxu1 %vm448_vm2, %v3353_v43 }
 0xb20   :  { %4928 = vmatpush3.bf16.msra.mxu1 %v4903_v4  ;;  %4707 = vmatmul.mubr.msk.f32.vlgmr.msra.gmra.mrb[38].mxu0 %vm448_vm2, %v3360_v36 }
 0xb21   :  { %3080 = vrot.lane.b32.xlu0 %v3079_v47, %s5211_s2  ;;  %3075 = vrot.lane.b32.xlu1 %v3074_v46, %s5212_s23 }
 0xb22   :  { %4710 = vmatpush3.xpose.msk.msra.mxu0 %vm448_vm2, %v3353_v43  ;;  %4929 = vmatprep.subr.bf16.mxu1 %v5208_v25 }
 0xb23   :  { %4743 = vmatprep.mubr.msk.f32.mxu1 %vm5209_vm3, %v5210_v26  ;;  %4711 = vmatprep.mubr.msk.f32.mxu0 %vm5209_vm3, %v5210_v26 }
 0xb24   :  { %4931 = vmatpush3.bf16.msra.mxu1 %v4906_v5  ;;  %4714 = vmatprep.subr.mxu0 %v5210_v26 }
 0xb25   :  { %4938 = vmatprep.subr.bf16.mxu1 %v5208_v25 }
 0xb26   :  { %v3243_v2 = vpop.f32.mrb[36].mxu0 }
 0xb27   :  { %v3248_v48 = vrot.slane %v3243_v2, 1  ;;  %v3253_v39 = vrot.slane %v3243_v2, 2  ;;  %4744 = vmatmul.mubr.msk.f32.vlgmr.msra.gmra.mrb[34].mxu1 %vm448_vm2, %v3360_v36  ;;  %v4692_v50 = vpop.f32.mrb[37].mxu0 }
 0xb28   :  { %4940 = vmatpush3.bf16.msra.mxu1 %v4915_v14  ;;  %4712 = vmatmul.mubr.msk.f32.vlgmr.msra.gmra.mrb[38].mxu0 %vm448_vm2, %v3353_v43 }
 0xb29   :  { %4715 = vmatpush3.xpose.msk.msra.mxu0 %vm448_vm2, %v3366_v44  ;;  %3254 = vrot.lane.b32.xlu0 %v3253_v39, %s5211_s2 }
 0xb2a   :  { %3249 = vrot.lane.b32.xlu1 %v3248_v48, %s5212_s23  ;;  %4941 = vmatprep.subr.bf16.mxu1 %v5208_v25 }
 0xb2b   :  { %4765 = vmatprep.mubr.msk.f32.mxu1 %vm5209_vm3, %v5210_v26  ;;  %4716 = vmatprep.mubr.msk.f32.mxu0 %vm5209_vm3, %v5210_v26 }
 0xb2c   :  { %4943 = vmatpush3.bf16.msra.mxu1 %v5943_v24  ;;  %4719 = vmatprep.subr.mxu0 %v5210_v26 }
 0xb2f   :  { %4766 = vmatmul.mubr.msk.f32.vlgmr.msra.gmra.mrb[36].mxu1 %vm448_vm2, %v3374_v32 }
 0xb30   :  { %4717 = vmatmul.mubr.msk.f32.vlgmr.msra.gmra.mrb[38].mxu0 %vm448_vm2, %v3366_v44 }
 0xb31   :  { %4720 = vmatpush3.xpose.msk.msra.mxu0 %vm448_vm2, %v3374_v32  ;;  %4721 = vmatprep.mubr.msk.f32.mxu0 %vm5209_vm3, %v5210_v26 }
 0xb32   :  { %4932 = vmatprep.subr.bf16.mxu0 %v5208_v25 }
 0xb36   :  { %v2979_v52 = vpop.f32.mrb[26].mxu1 }
 0xb37   :  { %v4659_v53 = vpop.f32.mrb[27].mxu1  ;;  %v2984_v11 = vmul.f32 0.088388346, %v2979_v52 }
 0xb38   :  { %4722 = vmatmul.mubr.msk.f32.vlgmr.msra.gmra.mrb[38].mxu0 %vm448_vm2, %v3374_v32 }
 0xb39   :  { %4934 = vmatpush3.bf16.msra.mxu0 %v5864_v9  ;;  %4754 = vmatprep.mubr.msk.f32.mxu0 %vm5209_vm3, %v5210_v26  ;;  %v2986_v34 = vsel %vm2985_vm10, %v2984_v11, -inf }
 0xb3a   :  { %4935 = vmatprep.subr.bf16.mxu0 %v5208_v25 }
 0xb3d   :  { %4937 = vmatpush3.bf16.msra.mxu0 %v5883_v10 }
 0xb3e   :  { %v3156_v55 = vpop.f32.mrb[28].mxu1 }
 0xb3f   :  { %v3161_v49 = vrot.slane %v3156_v55, 1  ;;  %v3166_v56 = vrot.slane %v3156_v55, 2  ;;  %v4681_v54 = vpop.f32.mrb[29].mxu1 }
 0xb40   :  { %4755 = vmatmul.mubr.msk.f32.vlgmr.msra.gmra.mrb[40].mxu0 %vm448_vm2, %v3366_v44 }
 0xb41   :  { %3167 = vrot.lane.b32.xlu0 %v3166_v56, %s5211_s2  ;;  %3162 = vrot.lane.b32.xlu1 %v3161_v49, %s5212_s23 }
 0xb46   :  { %v6010_v51 = vpop.f32.mrb[30].mxu1 }
 0xb47   :  { %v4703_v57 = vpop.f32.mrb[31].mxu1  ;;  %v3335_v19 = vrot.slane %v6010_v51, 1  ;;  %v3340_v31 = vrot.slane %v6010_v51, 2 }
 0xb93   :  { %v3076_v58 = vpop.permute.xlu1 %3075  ;;  %v3081_v60 = vpop.permute.xlu0 %3080 }
 0xb94   :  { %v3078_v26 = vadd.f32 %v3076_v58, %v3069_v42  ;;  %v3683_v42 = vld [vmem:[%s6089_s3] sm:$0x1]  ;;  %s5213_s3 = smov [#allocation4]  }
 0xb95   :  { %s4063_s28 = sshll.u32 %s5213_s3, 4  ;;  %s4064_s28 = int_to_ptr.vmem [resolvable:$true] %s4063_s28 }
 0xb96   :  { %v3083_v59 = vadd.f32 %v3081_v60, %v3078_v26  ;;  %s5138_s29 = scalar_lea.vmem %s4064_s28, 2048  ;;  %p5143_p1 = scmp.lt.s32.totalorder %s4064_s28, %s4064_s28 }
 0xb97   :  { %p5139_p0 = scmp.ne.s32.totalorder %s4064_s28, %s5138_s29  ;;  %p5144_p2 = scmp.lt.s32.totalorder %s5138_s29, %s5138_s29 }
 0xb98   :  { %v3084_v9 = vadd.f32 %v3083_v59, %v2998_v7 }
 0xb99   :  { %p5145_p3 = por %p5144_p2, %p5143_p1 }
 0xb9b   :  { %v3255_v25 = vpop.permute.xlu0 %3254  ;;  %p5146_p4 = pnand %p5145_p3, %p5139_p0 }
 0xb9c   :  { %v3250_v6 = vpop.permute.xlu1 %3249 }
 0xb9d   :  { %v3252_v63 = vadd.f32 %v3250_v6, %v3243_v2  ;;  %v4029_v2 = vlaneseq }
 0xb9f   :  { %v3257_v61 = vadd.f32 %v3255_v25, %v3252_v63 }
 0xbb3   :  { %v3163_v62 = vpop.permute.xlu1 %3162  ;;  %v3168_v0 = vpop.permute.xlu0 %3167 }
 0xbb4   :  { %v3165_v45 = vadd.f32 %v3163_v62, %v3156_v55  ;;  %v4030_v55 = vshrl.u32 %v4029_v2, 7 }
 0xbb6   :  { %v3170_v8 = vadd.f32 %v3168_v0, %v3165_v45  ;;  %v4031_v60 = vsub.s32 0, %v4030_v55 }
 0xbb8   :  { %v3171_v10 = vadd.f32 %v3170_v8, %v3084_v9 }
 0xbba   :  { %v6015_v22 = vadd.f32 %v3257_v61, %v3171_v10 }
 0xbf2   :  { %v3754_v1 = vpop.f32.mrb[32].mxu1 }
 0xbf3   :  { %v3759_v4 = vrot.slane %v3754_v1, 1  ;;  %v3764_v15 = vrot.slane %v3754_v1, 2  ;;  %v4734_v3 = vpop.f32.mrb[33].mxu1 }
 0xbf5   :  { %3765 = vrot.lane.b32.xlu1 %v3764_v15, %s5211_s2  ;;  %3760 = vrot.lane.b32.xlu0 %v3759_v4, %s5212_s23 }
 0xbfa   :  { %v3840_v5 = vpop.f32.mrb[34].mxu1 }
 0xbfb   :  { %v3845_v12 = vrot.slane %v3840_v5, 1  ;;  %v3850_v13 = vrot.slane %v3840_v5, 2  ;;  %v4745_v14 = vpop.f32.mrb[35].mxu1 }
 0xbfd   :  { %3851 = vrot.lane.b32.xlu0 %v3850_v13, %s5211_s2  ;;  %3846 = vrot.lane.b32.xlu1 %v3845_v12, %s5212_s23 }
 0xc02   :  { %v4012_v20 = vpop.f32.mrb[36].mxu1 }
 0xc03   :  { %v4017_v23 = vrot.slane %v4012_v20, 1  ;;  %v4767_v24 = vpop.f32.mrb[37].mxu1  ;;  %v4022_v30 = vrot.slane %v4012_v20, 2 }
 0xc05   :  { %4018 = vrot.lane.b32.xlu1 %v4017_v23, %s5212_s23 }
 0xc0b   :  { %v3664_v21 = vpop.f32.mrb[38].mxu0 }
 0xc0c   :  { %v4723_v27 = vpop.f32.mrb[39].mxu0  ;;  %v3669_v33 = vmul.f32 0.088388346, %v3664_v21 }
 0xc0e   :  { %v3670_v18 = vsel %vm2985_vm10, %v3669_v33, -inf }
 0xc13   :  { %v3926_v28 = vpop.f32.mrb[40].mxu0 }
 0xc14   :  { %v3931_v16 = vrot.slane %v3926_v28, 1  ;;  %v3936_v29 = vrot.slane %v3926_v28, 2  ;;  %v4756_v17 = vpop.f32.mrb[41].mxu0 }
 0xc16   :  { %3937 = vrot.lane.b32.xlu0 %v3936_v29, %s5211_s2  ;;  %3932 = vrot.lane.b32.xlu1 %v3931_v16, %s5212_s23 }
 0xc1a   :  { %4023 = vrot.lane.b32.xlu0 %v4022_v30, %s5211_s2  ;;  %3336 = vrot.lane.b32.xlu1 %v3335_v19, %s5212_s23 }
 0xc1e   :  { %3341 = vrot.lane.b32.xlu1 %v3340_v31, %s5211_s2 }
 0xc39   :  { %2987 = vmax.xlane.f32.xlu0 %v2986_v34 }
 0xc3d   :  { %3671 = vmax.xlane.f32.xlu0 %v3670_v18 }
 0xc67   :  { %v3761_v35 = vpop.permute.xlu0 %3760  ;;  %v3766_v37 = vpop.permute.xlu1 %3765 }
 0xc68   :  { %v3763_v36 = vadd.f32 %v3761_v35, %v3754_v1 }
 0xc6a   :  { %v3768_v38 = vadd.f32 %v3766_v37, %v3763_v36 }
 0xc6c   :  { %v3769_v32 = vadd.f32 %v3768_v38, %v3683_v42 }
 0xc6f   :  { %v3847_v40 = vpop.permute.xlu1 %3846  ;;  %v3852_v44 = vpop.permute.xlu0 %3851 }
 0xc70   :  { %v3849_v43 = vadd.f32 %v3847_v40, %v3840_v5 }
 0xc72   :  { %v3854_v46 = vadd.f32 %v3852_v44, %v3849_v43 }
 0xc74   :  { %v3855_v47 = vadd.f32 %v3854_v46, %v3769_v32 }
 0xc77   :  { %v4019_v41 = vpop.permute.xlu1 %4018 }
 0xc78   :  { %v4021_v52 = vadd.f32 %v4019_v41, %v4012_v20 }
 0xc88   :  { %v3933_v48 = vpop.permute.xlu1 %3932  ;;  %v3938_v39 = vpop.permute.xlu0 %3937 }
 0xc89   :  { %v3935_v50 = vadd.f32 %v3933_v48, %v3926_v28 }
 0xc8b   :  { %v3940_v53 = vadd.f32 %v3938_v39, %v3935_v50 }
 0xc8c   :  { %v3337_v49 = vpop.permute.xlu1 %3336  ;;  %v4024_v56 = vpop.permute.xlu0 %4023 }
 0xc8d   :  { %v3941_v54 = vadd.f32 %v3940_v53, %v3855_v47  ;;  %v4026_v57 = vadd.f32 %v4024_v56, %v4021_v52  ;;  %v3339_v58 = vadd.f32 %v3337_v49, %v6010_v51 }
 0xc8f   :  { %v4027_v26 = vadd.f32 %v4026_v57, %v3941_v54 }
 0xc90   :  { %v3342_v6 = vpop.permute.xlu1 %3341 }
 0xc91   :  { %v3344_v25 = vadd.f32 %v3342_v6, %v3339_v58  ;;  %v4032_v59 = vrot.slane %v4027_v26, %v4031_v60 }
 0xc93   :  { %v3345_v7 = vadd.f32 %v3344_v25, %v6015_v22 }
 0xc95   :  { %v4034_v62 = vsel %vm990_vm5, %v3345_v7, %v4032_v59 }
 0xc96   :  { %v4036_v63 = vsel %vm4035_vm11, %v4034_v62, -inf }
 0xc97   :  { %4037 = vmax.xlane.f32.xlu1 %v4036_v63 }
 0xcc6   :  { %v2988_v45 = vpop.xlane.xlu0 %2987 }
 0xcc7   :  { %v2989_v0 = vsub.f32 %v2984_v11, %v2988_v45 }
 0xcc9   :  { %v2990_v9 = vmul.f32 1.442695, %v2989_v0 }
 0xcca   :  { %v3672_v8 = vpop.xlane.xlu0 %3671 }
 0xccb   :  { %5126 = vpow2.f32 %v2990_v9  ;;  %v3673_v61 = vsub.f32 %v3669_v33, %v3672_v8 }
 0xccd   :  { %v3674_v51 = vmul.f32 1.442695, %v3673_v61 }
 0xccf   :  { %5128 = vpow2.f32 %v3674_v51 }
 0xcd5   :  { %v5127_v10 = vpop.eup %5126 }
 0xcd6   :  { %v2992_v1 = vsel %vm2985_vm10, %v5127_v10, 0.0 }
 0xcd7   :  { %2993 = vadd.xlane.f32.xlu0 %v2992_v1 }
 0xcd9   :  { %v5129_v4 = vpop.eup %5128 }
 0xcda   :  { %v3676_v22 = vsel %vm2985_vm10, %v5129_v4, 0.0 }
 0xcdb   :  { %3677 = vadd.xlane.f32.xlu0 %v3676_v22 }
 0xd24   :  { %v4038_v15 = vpop.xlane.xlu1 %4037 }
 0xd25   :  { %v4039_v3 = vsub.f32 %v4034_v62, %v4038_v15 }
 0xd27   :  { %v4040_v5 = vmul.f32 1.442695, %v4039_v3 }
 0xd29   :  { %5130 = vpow2.f32 %v4040_v5 }
 0xd33   :  { %v5131_v12 = vpop.eup %5130 }
 0xd34   :  { %v4042_v13 = vsel %vm4035_vm11, %v5131_v12, 0.0 }
 0xd35   :  { %4043 = vadd.xlane.f32.xlu1 %v4042_v13 }
 0xd36   :  { %5149 = shalt.err (!%p5146_p4)
}
 0xd37   :  { %s5150_s9 = scalar_lea.hbm %s6091_s5, 2048 }
 0xd38   :  { %p5151_p5 = scmp.ne.s32.totalorder %s6091_s5, %s5150_s9  ;;  %p5154_p6 = scmp.lt.u32.totalorder %s5150_s9, %s6091_s5 }
 0xd3a   :  { %p5156_p7 = pnand %p5154_p6, %p5151_p5 }
 0xd3c   :  { %5159 = shalt.err (!%p5156_p7)
}
 0xd3d   :  { %s5214_s13 = smov 128   ;;  %s5215_s14 = smov 8  }
 0xd3e   :  { %4069 = dma.vmem_to_hbm [thread:$0]  %s4064_s28, 2048, %s6091_s5, [#allocation5], %s5214_s13, %s5214_s13, %s5215_s14  }
 0xd3f   :  { %s5216_s1 = smov [#allocation6]  }
 0xd40   :  { %s4075_s17 = sshll.u32 %s5216_s1, 4  ;;  %s4076_s17 = int_to_ptr.vmem [resolvable:$true] %s4075_s17 }
 0xd41   :  { %s5160_s18 = scalar_lea.vmem %s4076_s17, 3072  ;;  %p5165_p9 = scmp.lt.s32.totalorder %s4076_s17, %s4076_s17 }
 0xd42   :  { %p5161_p8 = scmp.ne.s32.totalorder %s4076_s17, %s5160_s18  ;;  %p5166_p10 = scmp.lt.s32.totalorder %s5160_s18, %s5160_s18 }
 0xd44   :  { %p5167_p11 = por %p5166_p10, %p5165_p9 }
 0xd46   :  { %p5168_p12 = pnand %p5167_p11, %p5161_p8 }
 0xd48   :  { %5171 = shalt.err (!%p5168_p12)
}
 0xd49   :  { %s5172_s21 = scalar_lea.hbm %s6092_s6, 3072 }
 0xd4a   :  { %p5173_p13 = scmp.ne.s32.totalorder %s6092_s6, %s5172_s21  ;;  %p5176_p0 = scmp.lt.u32.totalorder %s5172_s21, %s6092_s6 }
 0xd4c   :  { %p5178_p1 = pnand %p5176_p0, %p5173_p13 }
 0xd4e   :  { %5181 = shalt.err (!%p5178_p1)
}
 0xd4f   :  { %4081 = dma.vmem_to_hbm [thread:$0]  %s4076_s17, 3072, %s6092_s6, [#allocation5], %s5214_s13, %s5214_s13, %s5215_s14  }
 0xd50   :  { %s5217_s6 = smov [#allocation2]  }
 0xd51   :  { %s4054_s29 = sshll.u32 %s5217_s6, 4  ;;  %s4055_s29 = int_to_ptr.vmem [resolvable:$true] %s4054_s29 }
 0xd52   :  { %s5182_s30 = scalar_lea.vmem %s4055_s29, 32  ;;  %p5187_p3 = scmp.lt.s32.totalorder %s4055_s29, %s4055_s29 }
 0xd53   :  { %p5183_p2 = scmp.ne.s32.totalorder %s4055_s29, %s5182_s30  ;;  %p5188_p4 = scmp.lt.s32.totalorder %s5182_s30, %s5182_s30 }
 0xd55   :  { %p5189_p5 = por %p5188_p4, %p5187_p3 }
 0xd57   :  { %p5190_p6 = pnand %p5189_p5, %p5183_p2 }
 0xd64   :  { %v2994_v14 = vpop.xlane.xlu0 %2993 }
 0xd65   :  { %5132 = vrcp.f32 %v2994_v14 }
 0xd68   :  { %v3678_v20 = vpop.xlane.xlu0 %3677 }
 0xd69   :  { %5134 = vrcp.f32 %v3678_v20 }
 0xd6f   :  { %v5133_v23 = vpop.eup %5132 }
 0xd70   :  { %v2996_v24 = vmul.f32 %v5133_v23, %v5127_v10 }
 0xd72   :  { %2997 = vst.msk [vmem:[%s6093_s7] sm:$0x7] %vm2985_vm10, %v2996_v24 }
 0xd73   :  { %v5135_v21 = vpop.eup %5134 }
 0xd74   :  { %v3680_v27 = vmul.f32 %v5135_v21, %v5129_v4 }
 0xd76   :  { %4241 = vst.msk [vmem:[%s6093_s7 + $0x4] sm:$0x7] %vm2985_vm10, %v3680_v27 }
 0xdc2   :  { %v4044_v28 = vpop.xlane.xlu1 %4043 }
 0xdc3   :  { %5136 = vrcp.f32 %v4044_v28 }
 0xdcd   :  { %v5137_v16 = vpop.eup %5136 }
 0xdce   :  { %v4046_v29 = vmul.f32 %v5137_v16, %v5131_v12 }
 0xdd0   :  { %4047 = vst.msk [vmem:[#allocation2] sm:$0x3] %vm4035_vm11, %v4046_v29 }
 0xdd1   :  { %5193 = shalt.err (!%p5190_p6)
}
 0xdd2   :  { %s5194_s7 = scalar_lea.hbm %s6090_s4, 32 }
 0xdd3   :  { %p5195_p7 = scmp.ne.s32.totalorder %s6090_s4, %s5194_s7  ;;  %p5198_p8 = scmp.lt.u32.totalorder %s5194_s7, %s6090_s4 }
 0xdd5   :  { %p5200_p9 = pnand %p5198_p8, %p5195_p7 }
 0xdd7   :  { %5203 = shalt.err (!%p5200_p9)
}
 0xdd8   :  { %4057 = dma.vmem_to_hbm [thread:$0]  %s4055_s29, 32, %s6090_s4, [#allocation3]  }
 0xdd9   :  { %5204 = dma.done.wait [#allocation3], 32  }
 0xdda   :  { %5205 = vsyncadd [#allocation3], 4294967264 }
 0xddb   :  { %5206 = dma.done.wait [#allocation5], 5120  }
 0xddc   :  { %5207 = vsyncadd [#allocation5], 4294962176 }
 0xddd   :  { %4095 = vsyncpa [#allocation3], 1 }
 0xdde   :  { %4096 = vsyncpa [#allocation5], 1 }

</bundles_post_ra>
